<compile_context>
chip_gen: v7x
topology: tpu7x:2x2x1
jax: 0.10.0
libtpu: 0.0.40
codegen_flags: <defaults>
</compile_context>

<pallas_src>
import functools

import jax
import jax.numpy as jnp
from jax.experimental import pallas as pl
from jax.experimental.pallas import tpu as pltpu


def _round_up(n, m):
    return ((n + m - 1) // m) * m


def _pad_gate_cols(w, H, Hp):
    """[rows, 4H] -> [rows, 4Hp]: zero-pad each PyTorch gate block (i|f|g|o) to Hp lanes."""
    if Hp == H:
        return w
    rows = w.shape[0]
    w4 = w.reshape(rows, 4, H)
    w4 = jnp.pad(w4, ((0, 0), (0, 0), (0, Hp - H)))
    return w4.reshape(rows, 4 * Hp)


def _pad_rows(w, Hp):
    """[H, cols] -> [Hp, cols] with zero rows (padded h lanes contribute nothing)."""
    H = w.shape[0]
    if Hp == H:
        return w
    return jnp.pad(w, ((0, Hp - H), (0, 0)))


def _lstm_kernel(x_ref, w0x_ref, b0_ref, wblk_ref, b1_ref, wp_ref, bp_ref,
                 out_ref, xw_ref, h1h_ref, *, seq_len, batch_p):
    T = seq_len
    Bp = batch_p
    Hp = wp_ref.shape[0]
    Op = out_ref.shape[2]

    # ---- Phase 1: batched layer-0 input projection (one bf16 MXU matmul over all T*Bp rows).
    xw = jnp.dot(x_ref[...], w0x_ref[...],
                 preferred_element_type=jnp.float32) + b0_ref[...]
    xw_ref[...] = xw.reshape(T, Bp, 4 * Hp)

    wblk = wblk_ref[...]                                    # [2Hp, 8Hp] bf16, loaded once
    b1b = jnp.broadcast_to(b1_ref[...], (Bp, 4 * Hp))       # hoisted out of the serial loop

    def sg(v):
        # sigmoid(x) == 0.5 * tanh(0.5 x) + 0.5 : one EUP push + one VPU fma.
        return jnp.tanh(v * 0.5) * 0.5 + 0.5

    def gate_act(gates, c_prev):
        # 128-lane-aligned static slices (Hp = 128 per gate): whole-vreg selects.
        i_g = sg(gates[:, 0 * Hp:1 * Hp])
        f_g = sg(gates[:, 1 * Hp:2 * Hp])
        g_g = jnp.tanh(gates[:, 2 * Hp:3 * Hp])
        o_g = sg(gates[:, 3 * Hp:4 * Hp])
        c_new = f_g * c_prev + i_g * g_g
        h_new = o_g * jnp.tanh(c_new)
        return h_new, c_new

    zeros = jnp.zeros((Bp, Hp), jnp.float32)

    # ---- Phase 2 prologue: layer 0, step 0 (h0(-1) = 0, so no recurrent matmul needed).
    h0_0, c0_0 = gate_act(xw_ref[0], zeros)
    h01 = jnp.concatenate([h0_0, zeros], axis=-1).astype(jnp.bfloat16)  # [h0(0) | h1(-1)=0]

    def step(t, carry):
        # carry: h01 = [h0(t) | h1(t-1)] (bf16), c0 = c0(t), c1 = c1(t-1)   (f32)
        h01_c, c0, c1 = carry
        # Single fused MXU push: [ h0 @ Whh0 | h0 @ Wih1 + h1 @ Whh1 ].
        G = jnp.dot(h01_c, wblk, preferred_element_type=jnp.float32)     # [Bp, 8Hp] f32
        # Layer 1, step t.
        h1n, c1n = gate_act(G[:, 4 * Hp:] + b1b, c1)
        h1h_ref[t] = h1n                                                 # aligned [Bp, Hp] store
        # Layer 0, step t+1 (input part precomputed in phase 1; aligned [Bp, 4Hp] load).
        h0n, c0n = gate_act(xw_ref[t + 1] + G[:, :4 * Hp], c0)
        h01_n = jnp.concatenate([h0n, h1n], axis=-1).astype(jnp.bfloat16)
        return (h01_n, c0n, c1n)

    unroll = True if T <= 32 else 8
    h01, c0, c1 = jax.lax.fori_loop(0, T - 1, step, (h01, c0_0, zeros), unroll=unroll)

    # ---- Phase 2 epilogue: layer 1 at step T-1 (layer 0 of step T does not exist).
    g1 = jnp.dot(h01, wblk[:, 4 * Hp:], preferred_element_type=jnp.float32) + b1b
    h1_last, _ = gate_act(g1, c1)
    h1h_ref[T - 1] = h1_last

    # ---- Phase 3: batched output projection, single lane-dense (Op = 128) store.
    h1h = h1h_ref[...].astype(jnp.bfloat16).reshape(T * Bp, Hp)
    res = jnp.dot(h1h, wp_ref[...], preferred_element_type=jnp.float32) + bp_ref[...]
    out_ref[...] = res.reshape(T, Bp, Op)


def temporal_encoder_pallas(x, params):
    """x: [B, T, in_dim] (batch-first, like the PyTorch module). Returns [B, T, 1, out_dim]."""
    B, T, in_dim = x.shape
    H = params["whh0_T"].shape[0]
    O = params["wp_T"].shape[1]
    Hp = _round_up(H, 128)          # each gate occupies a full 128-lane group
    Op = _round_up(O, 128)          # lane-dense output store
    Bp = _round_up(B, 8)            # sublane-aligned per-step batch tile
    in_p = _round_up(in_dim, 128)   # lane-dense matmul contraction dim

    # Time-major, batch/feature zero-padded, flattened to [T*Bp, in_p] (row = t*Bp + b), bf16.
    x_tm = jnp.transpose(x, (1, 0, 2)).astype(jnp.float32)
    x_tm = jnp.pad(x_tm, ((0, 0), (0, Bp - B), (0, in_p - in_dim)))
    x2 = x_tm.reshape(T * Bp, in_p).astype(jnp.bfloat16)

    # Gate-padded / row-padded weights (zero padding; padded h/c lanes stay exactly 0).
    w0x = _pad_gate_cols(params["wih0_T"], H, Hp)                       # [in, 4Hp]
    w0x = jnp.pad(w0x, ((0, in_p - in_dim), (0, 0))).astype(jnp.bfloat16)   # [in_p, 4Hp]
    b0p = _pad_gate_cols(params["b0"], H, Hp).astype(jnp.float32)       # [1, 4Hp]

    w0h = _pad_gate_cols(_pad_rows(params["whh0_T"], Hp), H, Hp)        # [Hp, 4Hp]
    wih1 = _pad_gate_cols(_pad_rows(params["wih1_T"], Hp), H, Hp)       # [Hp, 4Hp]
    whh1 = _pad_gate_cols(_pad_rows(params["whh1_T"], Hp), H, Hp)       # [Hp, 4Hp]
    # Block weight for the retimed single-matmul step: [[Whh0, Wih1], [0, Whh1]].
    wblk = jnp.concatenate(
        [jnp.concatenate([w0h, wih1], axis=1),
         jnp.concatenate([jnp.zeros_like(whh1), whh1], axis=1)],
        axis=0).astype(jnp.bfloat16)                                    # [2Hp, 8Hp]
    b1p = _pad_gate_cols(params["b1"], H, Hp).astype(jnp.float32)       # [1, 4Hp]

    wpp = jnp.pad(params["wp_T"], ((0, Hp - H), (0, Op - O))).astype(jnp.bfloat16)  # [Hp, Op]
    bpp = jnp.pad(params["bp"], ((0, 0), (0, Op - O))).astype(jnp.float32)          # [1, Op]

    kernel = functools.partial(_lstm_kernel, seq_len=T, batch_p=Bp)

    # Explicit VMEM budget (matters on v7x's 64 MiB physical / 32 MiB scoped default).
    vmem_bytes = (x2.size * 2 + w0x.size * 2 + wblk.size * 2 + wpp.size * 2
                  + (b0p.size + b1p.size + bpp.size) * 4
                  + T * Bp * 4 * Hp * 4          # xw scratch (f32)
                  + T * Bp * Hp * 4              # h1 history scratch (f32)
                  + T * Bp * Op * 4)             # output
    vmem_limit = int(min(96 * 2**20, max(8 * 2**20, 2 * vmem_bytes)))

    out3 = pl.pallas_call(
        kernel,
        out_shape=jax.ShapeDtypeStruct((T, Bp, Op), jnp.float32),
        in_specs=[pl.BlockSpec(memory_space=pltpu.MemorySpace.VMEM)] * 7,
        out_specs=pl.BlockSpec(memory_space=pltpu.MemorySpace.VMEM),
        scratch_shapes=[
            pltpu.VMEM((T, Bp, 4 * Hp), jnp.float32),   # precomputed x @ Wih0 + b0
            pltpu.VMEM((T, Bp, Hp), jnp.float32),       # h1 history for batched projection
        ],
        compiler_params=pltpu.CompilerParams(vmem_limit_bytes=vmem_limit),
    )(x2, w0x, b0p, wblk, b1p, wpp, bpp)

    # [T, Bp, Op] -> [B, T, 1, O]  (matches torch.stack([B,1,O] ...) on dim=1)
    return out3[:, :B, :O].transpose(1, 0, 2)[:, :, None, :]


def temporal_encoder_ref(x, params):
    """Pure-JAX reference (same math, unpadded, f32) for the correctness check."""
    B, T, _ = x.shape
    H = params["whh0_T"].shape[0]

    def cell(x_in, h, c, wih, whh, b):
        g = x_in @ wih + h @ whh + b
        i = jax.nn.sigmoid(g[:, 0 * H:1 * H])
        f = jax.nn.sigmoid(g[:, 1 * H:2 * H])
        gg = jnp.tanh(g[:, 2 * H:3 * H])
        o = jax.nn.sigmoid(g[:, 3 * H:4 * H])
        c_new = f * c + i * gg
        return o * jnp.tanh(c_new), c_new

    def step(carry, x_t):
        h0, c0, h1, c1 = carry
        h0, c0 = cell(x_t, h0, c0, params["wih0_T"], params["whh0_T"], params["b0"])
        h1, c1 = cell(h0, h1, c1, params["wih1_T"], params["whh1_T"], params["b1"])
        y = h1 @ params["wp_T"] + params["bp"]
        return (h0, c0, h1, c1), y

    init = tuple(jnp.zeros((B, H), jnp.float32) for _ in range(4))
    _, ys = jax.lax.scan(step, init, jnp.transpose(x, (1, 0, 2)))
    return jnp.transpose(ys, (1, 0, 2))[:, :, None, :]


def make_params(key, in_dim, hid_dim, out_dim):
    """Deterministic synthetic parameters (PyTorch-style uniform(-1/sqrt(H), 1/sqrt(H)))."""
    ks = jax.random.split(key, 12)
    s = 1.0 / jnp.sqrt(hid_dim)
    u = lambda k, shape: jax.random.uniform(k, shape, jnp.float32, -s, s)
    params = {
        # stored pre-transposed so kernels do [B,in] @ [in,4H]
        "wih0_T": u(ks[0], (in_dim, 4 * hid_dim)),
        "whh0_T": u(ks[1], (hid_dim, 4 * hid_dim)),
        "b0":     (u(ks[2], (1, 4 * hid_dim)) + u(ks[3], (1, 4 * hid_dim))),  # b_ih + b_hh
        "wih1_T": u(ks[4], (hid_dim, 4 * hid_dim)),
        "whh1_T": u(ks[5], (hid_dim, 4 * hid_dim)),
        "b1":     (u(ks[6], (1, 4 * hid_dim)) + u(ks[7], (1, 4 * hid_dim))),
        "wp_T":   u(ks[8], (hid_dim, out_dim)),
        "bp":     u(ks[9], (1, out_dim)),
    }
    return params


if __name__ == "__main__":
    B, T, in_dim, hid_dim, out_dim = 2, 8, 16, 32, 8

    key = jax.random.PRNGKey(0)
    k_x, k_p = jax.random.split(key)
    x = jax.random.normal(k_x, (B, T, in_dim), jnp.float32)
    params = make_params(k_p, in_dim, hid_dim, out_dim)

    out = jax.block_until_ready(temporal_encoder_pallas(x, params))
    assert out.shape == (B, T, 1, out_dim), out.shape

    ref = jax.block_until_ready(temporal_encoder_ref(x, params))
    assert jnp.allclose(out, ref, atol=5e-2, rtol=5e-2), \
        float(jnp.max(jnp.abs(out - ref)))

    print("KERNEL_OK")
</pallas_src>

<mosaic_0001>
module attributes {stable_mosaic.version = 11 : i64} {
  func.func @_lstm_kernel(%arg0: memref<64x128xbf16, #tpu.memory_space<vmem>>, %arg1: memref<128x512xbf16, #tpu.memory_space<vmem>>, %arg2: memref<1x512xf32, #tpu.memory_space<vmem>>, %arg3: memref<256x1024xbf16, #tpu.memory_space<vmem>>, %arg4: memref<1x512xf32, #tpu.memory_space<vmem>>, %arg5: memref<128x128xbf16, #tpu.memory_space<vmem>>, %arg6: memref<1x128xf32, #tpu.memory_space<vmem>>, %arg7: memref<8x8x128xf32, #tpu.memory_space<vmem>>, %arg8: memref<8x8x512xf32, #tpu.memory_space<vmem>>, %arg9: memref<8x8x128xf32, #tpu.memory_space<vmem>>) attributes {dimension_semantics = [], scalar_prefetch = 0 : i64, scratch_operands = 2 : i64, tpu.core_type = #tpu.core_type<tc>} {
    %c0 = arith.constant 0 : index
    %c0_0 = arith.constant 0 : index
    %0 = vector.load %arg0[%c0, %c0_0] : memref<64x128xbf16, #tpu.memory_space<vmem>>, vector<64x128xbf16>
    %c0_1 = arith.constant 0 : index
    %c0_2 = arith.constant 0 : index
    %1 = vector.load %arg1[%c0_1, %c0_2] : memref<128x512xbf16, #tpu.memory_space<vmem>>, vector<128x512xbf16>
    %cst = arith.constant dense<0.000000e+00> : vector<64x512xf32>
    %2 = tpu.matmul %0, %1, %cst {dimension_numbers = #tpu.dot_dimension_numbers<[1], [0], [0], [1], [0, 0, 1, 1], [], []>} : vector<64x128xbf16>, vector<128x512xbf16>, vector<64x512xf32> -> vector<64x512xf32>
    %c0_3 = arith.constant 0 : index
    %c0_4 = arith.constant 0 : index
    %3 = vector.load %arg2[%c0_3, %c0_4] : memref<1x512xf32, #tpu.memory_space<vmem>>, vector<1x512xf32>
    %4 = vector.broadcast %3 : vector<1x512xf32> to vector<64x512xf32>
    %5 = arith.addf %2, %4 : vector<64x512xf32>
    %6 = vector.shape_cast %5 : vector<64x512xf32> to vector<8x8x512xf32>
    %c0_5 = arith.constant 0 : index
    %c0_6 = arith.constant 0 : index
    %c0_7 = arith.constant 0 : index
    %7 = vector.load %arg8[%c0_5, %c0_6, %c0_7] : memref<8x8x512xf32, #tpu.memory_space<vmem>>, vector<8x8x512xf32>
    tpu.vector_store %arg8[%c0_5, %c0_6, %c0_7], %6 {strides = array<i32>} : memref<8x8x512xf32, #tpu.memory_space<vmem>>, vector<8x8x512xf32>,
    %c0_8 = arith.constant 0 : index
    %c0_9 = arith.constant 0 : index
    %8 = vector.load %arg3[%c0_8, %c0_9] : memref<256x1024xbf16, #tpu.memory_space<vmem>>, vector<256x1024xbf16>
    %c0_10 = arith.constant 0 : index
    %c0_11 = arith.constant 0 : index
    %9 = vector.load %arg4[%c0_10, %c0_11] : memref<1x512xf32, #tpu.memory_space<vmem>>, vector<1x512xf32>
    %10 = vector.shape_cast %9 : vector<1x512xf32> to vector<1x512xf32>
    %11 = vector.broadcast %10 : vector<1x512xf32> to vector<8x512xf32>
    %cst_12 = arith.constant 0.000000e+00 : f32
    %12 = vector.broadcast %cst_12 : f32 to vector<8x128xf32>
    %c0_13 = arith.constant 0 : index
    %c0_14 = arith.constant 0 : index
    %c0_15 = arith.constant 0 : index
    %13 = vector.load %arg8[%c0_13, %c0_14, %c0_15] : memref<8x8x512xf32, #tpu.memory_space<vmem>>, vector<1x8x512xf32>
    %14 = vector.shape_cast %13 : vector<1x8x512xf32> to vector<8x512xf32>
    %15 = vector.extract_strided_slice %14 {offsets = [0, 0], sizes = [8, 128], strides = [1, 1]} : vector<8x512xf32> to vector<8x128xf32>
    %cst_16 = arith.constant 5.000000e-01 : f32
    %16 = vector.broadcast %cst_16 : f32 to vector<8x128xf32>
    %17 = arith.mulf %15, %16 : vector<8x128xf32>
    %18 = math.tanh %17 : vector<8x128xf32>
    %cst_17 = arith.constant 5.000000e-01 : f32
    %19 = vector.broadcast %cst_17 : f32 to vector<8x128xf32>
    %20 = arith.mulf %18, %19 : vector<8x128xf32>
    %cst_18 = arith.constant 5.000000e-01 : f32
    %21 = vector.broadcast %cst_18 : f32 to vector<8x128xf32>
    %22 = arith.addf %20, %21 : vector<8x128xf32>
    %23 = vector.extract_strided_slice %14 {offsets = [0, 128], sizes = [8, 128], strides = [1, 1]} : vector<8x512xf32> to vector<8x128xf32>
    %cst_19 = arith.constant 5.000000e-01 : f32
    %24 = vector.broadcast %cst_19 : f32 to vector<8x128xf32>
    %25 = arith.mulf %23, %24 : vector<8x128xf32>
    %26 = math.tanh %25 : vector<8x128xf32>
    %cst_20 = arith.constant 5.000000e-01 : f32
    %27 = vector.broadcast %cst_20 : f32 to vector<8x128xf32>
    %28 = arith.mulf %26, %27 : vector<8x128xf32>
    %cst_21 = arith.constant 5.000000e-01 : f32
    %29 = vector.broadcast %cst_21 : f32 to vector<8x128xf32>
    %30 = arith.addf %28, %29 : vector<8x128xf32>
    %31 = vector.extract_strided_slice %14 {offsets = [0, 256], sizes = [8, 128], strides = [1, 1]} : vector<8x512xf32> to vector<8x128xf32>
    %32 = math.tanh %31 : vector<8x128xf32>
    %33 = vector.extract_strided_slice %14 {offsets = [0, 384], sizes = [8, 128], strides = [1, 1]} : vector<8x512xf32> to vector<8x128xf32>
    %cst_22 = arith.constant 5.000000e-01 : f32
    %34 = vector.broadcast %cst_22 : f32 to vector<8x128xf32>
    %35 = arith.mulf %33, %34 : vector<8x128xf32>
    %36 = math.tanh %35 : vector<8x128xf32>
    %cst_23 = arith.constant 5.000000e-01 : f32
    %37 = vector.broadcast %cst_23 : f32 to vector<8x128xf32>
    %38 = arith.mulf %36, %37 : vector<8x128xf32>
    %cst_24 = arith.constant 5.000000e-01 : f32
    %39 = vector.broadcast %cst_24 : f32 to vector<8x128xf32>
    %40 = arith.addf %38, %39 : vector<8x128xf32>
    %41 = arith.mulf %30, %12 : vector<8x128xf32>
    %42 = arith.mulf %22, %32 : vector<8x128xf32>
    %43 = arith.addf %41, %42 : vector<8x128xf32>
    %44 = math.tanh %43 : vector<8x128xf32>
    %45 = arith.mulf %40, %44 : vector<8x128xf32>
    %46 = tpu.concatenate %45, %12 in 1 : vector<8x128xf32>, vector<8x128xf32> -> vector<8x256xf32>
    %47 = arith.truncf %46 : vector<8x256xf32> to vector<8x256xbf16>
    %c0_i32 = arith.constant 0 : i32
    %cst_25 = arith.constant dense<0.000000e+00> : vector<8x1024xf32>
    %48 = tpu.matmul %47, %8, %cst_25 {dimension_numbers = #tpu.dot_dimension_numbers<[1], [0], [0], [1], [0, 0, 1, 1], [], []>} : vector<8x256xbf16>, vector<256x1024xbf16>, vector<8x1024xf32> -> vector<8x1024xf32>
    %49 = vector.extract_strided_slice %48 {offsets = [0, 512], sizes = [8, 512], strides = [1, 1]} : vector<8x1024xf32> to vector<8x512xf32>
    %50 = arith.addf %49, %11 : vector<8x512xf32>
    %51 = vector.extract_strided_slice %50 {offsets = [0, 0], sizes = [8, 128], strides = [1, 1]} : vector<8x512xf32> to vector<8x128xf32>
    %cst_26 = arith.constant 5.000000e-01 : f32
    %52 = vector.broadcast %cst_26 : f32 to vector<8x128xf32>
    %53 = arith.mulf %51, %52 : vector<8x128xf32>
    %54 = math.tanh %53 : vector<8x128xf32>
    %cst_27 = arith.constant 5.000000e-01 : f32
    %55 = vector.broadcast %cst_27 : f32 to vector<8x128xf32>
    %56 = arith.mulf %54, %55 : vector<8x128xf32>
    %cst_28 = arith.constant 5.000000e-01 : f32
    %57 = vector.broadcast %cst_28 : f32 to vector<8x128xf32>
    %58 = arith.addf %56, %57 : vector<8x128xf32>
    %59 = vector.extract_strided_slice %50 {offsets = [0, 128], sizes = [8, 128], strides = [1, 1]} : vector<8x512xf32> to vector<8x128xf32>
    %cst_29 = arith.constant 5.000000e-01 : f32
    %60 = vector.broadcast %cst_29 : f32 to vector<8x128xf32>
    %61 = arith.mulf %59, %60 : vector<8x128xf32>
    %62 = math.tanh %61 : vector<8x128xf32>
    %cst_30 = arith.constant 5.000000e-01 : f32
    %63 = vector.broadcast %cst_30 : f32 to vector<8x128xf32>
    %64 = arith.mulf %62, %63 : vector<8x128xf32>
    %cst_31 = arith.constant 5.000000e-01 : f32
    %65 = vector.broadcast %cst_31 : f32 to vector<8x128xf32>
    %66 = arith.addf %64, %65 : vector<8x128xf32>
    %67 = vector.extract_strided_slice %50 {offsets = [0, 256], sizes = [8, 128], strides = [1, 1]} : vector<8x512xf32> to vector<8x128xf32>
    %68 = math.tanh %67 : vector<8x128xf32>
    %69 = vector.extract_strided_slice %50 {offsets = [0, 384], sizes = [8, 128], strides = [1, 1]} : vector<8x512xf32> to vector<8x128xf32>
    %cst_32 = arith.constant 5.000000e-01 : f32
    %70 = vector.broadcast %cst_32 : f32 to vector<8x128xf32>
    %71 = arith.mulf %69, %70 : vector<8x128xf32>
    %72 = math.tanh %71 : vector<8x128xf32>
    %cst_33 = arith.constant 5.000000e-01 : f32
    %73 = vector.broadcast %cst_33 : f32 to vector<8x128xf32>
    %74 = arith.mulf %72, %73 : vector<8x128xf32>
    %cst_34 = arith.constant 5.000000e-01 : f32
    %75 = vector.broadcast %cst_34 : f32 to vector<8x128xf32>
    %76 = arith.addf %74, %75 : vector<8x128xf32>
    %77 = arith.mulf %66, %12 : vector<8x128xf32>
    %78 = arith.mulf %58, %68 : vector<8x128xf32>
    %79 = arith.addf %77, %78 : vector<8x128xf32>
    %80 = math.tanh %79 : vector<8x128xf32>
    %81 = arith.mulf %76, %80 : vector<8x128xf32>
    %82 = arith.index_cast %c0_i32 : i32 to index
    %c0_35 = arith.constant 0 : index
    %c0_36 = arith.constant 0 : index
    %83 = vector.load %arg9[%82, %c0_35, %c0_36] : memref<8x8x128xf32, #tpu.memory_space<vmem>>, vector<1x8x128xf32>
    %84 = vector.shape_cast %83 : vector<1x8x128xf32> to vector<8x128xf32>
    %85 = vector.shape_cast %81 : vector<8x128xf32> to vector<1x8x128xf32>
    tpu.vector_store %arg9[%82, %c0_35, %c0_36], %85 {strides = array<i32>} : memref<8x8x128xf32, #tpu.memory_space<vmem>>, vector<1x8x128xf32>,
    %c1_i32 = arith.constant 1 : i32
    %86 = arith.addi %c0_i32, %c1_i32 : i32
    %87 = arith.index_cast %86 : i32 to index
    %c0_37 = arith.constant 0 : index
    %c0_38 = arith.constant 0 : index
    %88 = vector.load %arg8[%87, %c0_37, %c0_38] : memref<8x8x512xf32, #tpu.memory_space<vmem>>, vector<1x8x512xf32>
    %89 = vector.shape_cast %88 : vector<1x8x512xf32> to vector<8x512xf32>
    %90 = vector.extract_strided_slice %48 {offsets = [0, 0], sizes = [8, 512], strides = [1, 1]} : vector<8x1024xf32> to vector<8x512xf32>
    %91 = arith.addf %89, %90 : vector<8x512xf32>
    %92 = vector.extract_strided_slice %91 {offsets = [0, 0], sizes = [8, 128], strides = [1, 1]} : vector<8x512xf32> to vector<8x128xf32>
    %cst_39 = arith.constant 5.000000e-01 : f32
    %93 = vector.broadcast %cst_39 : f32 to vector<8x128xf32>
    %94 = arith.mulf %92, %93 : vector<8x128xf32>
    %95 = math.tanh %94 : vector<8x128xf32>
    %cst_40 = arith.constant 5.000000e-01 : f32
    %96 = vector.broadcast %cst_40 : f32 to vector<8x128xf32>
    %97 = arith.mulf %95, %96 : vector<8x128xf32>
    %cst_41 = arith.constant 5.000000e-01 : f32
    %98 = vector.broadcast %cst_41 : f32 to vector<8x128xf32>
    %99 = arith.addf %97, %98 : vector<8x128xf32>
    %100 = vector.extract_strided_slice %91 {offsets = [0, 128], sizes = [8, 128], strides = [1, 1]} : vector<8x512xf32> to vector<8x128xf32>
    %cst_42 = arith.constant 5.000000e-01 : f32
    %101 = vector.broadcast %cst_42 : f32 to vector<8x128xf32>
    %102 = arith.mulf %100, %101 : vector<8x128xf32>
    %103 = math.tanh %102 : vector<8x128xf32>
    %cst_43 = arith.constant 5.000000e-01 : f32
    %104 = vector.broadcast %cst_43 : f32 to vector<8x128xf32>
    %105 = arith.mulf %103, %104 : vector<8x128xf32>
    %cst_44 = arith.constant 5.000000e-01 : f32
    %106 = vector.broadcast %cst_44 : f32 to vector<8x128xf32>
    %107 = arith.addf %105, %106 : vector<8x128xf32>
    %108 = vector.extract_strided_slice %91 {offsets = [0, 256], sizes = [8, 128], strides = [1, 1]} : vector<8x512xf32> to vector<8x128xf32>
    %109 = math.tanh %108 : vector<8x128xf32>
    %110 = vector.extract_strided_slice %91 {offsets = [0, 384], sizes = [8, 128], strides = [1, 1]} : vector<8x512xf32> to vector<8x128xf32>
    %cst_45 = arith.constant 5.000000e-01 : f32
    %111 = vector.broadcast %cst_45 : f32 to vector<8x128xf32>
    %112 = arith.mulf %110, %111 : vector<8x128xf32>
    %113 = math.tanh %112 : vector<8x128xf32>
    %cst_46 = arith.constant 5.000000e-01 : f32
    %114 = vector.broadcast %cst_46 : f32 to vector<8x128xf32>
    %115 = arith.mulf %113, %114 : vector<8x128xf32>
    %cst_47 = arith.constant 5.000000e-01 : f32
    %116 = vector.broadcast %cst_47 : f32 to vector<8x128xf32>
    %117 = arith.addf %115, %116 : vector<8x128xf32>
    %118 = arith.mulf %107, %43 : vector<8x128xf32>
    %119 = arith.mulf %99, %109 : vector<8x128xf32>
    %120 = arith.addf %118, %119 : vector<8x128xf32>
    %121 = math.tanh %120 : vector<8x128xf32>
    %122 = arith.mulf %117, %121 : vector<8x128xf32>
    %123 = tpu.concatenate %122, %81 in 1 : vector<8x128xf32>, vector<8x128xf32> -> vector<8x256xf32>
    %124 = arith.truncf %123 : vector<8x256xf32> to vector<8x256xbf16>
    %c1_i32_48 = arith.constant 1 : i32
    %cst_49 = arith.constant dense<0.000000e+00> : vector<8x1024xf32>
    %125 = tpu.matmul %124, %8, %cst_49 {dimension_numbers = #tpu.dot_dimension_numbers<[1], [0], [0], [1], [0, 0, 1, 1], [], []>} : vector<8x256xbf16>, vector<256x1024xbf16>, vector<8x1024xf32> -> vector<8x1024xf32>
    %126 = vector.extract_strided_slice %125 {offsets = [0, 512], sizes = [8, 512], strides = [1, 1]} : vector<8x1024xf32> to vector<8x512xf32>
    %127 = arith.addf %126, %11 : vector<8x512xf32>
    %128 = vector.extract_strided_slice %127 {offsets = [0, 0], sizes = [8, 128], strides = [1, 1]} : vector<8x512xf32> to vector<8x128xf32>
    %cst_50 = arith.constant 5.000000e-01 : f32
    %129 = vector.broadcast %cst_50 : f32 to vector<8x128xf32>
    %130 = arith.mulf %128, %129 : vector<8x128xf32>
    %131 = math.tanh %130 : vector<8x128xf32>
    %cst_51 = arith.constant 5.000000e-01 : f32
    %132 = vector.broadcast %cst_51 : f32 to vector<8x128xf32>
    %133 = arith.mulf %131, %132 : vector<8x128xf32>
    %cst_52 = arith.constant 5.000000e-01 : f32
    %134 = vector.broadcast %cst_52 : f32 to vector<8x128xf32>
    %135 = arith.addf %133, %134 : vector<8x128xf32>
    %136 = vector.extract_strided_slice %127 {offsets = [0, 128], sizes = [8, 128], strides = [1, 1]} : vector<8x512xf32> to vector<8x128xf32>
    %cst_53 = arith.constant 5.000000e-01 : f32
    %137 = vector.broadcast %cst_53 : f32 to vector<8x128xf32>
    %138 = arith.mulf %136, %137 : vector<8x128xf32>
    %139 = math.tanh %138 : vector<8x128xf32>
    %cst_54 = arith.constant 5.000000e-01 : f32
    %140 = vector.broadcast %cst_54 : f32 to vector<8x128xf32>
    %141 = arith.mulf %139, %140 : vector<8x128xf32>
    %cst_55 = arith.constant 5.000000e-01 : f32
    %142 = vector.broadcast %cst_55 : f32 to vector<8x128xf32>
    %143 = arith.addf %141, %142 : vector<8x128xf32>
    %144 = vector.extract_strided_slice %127 {offsets = [0, 256], sizes = [8, 128], strides = [1, 1]} : vector<8x512xf32> to vector<8x128xf32>
    %145 = math.tanh %144 : vector<8x128xf32>
    %146 = vector.extract_strided_slice %127 {offsets = [0, 384], sizes = [8, 128], strides = [1, 1]} : vector<8x512xf32> to vector<8x128xf32>
    %cst_56 = arith.constant 5.000000e-01 : f32
    %147 = vector.broadcast %cst_56 : f32 to vector<8x128xf32>
    %148 = arith.mulf %146, %147 : vector<8x128xf32>
    %149 = math.tanh %148 : vector<8x128xf32>
    %cst_57 = arith.constant 5.000000e-01 : f32
    %150 = vector.broadcast %cst_57 : f32 to vector<8x128xf32>
    %151 = arith.mulf %149, %150 : vector<8x128xf32>
    %cst_58 = arith.constant 5.000000e-01 : f32
    %152 = vector.broadcast %cst_58 : f32 to vector<8x128xf32>
    %153 = arith.addf %151, %152 : vector<8x128xf32>
    %154 = arith.mulf %143, %79 : vector<8x128xf32>
    %155 = arith.mulf %135, %145 : vector<8x128xf32>
    %156 = arith.addf %154, %155 : vector<8x128xf32>
    %157 = math.tanh %156 : vector<8x128xf32>
    %158 = arith.mulf %153, %157 : vector<8x128xf32>
    %159 = arith.index_cast %c1_i32_48 : i32 to index
    %c0_59 = arith.constant 0 : index
    %c0_60 = arith.constant 0 : index
    %160 = vector.load %arg9[%159, %c0_59, %c0_60] : memref<8x8x128xf32, #tpu.memory_space<vmem>>, vector<1x8x128xf32>
    %161 = vector.shape_cast %160 : vector<1x8x128xf32> to vector<8x128xf32>
    %162 = vector.shape_cast %158 : vector<8x128xf32> to vector<1x8x128xf32>
    tpu.vector_store %arg9[%159, %c0_59, %c0_60], %162 {strides = array<i32>} : memref<8x8x128xf32, #tpu.memory_space<vmem>>, vector<1x8x128xf32>,
    %c1_i32_61 = arith.constant 1 : i32
    %163 = arith.addi %c1_i32_48, %c1_i32_61 : i32
    %164 = arith.index_cast %163 : i32 to index
    %c0_62 = arith.constant 0 : index
    %c0_63 = arith.constant 0 : index
    %165 = vector.load %arg8[%164, %c0_62, %c0_63] : memref<8x8x512xf32, #tpu.memory_space<vmem>>, vector<1x8x512xf32>
    %166 = vector.shape_cast %165 : vector<1x8x512xf32> to vector<8x512xf32>
    %167 = vector.extract_strided_slice %125 {offsets = [0, 0], sizes = [8, 512], strides = [1, 1]} : vector<8x1024xf32> to vector<8x512xf32>
    %168 = arith.addf %166, %167 : vector<8x512xf32>
    %169 = vector.extract_strided_slice %168 {offsets = [0, 0], sizes = [8, 128], strides = [1, 1]} : vector<8x512xf32> to vector<8x128xf32>
    %cst_64 = arith.constant 5.000000e-01 : f32
    %170 = vector.broadcast %cst_64 : f32 to vector<8x128xf32>
    %171 = arith.mulf %169, %170 : vector<8x128xf32>
    %172 = math.tanh %171 : vector<8x128xf32>
    %cst_65 = arith.constant 5.000000e-01 : f32
    %173 = vector.broadcast %cst_65 : f32 to vector<8x128xf32>
    %174 = arith.mulf %172, %173 : vector<8x128xf32>
    %cst_66 = arith.constant 5.000000e-01 : f32
    %175 = vector.broadcast %cst_66 : f32 to vector<8x128xf32>
    %176 = arith.addf %174, %175 : vector<8x128xf32>
    %177 = vector.extract_strided_slice %168 {offsets = [0, 128], sizes = [8, 128], strides = [1, 1]} : vector<8x512xf32> to vector<8x128xf32>
    %cst_67 = arith.constant 5.000000e-01 : f32
    %178 = vector.broadcast %cst_67 : f32 to vector<8x128xf32>
    %179 = arith.mulf %177, %178 : vector<8x128xf32>
    %180 = math.tanh %179 : vector<8x128xf32>
    %cst_68 = arith.constant 5.000000e-01 : f32
    %181 = vector.broadcast %cst_68 : f32 to vector<8x128xf32>
    %182 = arith.mulf %180, %181 : vector<8x128xf32>
    %cst_69 = arith.constant 5.000000e-01 : f32
    %183 = vector.broadcast %cst_69 : f32 to vector<8x128xf32>
    %184 = arith.addf %182, %183 : vector<8x128xf32>
    %185 = vector.extract_strided_slice %168 {offsets = [0, 256], sizes = [8, 128], strides = [1, 1]} : vector<8x512xf32> to vector<8x128xf32>
    %186 = math.tanh %185 : vector<8x128xf32>
    %187 = vector.extract_strided_slice %168 {offsets = [0, 384], sizes = [8, 128], strides = [1, 1]} : vector<8x512xf32> to vector<8x128xf32>
    %cst_70 = arith.constant 5.000000e-01 : f32
    %188 = vector.broadcast %cst_70 : f32 to vector<8x128xf32>
    %189 = arith.mulf %187, %188 : vector<8x128xf32>
    %190 = math.tanh %189 : vector<8x128xf32>
    %cst_71 = arith.constant 5.000000e-01 : f32
    %191 = vector.broadcast %cst_71 : f32 to vector<8x128xf32>
    %192 = arith.mulf %190, %191 : vector<8x128xf32>
    %cst_72 = arith.constant 5.000000e-01 : f32
    %193 = vector.broadcast %cst_72 : f32 to vector<8x128xf32>
    %194 = arith.addf %192, %193 : vector<8x128xf32>
    %195 = arith.mulf %184, %120 : vector<8x128xf32>
    %196 = arith.mulf %176, %186 : vector<8x128xf32>
    %197 = arith.addf %195, %196 : vector<8x128xf32>
    %198 = math.tanh %197 : vector<8x128xf32>
    %199 = arith.mulf %194, %198 : vector<8x128xf32>
    %200 = tpu.concatenate %199, %158 in 1 : vector<8x128xf32>, vector<8x128xf32> -> vector<8x256xf32>
    %201 = arith.truncf %200 : vector<8x256xf32> to vector<8x256xbf16>
    %c2_i32 = arith.constant 2 : i32
    %cst_73 = arith.constant dense<0.000000e+00> : vector<8x1024xf32>
    %202 = tpu.matmul %201, %8, %cst_73 {dimension_numbers = #tpu.dot_dimension_numbers<[1], [0], [0], [1], [0, 0, 1, 1], [], []>} : vector<8x256xbf16>, vector<256x1024xbf16>, vector<8x1024xf32> -> vector<8x1024xf32>
    %203 = vector.extract_strided_slice %202 {offsets = [0, 512], sizes = [8, 512], strides = [1, 1]} : vector<8x1024xf32> to vector<8x512xf32>
    %204 = arith.addf %203, %11 : vector<8x512xf32>
    %205 = vector.extract_strided_slice %204 {offsets = [0, 0], sizes = [8, 128], strides = [1, 1]} : vector<8x512xf32> to vector<8x128xf32>
    %cst_74 = arith.constant 5.000000e-01 : f32
    %206 = vector.broadcast %cst_74 : f32 to vector<8x128xf32>
    %207 = arith.mulf %205, %206 : vector<8x128xf32>
    %208 = math.tanh %207 : vector<8x128xf32>
    %cst_75 = arith.constant 5.000000e-01 : f32
    %209 = vector.broadcast %cst_75 : f32 to vector<8x128xf32>
    %210 = arith.mulf %208, %209 : vector<8x128xf32>
    %cst_76 = arith.constant 5.000000e-01 : f32
    %211 = vector.broadcast %cst_76 : f32 to vector<8x128xf32>
    %212 = arith.addf %210, %211 : vector<8x128xf32>
    %213 = vector.extract_strided_slice %204 {offsets = [0, 128], sizes = [8, 128], strides = [1, 1]} : vector<8x512xf32> to vector<8x128xf32>
    %cst_77 = arith.constant 5.000000e-01 : f32
    %214 = vector.broadcast %cst_77 : f32 to vector<8x128xf32>
    %215 = arith.mulf %213, %214 : vector<8x128xf32>
    %216 = math.tanh %215 : vector<8x128xf32>
    %cst_78 = arith.constant 5.000000e-01 : f32
    %217 = vector.broadcast %cst_78 : f32 to vector<8x128xf32>
    %218 = arith.mulf %216, %217 : vector<8x128xf32>
    %cst_79 = arith.constant 5.000000e-01 : f32
    %219 = vector.broadcast %cst_79 : f32 to vector<8x128xf32>
    %220 = arith.addf %218, %219 : vector<8x128xf32>
    %221 = vector.extract_strided_slice %204 {offsets = [0, 256], sizes = [8, 128], strides = [1, 1]} : vector<8x512xf32> to vector<8x128xf32>
    %222 = math.tanh %221 : vector<8x128xf32>
    %223 = vector.extract_strided_slice %204 {offsets = [0, 384], sizes = [8, 128], strides = [1, 1]} : vector<8x512xf32> to vector<8x128xf32>
    %cst_80 = arith.constant 5.000000e-01 : f32
    %224 = vector.broadcast %cst_80 : f32 to vector<8x128xf32>
    %225 = arith.mulf %223, %224 : vector<8x128xf32>
    %226 = math.tanh %225 : vector<8x128xf32>
    %cst_81 = arith.constant 5.000000e-01 : f32
    %227 = vector.broadcast %cst_81 : f32 to vector<8x128xf32>
    %228 = arith.mulf %226, %227 : vector<8x128xf32>
    %cst_82 = arith.constant 5.000000e-01 : f32
    %229 = vector.broadcast %cst_82 : f32 to vector<8x128xf32>
    %230 = arith.addf %228, %229 : vector<8x128xf32>
    %231 = arith.mulf %220, %156 : vector<8x128xf32>
    %232 = arith.mulf %212, %222 : vector<8x128xf32>
    %233 = arith.addf %231, %232 : vector<8x128xf32>
    %234 = math.tanh %233 : vector<8x128xf32>
    %235 = arith.mulf %230, %234 : vector<8x128xf32>
    %236 = arith.index_cast %c2_i32 : i32 to index
    %c0_83 = arith.constant 0 : index
    %c0_84 = arith.constant 0 : index
    %237 = vector.load %arg9[%236, %c0_83, %c0_84] : memref<8x8x128xf32, #tpu.memory_space<vmem>>, vector<1x8x128xf32>
    %238 = vector.shape_cast %237 : vector<1x8x128xf32> to vector<8x128xf32>
    %239 = vector.shape_cast %235 : vector<8x128xf32> to vector<1x8x128xf32>
    tpu.vector_store %arg9[%236, %c0_83, %c0_84], %239 {strides = array<i32>} : memref<8x8x128xf32, #tpu.memory_space<vmem>>, vector<1x8x128xf32>,
    %c1_i32_85 = arith.constant 1 : i32
    %240 = arith.addi %c2_i32, %c1_i32_85 : i32
    %241 = arith.index_cast %240 : i32 to index
    %c0_86 = arith.constant 0 : index
    %c0_87 = arith.constant 0 : index
    %242 = vector.load %arg8[%241, %c0_86, %c0_87] : memref<8x8x512xf32, #tpu.memory_space<vmem>>, vector<1x8x512xf32>
    %243 = vector.shape_cast %242 : vector<1x8x512xf32> to vector<8x512xf32>
    %244 = vector.extract_strided_slice %202 {offsets = [0, 0], sizes = [8, 512], strides = [1, 1]} : vector<8x1024xf32> to vector<8x512xf32>
    %245 = arith.addf %243, %244 : vector<8x512xf32>
    %246 = vector.extract_strided_slice %245 {offsets = [0, 0], sizes = [8, 128], strides = [1, 1]} : vector<8x512xf32> to vector<8x128xf32>
    %cst_88 = arith.constant 5.000000e-01 : f32
    %247 = vector.broadcast %cst_88 : f32 to vector<8x128xf32>
    %248 = arith.mulf %246, %247 : vector<8x128xf32>
    %249 = math.tanh %248 : vector<8x128xf32>
    %cst_89 = arith.constant 5.000000e-01 : f32
    %250 = vector.broadcast %cst_89 : f32 to vector<8x128xf32>
    %251 = arith.mulf %249, %250 : vector<8x128xf32>
    %cst_90 = arith.constant 5.000000e-01 : f32
    %252 = vector.broadcast %cst_90 : f32 to vector<8x128xf32>
    %253 = arith.addf %251, %252 : vector<8x128xf32>
    %254 = vector.extract_strided_slice %245 {offsets = [0, 128], sizes = [8, 128], strides = [1, 1]} : vector<8x512xf32> to vector<8x128xf32>
    %cst_91 = arith.constant 5.000000e-01 : f32
    %255 = vector.broadcast %cst_91 : f32 to vector<8x128xf32>
    %256 = arith.mulf %254, %255 : vector<8x128xf32>
    %257 = math.tanh %256 : vector<8x128xf32>
    %cst_92 = arith.constant 5.000000e-01 : f32
    %258 = vector.broadcast %cst_92 : f32 to vector<8x128xf32>
    %259 = arith.mulf %257, %258 : vector<8x128xf32>
    %cst_93 = arith.constant 5.000000e-01 : f32
    %260 = vector.broadcast %cst_93 : f32 to vector<8x128xf32>
    %261 = arith.addf %259, %260 : vector<8x128xf32>
    %262 = vector.extract_strided_slice %245 {offsets = [0, 256], sizes = [8, 128], strides = [1, 1]} : vector<8x512xf32> to vector<8x128xf32>
    %263 = math.tanh %262 : vector<8x128xf32>
    %264 = vector.extract_strided_slice %245 {offsets = [0, 384], sizes = [8, 128], strides = [1, 1]} : vector<8x512xf32> to vector<8x128xf32>
    %cst_94 = arith.constant 5.000000e-01 : f32
    %265 = vector.broadcast %cst_94 : f32 to vector<8x128xf32>
    %266 = arith.mulf %264, %265 : vector<8x128xf32>
    %267 = math.tanh %266 : vector<8x128xf32>
    %cst_95 = arith.constant 5.000000e-01 : f32
    %268 = vector.broadcast %cst_95 : f32 to vector<8x128xf32>
    %269 = arith.mulf %267, %268 : vector<8x128xf32>
    %cst_96 = arith.constant 5.000000e-01 : f32
    %270 = vector.broadcast %cst_96 : f32 to vector<8x128xf32>
    %271 = arith.addf %269, %270 : vector<8x128xf32>
    %272 = arith.mulf %261, %197 : vector<8x128xf32>
    %273 = arith.mulf %253, %263 : vector<8x128xf32>
    %274 = arith.addf %272, %273 : vector<8x128xf32>
    %275 = math.tanh %274 : vector<8x128xf32>
    %276 = arith.mulf %271, %275 : vector<8x128xf32>
    %277 = tpu.concatenate %276, %235 in 1 : vector<8x128xf32>, vector<8x128xf32> -> vector<8x256xf32>
    %278 = arith.truncf %277 : vector<8x256xf32> to vector<8x256xbf16>
    %c3_i32 = arith.constant 3 : i32
    %cst_97 = arith.constant dense<0.000000e+00> : vector<8x1024xf32>
    %279 = tpu.matmul %278, %8, %cst_97 {dimension_numbers = #tpu.dot_dimension_numbers<[1], [0], [0], [1], [0, 0, 1, 1], [], []>} : vector<8x256xbf16>, vector<256x1024xbf16>, vector<8x1024xf32> -> vector<8x1024xf32>
    %280 = vector.extract_strided_slice %279 {offsets = [0, 512], sizes = [8, 512], strides = [1, 1]} : vector<8x1024xf32> to vector<8x512xf32>
    %281 = arith.addf %280, %11 : vector<8x512xf32>
    %282 = vector.extract_strided_slice %281 {offsets = [0, 0], sizes = [8, 128], strides = [1, 1]} : vector<8x512xf32> to vector<8x128xf32>
    %cst_98 = arith.constant 5.000000e-01 : f32
    %283 = vector.broadcast %cst_98 : f32 to vector<8x128xf32>
    %284 = arith.mulf %282, %283 : vector<8x128xf32>
    %285 = math.tanh %284 : vector<8x128xf32>
    %cst_99 = arith.constant 5.000000e-01 : f32
    %286 = vector.broadcast %cst_99 : f32 to vector<8x128xf32>
    %287 = arith.mulf %285, %286 : vector<8x128xf32>
    %cst_100 = arith.constant 5.000000e-01 : f32
    %288 = vector.broadcast %cst_100 : f32 to vector<8x128xf32>
    %289 = arith.addf %287, %288 : vector<8x128xf32>
    %290 = vector.extract_strided_slice %281 {offsets = [0, 128], sizes = [8, 128], strides = [1, 1]} : vector<8x512xf32> to vector<8x128xf32>
    %cst_101 = arith.constant 5.000000e-01 : f32
    %291 = vector.broadcast %cst_101 : f32 to vector<8x128xf32>
    %292 = arith.mulf %290, %291 : vector<8x128xf32>
    %293 = math.tanh %292 : vector<8x128xf32>
    %cst_102 = arith.constant 5.000000e-01 : f32
    %294 = vector.broadcast %cst_102 : f32 to vector<8x128xf32>
    %295 = arith.mulf %293, %294 : vector<8x128xf32>
    %cst_103 = arith.constant 5.000000e-01 : f32
    %296 = vector.broadcast %cst_103 : f32 to vector<8x128xf32>
    %297 = arith.addf %295, %296 : vector<8x128xf32>
    %298 = vector.extract_strided_slice %281 {offsets = [0, 256], sizes = [8, 128], strides = [1, 1]} : vector<8x512xf32> to vector<8x128xf32>
    %299 = math.tanh %298 : vector<8x128xf32>
    %300 = vector.extract_strided_slice %281 {offsets = [0, 384], sizes = [8, 128], strides = [1, 1]} : vector<8x512xf32> to vector<8x128xf32>
    %cst_104 = arith.constant 5.000000e-01 : f32
    %301 = vector.broadcast %cst_104 : f32 to vector<8x128xf32>
    %302 = arith.mulf %300, %301 : vector<8x128xf32>
    %303 = math.tanh %302 : vector<8x128xf32>
    %cst_105 = arith.constant 5.000000e-01 : f32
    %304 = vector.broadcast %cst_105 : f32 to vector<8x128xf32>
    %305 = arith.mulf %303, %304 : vector<8x128xf32>
    %cst_106 = arith.constant 5.000000e-01 : f32
    %306 = vector.broadcast %cst_106 : f32 to vector<8x128xf32>
    %307 = arith.addf %305, %306 : vector<8x128xf32>
    %308 = arith.mulf %297, %233 : vector<8x128xf32>
    %309 = arith.mulf %289, %299 : vector<8x128xf32>
    %310 = arith.addf %308, %309 : vector<8x128xf32>
    %311 = math.tanh %310 : vector<8x128xf32>
    %312 = arith.mulf %307, %311 : vector<8x128xf32>
    %313 = arith.index_cast %c3_i32 : i32 to index
    %c0_107 = arith.constant 0 : index
    %c0_108 = arith.constant 0 : index
    %314 = vector.load %arg9[%313, %c0_107, %c0_108] : memref<8x8x128xf32, #tpu.memory_space<vmem>>, vector<1x8x128xf32>
    %315 = vector.shape_cast %314 : vector<1x8x128xf32> to vector<8x128xf32>
    %316 = vector.shape_cast %312 : vector<8x128xf32> to vector<1x8x128xf32>
    tpu.vector_store %arg9[%313, %c0_107, %c0_108], %316 {strides = array<i32>} : memref<8x8x128xf32, #tpu.memory_space<vmem>>, vector<1x8x128xf32>,
    %c1_i32_109 = arith.constant 1 : i32
    %317 = arith.addi %c3_i32, %c1_i32_109 : i32
    %318 = arith.index_cast %317 : i32 to index
    %c0_110 = arith.constant 0 : index
    %c0_111 = arith.constant 0 : index
    %319 = vector.load %arg8[%318, %c0_110, %c0_111] : memref<8x8x512xf32, #tpu.memory_space<vmem>>, vector<1x8x512xf32>
    %320 = vector.shape_cast %319 : vector<1x8x512xf32> to vector<8x512xf32>
    %321 = vector.extract_strided_slice %279 {offsets = [0, 0], sizes = [8, 512], strides = [1, 1]} : vector<8x1024xf32> to vector<8x512xf32>
    %322 = arith.addf %320, %321 : vector<8x512xf32>
    %323 = vector.extract_strided_slice %322 {offsets = [0, 0], sizes = [8, 128], strides = [1, 1]} : vector<8x512xf32> to vector<8x128xf32>
    %cst_112 = arith.constant 5.000000e-01 : f32
    %324 = vector.broadcast %cst_112 : f32 to vector<8x128xf32>
    %325 = arith.mulf %323, %324 : vector<8x128xf32>
    %326 = math.tanh %325 : vector<8x128xf32>
    %cst_113 = arith.constant 5.000000e-01 : f32
    %327 = vector.broadcast %cst_113 : f32 to vector<8x128xf32>
    %328 = arith.mulf %326, %327 : vector<8x128xf32>
    %cst_114 = arith.constant 5.000000e-01 : f32
    %329 = vector.broadcast %cst_114 : f32 to vector<8x128xf32>
    %330 = arith.addf %328, %329 : vector<8x128xf32>
    %331 = vector.extract_strided_slice %322 {offsets = [0, 128], sizes = [8, 128], strides = [1, 1]} : vector<8x512xf32> to vector<8x128xf32>
    %cst_115 = arith.constant 5.000000e-01 : f32
    %332 = vector.broadcast %cst_115 : f32 to vector<8x128xf32>
    %333 = arith.mulf %331, %332 : vector<8x128xf32>
    %334 = math.tanh %333 : vector<8x128xf32>
    %cst_116 = arith.constant 5.000000e-01 : f32
    %335 = vector.broadcast %cst_116 : f32 to vector<8x128xf32>
    %336 = arith.mulf %334, %335 : vector<8x128xf32>
    %cst_117 = arith.constant 5.000000e-01 : f32
    %337 = vector.broadcast %cst_117 : f32 to vector<8x128xf32>
    %338 = arith.addf %336, %337 : vector<8x128xf32>
    %339 = vector.extract_strided_slice %322 {offsets = [0, 256], sizes = [8, 128], strides = [1, 1]} : vector<8x512xf32> to vector<8x128xf32>
    %340 = math.tanh %339 : vector<8x128xf32>
    %341 = vector.extract_strided_slice %322 {offsets = [0, 384], sizes = [8, 128], strides = [1, 1]} : vector<8x512xf32> to vector<8x128xf32>
    %cst_118 = arith.constant 5.000000e-01 : f32
    %342 = vector.broadcast %cst_118 : f32 to vector<8x128xf32>
    %343 = arith.mulf %341, %342 : vector<8x128xf32>
    %344 = math.tanh %343 : vector<8x128xf32>
    %cst_119 = arith.constant 5.000000e-01 : f32
    %345 = vector.broadcast %cst_119 : f32 to vector<8x128xf32>
    %346 = arith.mulf %344, %345 : vector<8x128xf32>
    %cst_120 = arith.constant 5.000000e-01 : f32
    %347 = vector.broadcast %cst_120 : f32 to vector<8x128xf32>
    %348 = arith.addf %346, %347 : vector<8x128xf32>
    %349 = arith.mulf %338, %274 : vector<8x128xf32>
    %350 = arith.mulf %330, %340 : vector<8x128xf32>
    %351 = arith.addf %349, %350 : vector<8x128xf32>
    %352 = math.tanh %351 : vector<8x128xf32>
    %353 = arith.mulf %348, %352 : vector<8x128xf32>
    %354 = tpu.concatenate %353, %312 in 1 : vector<8x128xf32>, vector<8x128xf32> -> vector<8x256xf32>
    %355 = arith.truncf %354 : vector<8x256xf32> to vector<8x256xbf16>
    %c4_i32 = arith.constant 4 : i32
    %cst_121 = arith.constant dense<0.000000e+00> : vector<8x1024xf32>
    %356 = tpu.matmul %355, %8, %cst_121 {dimension_numbers = #tpu.dot_dimension_numbers<[1], [0], [0], [1], [0, 0, 1, 1], [], []>} : vector<8x256xbf16>, vector<256x1024xbf16>, vector<8x1024xf32> -> vector<8x1024xf32>
    %357 = vector.extract_strided_slice %356 {offsets = [0, 512], sizes = [8, 512], strides = [1, 1]} : vector<8x1024xf32> to vector<8x512xf32>
    %358 = arith.addf %357, %11 : vector<8x512xf32>
    %359 = vector.extract_strided_slice %358 {offsets = [0, 0], sizes = [8, 128], strides = [1, 1]} : vector<8x512xf32> to vector<8x128xf32>
    %cst_122 = arith.constant 5.000000e-01 : f32
    %360 = vector.broadcast %cst_122 : f32 to vector<8x128xf32>
    %361 = arith.mulf %359, %360 : vector<8x128xf32>
    %362 = math.tanh %361 : vector<8x128xf32>
    %cst_123 = arith.constant 5.000000e-01 : f32
    %363 = vector.broadcast %cst_123 : f32 to vector<8x128xf32>
    %364 = arith.mulf %362, %363 : vector<8x128xf32>
    %cst_124 = arith.constant 5.000000e-01 : f32
    %365 = vector.broadcast %cst_124 : f32 to vector<8x128xf32>
    %366 = arith.addf %364, %365 : vector<8x128xf32>
    %367 = vector.extract_strided_slice %358 {offsets = [0, 128], sizes = [8, 128], strides = [1, 1]} : vector<8x512xf32> to vector<8x128xf32>
    %cst_125 = arith.constant 5.000000e-01 : f32
    %368 = vector.broadcast %cst_125 : f32 to vector<8x128xf32>
    %369 = arith.mulf %367, %368 : vector<8x128xf32>
    %370 = math.tanh %369 : vector<8x128xf32>
    %cst_126 = arith.constant 5.000000e-01 : f32
    %371 = vector.broadcast %cst_126 : f32 to vector<8x128xf32>
    %372 = arith.mulf %370, %371 : vector<8x128xf32>
    %cst_127 = arith.constant 5.000000e-01 : f32
    %373 = vector.broadcast %cst_127 : f32 to vector<8x128xf32>
    %374 = arith.addf %372, %373 : vector<8x128xf32>
    %375 = vector.extract_strided_slice %358 {offsets = [0, 256], sizes = [8, 128], strides = [1, 1]} : vector<8x512xf32> to vector<8x128xf32>
    %376 = math.tanh %375 : vector<8x128xf32>
    %377 = vector.extract_strided_slice %358 {offsets = [0, 384], sizes = [8, 128], strides = [1, 1]} : vector<8x512xf32> to vector<8x128xf32>
    %cst_128 = arith.constant 5.000000e-01 : f32
    %378 = vector.broadcast %cst_128 : f32 to vector<8x128xf32>
    %379 = arith.mulf %377, %378 : vector<8x128xf32>
    %380 = math.tanh %379 : vector<8x128xf32>
    %cst_129 = arith.constant 5.000000e-01 : f32
    %381 = vector.broadcast %cst_129 : f32 to vector<8x128xf32>
    %382 = arith.mulf %380, %381 : vector<8x128xf32>
    %cst_130 = arith.constant 5.000000e-01 : f32
    %383 = vector.broadcast %cst_130 : f32 to vector<8x128xf32>
    %384 = arith.addf %382, %383 : vector<8x128xf32>
    %385 = arith.mulf %374, %310 : vector<8x128xf32>
    %386 = arith.mulf %366, %376 : vector<8x128xf32>
    %387 = arith.addf %385, %386 : vector<8x128xf32>
    %388 = math.tanh %387 : vector<8x128xf32>
    %389 = arith.mulf %384, %388 : vector<8x128xf32>
    %390 = arith.index_cast %c4_i32 : i32 to index
    %c0_131 = arith.constant 0 : index
    %c0_132 = arith.constant 0 : index
    %391 = vector.load %arg9[%390, %c0_131, %c0_132] : memref<8x8x128xf32, #tpu.memory_space<vmem>>, vector<1x8x128xf32>
    %392 = vector.shape_cast %391 : vector<1x8x128xf32> to vector<8x128xf32>
    %393 = vector.shape_cast %389 : vector<8x128xf32> to vector<1x8x128xf32>
    tpu.vector_store %arg9[%390, %c0_131, %c0_132], %393 {strides = array<i32>} : memref<8x8x128xf32, #tpu.memory_space<vmem>>, vector<1x8x128xf32>,
    %c1_i32_133 = arith.constant 1 : i32
    %394 = arith.addi %c4_i32, %c1_i32_133 : i32
    %395 = arith.index_cast %394 : i32 to index
    %c0_134 = arith.constant 0 : index
    %c0_135 = arith.constant 0 : index
    %396 = vector.load %arg8[%395, %c0_134, %c0_135] : memref<8x8x512xf32, #tpu.memory_space<vmem>>, vector<1x8x512xf32>
    %397 = vector.shape_cast %396 : vector<1x8x512xf32> to vector<8x512xf32>
    %398 = vector.extract_strided_slice %356 {offsets = [0, 0], sizes = [8, 512], strides = [1, 1]} : vector<8x1024xf32> to vector<8x512xf32>
    %399 = arith.addf %397, %398 : vector<8x512xf32>
    %400 = vector.extract_strided_slice %399 {offsets = [0, 0], sizes = [8, 128], strides = [1, 1]} : vector<8x512xf32> to vector<8x128xf32>
    %cst_136 = arith.constant 5.000000e-01 : f32
    %401 = vector.broadcast %cst_136 : f32 to vector<8x128xf32>
    %402 = arith.mulf %400, %401 : vector<8x128xf32>
    %403 = math.tanh %402 : vector<8x128xf32>
    %cst_137 = arith.constant 5.000000e-01 : f32
    %404 = vector.broadcast %cst_137 : f32 to vector<8x128xf32>
    %405 = arith.mulf %403, %404 : vector<8x128xf32>
    %cst_138 = arith.constant 5.000000e-01 : f32
    %406 = vector.broadcast %cst_138 : f32 to vector<8x128xf32>
    %407 = arith.addf %405, %406 : vector<8x128xf32>
    %408 = vector.extract_strided_slice %399 {offsets = [0, 128], sizes = [8, 128], strides = [1, 1]} : vector<8x512xf32> to vector<8x128xf32>
    %cst_139 = arith.constant 5.000000e-01 : f32
    %409 = vector.broadcast %cst_139 : f32 to vector<8x128xf32>
    %410 = arith.mulf %408, %409 : vector<8x128xf32>
    %411 = math.tanh %410 : vector<8x128xf32>
    %cst_140 = arith.constant 5.000000e-01 : f32
    %412 = vector.broadcast %cst_140 : f32 to vector<8x128xf32>
    %413 = arith.mulf %411, %412 : vector<8x128xf32>
    %cst_141 = arith.constant 5.000000e-01 : f32
    %414 = vector.broadcast %cst_141 : f32 to vector<8x128xf32>
    %415 = arith.addf %413, %414 : vector<8x128xf32>
    %416 = vector.extract_strided_slice %399 {offsets = [0, 256], sizes = [8, 128], strides = [1, 1]} : vector<8x512xf32> to vector<8x128xf32>
    %417 = math.tanh %416 : vector<8x128xf32>
    %418 = vector.extract_strided_slice %399 {offsets = [0, 384], sizes = [8, 128], strides = [1, 1]} : vector<8x512xf32> to vector<8x128xf32>
    %cst_142 = arith.constant 5.000000e-01 : f32
    %419 = vector.broadcast %cst_142 : f32 to vector<8x128xf32>
    %420 = arith.mulf %418, %419 : vector<8x128xf32>
    %421 = math.tanh %420 : vector<8x128xf32>
    %cst_143 = arith.constant 5.000000e-01 : f32
    %422 = vector.broadcast %cst_143 : f32 to vector<8x128xf32>
    %423 = arith.mulf %421, %422 : vector<8x128xf32>
    %cst_144 = arith.constant 5.000000e-01 : f32
    %424 = vector.broadcast %cst_144 : f32 to vector<8x128xf32>
    %425 = arith.addf %423, %424 : vector<8x128xf32>
    %426 = arith.mulf %415, %351 : vector<8x128xf32>
    %427 = arith.mulf %407, %417 : vector<8x128xf32>
    %428 = arith.addf %426, %427 : vector<8x128xf32>
    %429 = math.tanh %428 : vector<8x128xf32>
    %430 = arith.mulf %425, %429 : vector<8x128xf32>
    %431 = tpu.concatenate %430, %389 in 1 : vector<8x128xf32>, vector<8x128xf32> -> vector<8x256xf32>
    %432 = arith.truncf %431 : vector<8x256xf32> to vector<8x256xbf16>
    %c5_i32 = arith.constant 5 : i32
    %cst_145 = arith.constant dense<0.000000e+00> : vector<8x1024xf32>
    %433 = tpu.matmul %432, %8, %cst_145 {dimension_numbers = #tpu.dot_dimension_numbers<[1], [0], [0], [1], [0, 0, 1, 1], [], []>} : vector<8x256xbf16>, vector<256x1024xbf16>, vector<8x1024xf32> -> vector<8x1024xf32>
    %434 = vector.extract_strided_slice %433 {offsets = [0, 512], sizes = [8, 512], strides = [1, 1]} : vector<8x1024xf32> to vector<8x512xf32>
    %435 = arith.addf %434, %11 : vector<8x512xf32>
    %436 = vector.extract_strided_slice %435 {offsets = [0, 0], sizes = [8, 128], strides = [1, 1]} : vector<8x512xf32> to vector<8x128xf32>
    %cst_146 = arith.constant 5.000000e-01 : f32
    %437 = vector.broadcast %cst_146 : f32 to vector<8x128xf32>
    %438 = arith.mulf %436, %437 : vector<8x128xf32>
    %439 = math.tanh %438 : vector<8x128xf32>
    %cst_147 = arith.constant 5.000000e-01 : f32
    %440 = vector.broadcast %cst_147 : f32 to vector<8x128xf32>
    %441 = arith.mulf %439, %440 : vector<8x128xf32>
    %cst_148 = arith.constant 5.000000e-01 : f32
    %442 = vector.broadcast %cst_148 : f32 to vector<8x128xf32>
    %443 = arith.addf %441, %442 : vector<8x128xf32>
    %444 = vector.extract_strided_slice %435 {offsets = [0, 128], sizes = [8, 128], strides = [1, 1]} : vector<8x512xf32> to vector<8x128xf32>
    %cst_149 = arith.constant 5.000000e-01 : f32
    %445 = vector.broadcast %cst_149 : f32 to vector<8x128xf32>
    %446 = arith.mulf %444, %445 : vector<8x128xf32>
    %447 = math.tanh %446 : vector<8x128xf32>
    %cst_150 = arith.constant 5.000000e-01 : f32
    %448 = vector.broadcast %cst_150 : f32 to vector<8x128xf32>
    %449 = arith.mulf %447, %448 : vector<8x128xf32>
    %cst_151 = arith.constant 5.000000e-01 : f32
    %450 = vector.broadcast %cst_151 : f32 to vector<8x128xf32>
    %451 = arith.addf %449, %450 : vector<8x128xf32>
    %452 = vector.extract_strided_slice %435 {offsets = [0, 256], sizes = [8, 128], strides = [1, 1]} : vector<8x512xf32> to vector<8x128xf32>
    %453 = math.tanh %452 : vector<8x128xf32>
    %454 = vector.extract_strided_slice %435 {offsets = [0, 384], sizes = [8, 128], strides = [1, 1]} : vector<8x512xf32> to vector<8x128xf32>
    %cst_152 = arith.constant 5.000000e-01 : f32
    %455 = vector.broadcast %cst_152 : f32 to vector<8x128xf32>
    %456 = arith.mulf %454, %455 : vector<8x128xf32>
    %457 = math.tanh %456 : vector<8x128xf32>
    %cst_153 = arith.constant 5.000000e-01 : f32
    %458 = vector.broadcast %cst_153 : f32 to vector<8x128xf32>
    %459 = arith.mulf %457, %458 : vector<8x128xf32>
    %cst_154 = arith.constant 5.000000e-01 : f32
    %460 = vector.broadcast %cst_154 : f32 to vector<8x128xf32>
    %461 = arith.addf %459, %460 : vector<8x128xf32>
    %462 = arith.mulf %451, %387 : vector<8x128xf32>
    %463 = arith.mulf %443, %453 : vector<8x128xf32>
    %464 = arith.addf %462, %463 : vector<8x128xf32>
    %465 = math.tanh %464 : vector<8x128xf32>
    %466 = arith.mulf %461, %465 : vector<8x128xf32>
    %467 = arith.index_cast %c5_i32 : i32 to index
    %c0_155 = arith.constant 0 : index
    %c0_156 = arith.constant 0 : index
    %468 = vector.load %arg9[%467, %c0_155, %c0_156] : memref<8x8x128xf32, #tpu.memory_space<vmem>>, vector<1x8x128xf32>
    %469 = vector.shape_cast %468 : vector<1x8x128xf32> to vector<8x128xf32>
    %470 = vector.shape_cast %466 : vector<8x128xf32> to vector<1x8x128xf32>
    tpu.vector_store %arg9[%467, %c0_155, %c0_156], %470 {strides = array<i32>} : memref<8x8x128xf32, #tpu.memory_space<vmem>>, vector<1x8x128xf32>,
    %c1_i32_157 = arith.constant 1 : i32
    %471 = arith.addi %c5_i32, %c1_i32_157 : i32
    %472 = arith.index_cast %471 : i32 to index
    %c0_158 = arith.constant 0 : index
    %c0_159 = arith.constant 0 : index
    %473 = vector.load %arg8[%472, %c0_158, %c0_159] : memref<8x8x512xf32, #tpu.memory_space<vmem>>, vector<1x8x512xf32>
    %474 = vector.shape_cast %473 : vector<1x8x512xf32> to vector<8x512xf32>
    %475 = vector.extract_strided_slice %433 {offsets = [0, 0], sizes = [8, 512], strides = [1, 1]} : vector<8x1024xf32> to vector<8x512xf32>
    %476 = arith.addf %474, %475 : vector<8x512xf32>
    %477 = vector.extract_strided_slice %476 {offsets = [0, 0], sizes = [8, 128], strides = [1, 1]} : vector<8x512xf32> to vector<8x128xf32>
    %cst_160 = arith.constant 5.000000e-01 : f32
    %478 = vector.broadcast %cst_160 : f32 to vector<8x128xf32>
    %479 = arith.mulf %477, %478 : vector<8x128xf32>
    %480 = math.tanh %479 : vector<8x128xf32>
    %cst_161 = arith.constant 5.000000e-01 : f32
    %481 = vector.broadcast %cst_161 : f32 to vector<8x128xf32>
    %482 = arith.mulf %480, %481 : vector<8x128xf32>
    %cst_162 = arith.constant 5.000000e-01 : f32
    %483 = vector.broadcast %cst_162 : f32 to vector<8x128xf32>
    %484 = arith.addf %482, %483 : vector<8x128xf32>
    %485 = vector.extract_strided_slice %476 {offsets = [0, 128], sizes = [8, 128], strides = [1, 1]} : vector<8x512xf32> to vector<8x128xf32>
    %cst_163 = arith.constant 5.000000e-01 : f32
    %486 = vector.broadcast %cst_163 : f32 to vector<8x128xf32>
    %487 = arith.mulf %485, %486 : vector<8x128xf32>
    %488 = math.tanh %487 : vector<8x128xf32>
    %cst_164 = arith.constant 5.000000e-01 : f32
    %489 = vector.broadcast %cst_164 : f32 to vector<8x128xf32>
    %490 = arith.mulf %488, %489 : vector<8x128xf32>
    %cst_165 = arith.constant 5.000000e-01 : f32
    %491 = vector.broadcast %cst_165 : f32 to vector<8x128xf32>
    %492 = arith.addf %490, %491 : vector<8x128xf32>
    %493 = vector.extract_strided_slice %476 {offsets = [0, 256], sizes = [8, 128], strides = [1, 1]} : vector<8x512xf32> to vector<8x128xf32>
    %494 = math.tanh %493 : vector<8x128xf32>
    %495 = vector.extract_strided_slice %476 {offsets = [0, 384], sizes = [8, 128], strides = [1, 1]} : vector<8x512xf32> to vector<8x128xf32>
    %cst_166 = arith.constant 5.000000e-01 : f32
    %496 = vector.broadcast %cst_166 : f32 to vector<8x128xf32>
    %497 = arith.mulf %495, %496 : vector<8x128xf32>
    %498 = math.tanh %497 : vector<8x128xf32>
    %cst_167 = arith.constant 5.000000e-01 : f32
    %499 = vector.broadcast %cst_167 : f32 to vector<8x128xf32>
    %500 = arith.mulf %498, %499 : vector<8x128xf32>
    %cst_168 = arith.constant 5.000000e-01 : f32
    %501 = vector.broadcast %cst_168 : f32 to vector<8x128xf32>
    %502 = arith.addf %500, %501 : vector<8x128xf32>
    %503 = arith.mulf %492, %428 : vector<8x128xf32>
    %504 = arith.mulf %484, %494 : vector<8x128xf32>
    %505 = arith.addf %503, %504 : vector<8x128xf32>
    %506 = math.tanh %505 : vector<8x128xf32>
    %507 = arith.mulf %502, %506 : vector<8x128xf32>
    %508 = tpu.concatenate %507, %466 in 1 : vector<8x128xf32>, vector<8x128xf32> -> vector<8x256xf32>
    %509 = arith.truncf %508 : vector<8x256xf32> to vector<8x256xbf16>
    %c6_i32 = arith.constant 6 : i32
    %cst_169 = arith.constant dense<0.000000e+00> : vector<8x1024xf32>
    %510 = tpu.matmul %509, %8, %cst_169 {dimension_numbers = #tpu.dot_dimension_numbers<[1], [0], [0], [1], [0, 0, 1, 1], [], []>} : vector<8x256xbf16>, vector<256x1024xbf16>, vector<8x1024xf32> -> vector<8x1024xf32>
    %511 = vector.extract_strided_slice %510 {offsets = [0, 512], sizes = [8, 512], strides = [1, 1]} : vector<8x1024xf32> to vector<8x512xf32>
    %512 = arith.addf %511, %11 : vector<8x512xf32>
    %513 = vector.extract_strided_slice %512 {offsets = [0, 0], sizes = [8, 128], strides = [1, 1]} : vector<8x512xf32> to vector<8x128xf32>
    %cst_170 = arith.constant 5.000000e-01 : f32
    %514 = vector.broadcast %cst_170 : f32 to vector<8x128xf32>
    %515 = arith.mulf %513, %514 : vector<8x128xf32>
    %516 = math.tanh %515 : vector<8x128xf32>
    %cst_171 = arith.constant 5.000000e-01 : f32
    %517 = vector.broadcast %cst_171 : f32 to vector<8x128xf32>
    %518 = arith.mulf %516, %517 : vector<8x128xf32>
    %cst_172 = arith.constant 5.000000e-01 : f32
    %519 = vector.broadcast %cst_172 : f32 to vector<8x128xf32>
    %520 = arith.addf %518, %519 : vector<8x128xf32>
    %521 = vector.extract_strided_slice %512 {offsets = [0, 128], sizes = [8, 128], strides = [1, 1]} : vector<8x512xf32> to vector<8x128xf32>
    %cst_173 = arith.constant 5.000000e-01 : f32
    %522 = vector.broadcast %cst_173 : f32 to vector<8x128xf32>
    %523 = arith.mulf %521, %522 : vector<8x128xf32>
    %524 = math.tanh %523 : vector<8x128xf32>
    %cst_174 = arith.constant 5.000000e-01 : f32
    %525 = vector.broadcast %cst_174 : f32 to vector<8x128xf32>
    %526 = arith.mulf %524, %525 : vector<8x128xf32>
    %cst_175 = arith.constant 5.000000e-01 : f32
    %527 = vector.broadcast %cst_175 : f32 to vector<8x128xf32>
    %528 = arith.addf %526, %527 : vector<8x128xf32>
    %529 = vector.extract_strided_slice %512 {offsets = [0, 256], sizes = [8, 128], strides = [1, 1]} : vector<8x512xf32> to vector<8x128xf32>
    %530 = math.tanh %529 : vector<8x128xf32>
    %531 = vector.extract_strided_slice %512 {offsets = [0, 384], sizes = [8, 128], strides = [1, 1]} : vector<8x512xf32> to vector<8x128xf32>
    %cst_176 = arith.constant 5.000000e-01 : f32
    %532 = vector.broadcast %cst_176 : f32 to vector<8x128xf32>
    %533 = arith.mulf %531, %532 : vector<8x128xf32>
    %534 = math.tanh %533 : vector<8x128xf32>
    %cst_177 = arith.constant 5.000000e-01 : f32
    %535 = vector.broadcast %cst_177 : f32 to vector<8x128xf32>
    %536 = arith.mulf %534, %535 : vector<8x128xf32>
    %cst_178 = arith.constant 5.000000e-01 : f32
    %537 = vector.broadcast %cst_178 : f32 to vector<8x128xf32>
    %538 = arith.addf %536, %537 : vector<8x128xf32>
    %539 = arith.mulf %528, %464 : vector<8x128xf32>
    %540 = arith.mulf %520, %530 : vector<8x128xf32>
    %541 = arith.addf %539, %540 : vector<8x128xf32>
    %542 = math.tanh %541 : vector<8x128xf32>
    %543 = arith.mulf %538, %542 : vector<8x128xf32>
    %544 = arith.index_cast %c6_i32 : i32 to index
    %c0_179 = arith.constant 0 : index
    %c0_180 = arith.constant 0 : index
    %545 = vector.load %arg9[%544, %c0_179, %c0_180] : memref<8x8x128xf32, #tpu.memory_space<vmem>>, vector<1x8x128xf32>
    %546 = vector.shape_cast %545 : vector<1x8x128xf32> to vector<8x128xf32>
    %547 = vector.shape_cast %543 : vector<8x128xf32> to vector<1x8x128xf32>
    tpu.vector_store %arg9[%544, %c0_179, %c0_180], %547 {strides = array<i32>} : memref<8x8x128xf32, #tpu.memory_space<vmem>>, vector<1x8x128xf32>,
    %c1_i32_181 = arith.constant 1 : i32
    %548 = arith.addi %c6_i32, %c1_i32_181 : i32
    %549 = arith.index_cast %548 : i32 to index
    %c0_182 = arith.constant 0 : index
    %c0_183 = arith.constant 0 : index
    %550 = vector.load %arg8[%549, %c0_182, %c0_183] : memref<8x8x512xf32, #tpu.memory_space<vmem>>, vector<1x8x512xf32>
    %551 = vector.shape_cast %550 : vector<1x8x512xf32> to vector<8x512xf32>
    %552 = vector.extract_strided_slice %510 {offsets = [0, 0], sizes = [8, 512], strides = [1, 1]} : vector<8x1024xf32> to vector<8x512xf32>
    %553 = arith.addf %551, %552 : vector<8x512xf32>
    %554 = vector.extract_strided_slice %553 {offsets = [0, 0], sizes = [8, 128], strides = [1, 1]} : vector<8x512xf32> to vector<8x128xf32>
    %cst_184 = arith.constant 5.000000e-01 : f32
    %555 = vector.broadcast %cst_184 : f32 to vector<8x128xf32>
    %556 = arith.mulf %554, %555 : vector<8x128xf32>
    %557 = math.tanh %556 : vector<8x128xf32>
    %cst_185 = arith.constant 5.000000e-01 : f32
    %558 = vector.broadcast %cst_185 : f32 to vector<8x128xf32>
    %559 = arith.mulf %557, %558 : vector<8x128xf32>
    %cst_186 = arith.constant 5.000000e-01 : f32
    %560 = vector.broadcast %cst_186 : f32 to vector<8x128xf32>
    %561 = arith.addf %559, %560 : vector<8x128xf32>
    %562 = vector.extract_strided_slice %553 {offsets = [0, 128], sizes = [8, 128], strides = [1, 1]} : vector<8x512xf32> to vector<8x128xf32>
    %cst_187 = arith.constant 5.000000e-01 : f32
    %563 = vector.broadcast %cst_187 : f32 to vector<8x128xf32>
    %564 = arith.mulf %562, %563 : vector<8x128xf32>
    %565 = math.tanh %564 : vector<8x128xf32>
    %cst_188 = arith.constant 5.000000e-01 : f32
    %566 = vector.broadcast %cst_188 : f32 to vector<8x128xf32>
    %567 = arith.mulf %565, %566 : vector<8x128xf32>
    %cst_189 = arith.constant 5.000000e-01 : f32
    %568 = vector.broadcast %cst_189 : f32 to vector<8x128xf32>
    %569 = arith.addf %567, %568 : vector<8x128xf32>
    %570 = vector.extract_strided_slice %553 {offsets = [0, 256], sizes = [8, 128], strides = [1, 1]} : vector<8x512xf32> to vector<8x128xf32>
    %571 = math.tanh %570 : vector<8x128xf32>
    %572 = vector.extract_strided_slice %553 {offsets = [0, 384], sizes = [8, 128], strides = [1, 1]} : vector<8x512xf32> to vector<8x128xf32>
    %cst_190 = arith.constant 5.000000e-01 : f32
    %573 = vector.broadcast %cst_190 : f32 to vector<8x128xf32>
    %574 = arith.mulf %572, %573 : vector<8x128xf32>
    %575 = math.tanh %574 : vector<8x128xf32>
    %cst_191 = arith.constant 5.000000e-01 : f32
    %576 = vector.broadcast %cst_191 : f32 to vector<8x128xf32>
    %577 = arith.mulf %575, %576 : vector<8x128xf32>
    %cst_192 = arith.constant 5.000000e-01 : f32
    %578 = vector.broadcast %cst_192 : f32 to vector<8x128xf32>
    %579 = arith.addf %577, %578 : vector<8x128xf32>
    %580 = arith.mulf %569, %505 : vector<8x128xf32>
    %581 = arith.mulf %561, %571 : vector<8x128xf32>
    %582 = arith.addf %580, %581 : vector<8x128xf32>
    %583 = math.tanh %582 : vector<8x128xf32>
    %584 = arith.mulf %579, %583 : vector<8x128xf32>
    %585 = tpu.concatenate %584, %543 in 1 : vector<8x128xf32>, vector<8x128xf32> -> vector<8x256xf32>
    %586 = arith.truncf %585 : vector<8x256xf32> to vector<8x256xbf16>
    %c7_i32 = arith.constant 7 : i32
    %587 = vector.extract_strided_slice %8 {offsets = [0, 512], sizes = [256, 512], strides = [1, 1]} : vector<256x1024xbf16> to vector<256x512xbf16>
    %cst_193 = arith.constant dense<0.000000e+00> : vector<8x512xf32>
    %588 = tpu.matmul %586, %587, %cst_193 {dimension_numbers = #tpu.dot_dimension_numbers<[1], [0], [0], [1], [0, 0, 1, 1], [], []>} : vector<8x256xbf16>, vector<256x512xbf16>, vector<8x512xf32> -> vector<8x512xf32>
    %589 = arith.addf %588, %11 : vector<8x512xf32>
    %590 = vector.extract_strided_slice %589 {offsets = [0, 0], sizes = [8, 128], strides = [1, 1]} : vector<8x512xf32> to vector<8x128xf32>
    %cst_194 = arith.constant 5.000000e-01 : f32
    %591 = vector.broadcast %cst_194 : f32 to vector<8x128xf32>
    %592 = arith.mulf %590, %591 : vector<8x128xf32>
    %593 = math.tanh %592 : vector<8x128xf32>
    %cst_195 = arith.constant 5.000000e-01 : f32
    %594 = vector.broadcast %cst_195 : f32 to vector<8x128xf32>
    %595 = arith.mulf %593, %594 : vector<8x128xf32>
    %cst_196 = arith.constant 5.000000e-01 : f32
    %596 = vector.broadcast %cst_196 : f32 to vector<8x128xf32>
    %597 = arith.addf %595, %596 : vector<8x128xf32>
    %598 = vector.extract_strided_slice %589 {offsets = [0, 128], sizes = [8, 128], strides = [1, 1]} : vector<8x512xf32> to vector<8x128xf32>
    %cst_197 = arith.constant 5.000000e-01 : f32
    %599 = vector.broadcast %cst_197 : f32 to vector<8x128xf32>
    %600 = arith.mulf %598, %599 : vector<8x128xf32>
    %601 = math.tanh %600 : vector<8x128xf32>
    %cst_198 = arith.constant 5.000000e-01 : f32
    %602 = vector.broadcast %cst_198 : f32 to vector<8x128xf32>
    %603 = arith.mulf %601, %602 : vector<8x128xf32>
    %cst_199 = arith.constant 5.000000e-01 : f32
    %604 = vector.broadcast %cst_199 : f32 to vector<8x128xf32>
    %605 = arith.addf %603, %604 : vector<8x128xf32>
    %606 = vector.extract_strided_slice %589 {offsets = [0, 256], sizes = [8, 128], strides = [1, 1]} : vector<8x512xf32> to vector<8x128xf32>
    %607 = math.tanh %606 : vector<8x128xf32>
    %608 = vector.extract_strided_slice %589 {offsets = [0, 384], sizes = [8, 128], strides = [1, 1]} : vector<8x512xf32> to vector<8x128xf32>
    %cst_200 = arith.constant 5.000000e-01 : f32
    %609 = vector.broadcast %cst_200 : f32 to vector<8x128xf32>
    %610 = arith.mulf %608, %609 : vector<8x128xf32>
    %611 = math.tanh %610 : vector<8x128xf32>
    %cst_201 = arith.constant 5.000000e-01 : f32
    %612 = vector.broadcast %cst_201 : f32 to vector<8x128xf32>
    %613 = arith.mulf %611, %612 : vector<8x128xf32>
    %cst_202 = arith.constant 5.000000e-01 : f32
    %614 = vector.broadcast %cst_202 : f32 to vector<8x128xf32>
    %615 = arith.addf %613, %614 : vector<8x128xf32>
    %616 = arith.mulf %605, %541 : vector<8x128xf32>
    %617 = arith.mulf %597, %607 : vector<8x128xf32>
    %618 = arith.addf %616, %617 : vector<8x128xf32>
    %619 = math.tanh %618 : vector<8x128xf32>
    %620 = arith.mulf %615, %619 : vector<8x128xf32>
    %c7 = arith.constant 7 : index
    %c0_203 = arith.constant 0 : index
    %c0_204 = arith.constant 0 : index
    %621 = vector.load %arg9[%c7, %c0_203, %c0_204] : memref<8x8x128xf32, #tpu.memory_space<vmem>>, vector<1x8x128xf32>
    %622 = vector.shape_cast %621 : vector<1x8x128xf32> to vector<8x128xf32>
    %623 = vector.shape_cast %620 : vector<8x128xf32> to vector<1x8x128xf32>
    tpu.vector_store %arg9[%c7, %c0_203, %c0_204], %623 {strides = array<i32>} : memref<8x8x128xf32, #tpu.memory_space<vmem>>, vector<1x8x128xf32>,
    %c0_205 = arith.constant 0 : index
    %c0_206 = arith.constant 0 : index
    %c0_207 = arith.constant 0 : index
    %624 = vector.load %arg9[%c0_205, %c0_206, %c0_207] : memref<8x8x128xf32, #tpu.memory_space<vmem>>, vector<8x8x128xf32>
    %625 = arith.truncf %624 : vector<8x8x128xf32> to vector<8x8x128xbf16>
    %626 = vector.shape_cast %625 : vector<8x8x128xbf16> to vector<64x128xbf16>
    %c0_208 = arith.constant 0 : index
    %c0_209 = arith.constant 0 : index
    %627 = vector.load %arg5[%c0_208, %c0_209] : memref<128x128xbf16, #tpu.memory_space<vmem>>, vector<128x128xbf16>
    %cst_210 = arith.constant dense<0.000000e+00> : vector<64x128xf32>
    %628 = tpu.matmul %626, %627, %cst_210 {dimension_numbers = #tpu.dot_dimension_numbers<[1], [0], [0], [1], [0, 0, 1, 1], [], []>} : vector<64x128xbf16>, vector<128x128xbf16>, vector<64x128xf32> -> vector<64x128xf32>
    %c0_211 = arith.constant 0 : index
    %c0_212 = arith.constant 0 : index
    %629 = vector.load %arg6[%c0_211, %c0_212] : memref<1x128xf32, #tpu.memory_space<vmem>>, vector<1x128xf32>
    %630 = vector.broadcast %629 : vector<1x128xf32> to vector<64x128xf32>
    %631 = arith.addf %628, %630 : vector<64x128xf32>
    %632 = vector.shape_cast %631 : vector<64x128xf32> to vector<8x8x128xf32>
    %c0_213 = arith.constant 0 : index
    %c0_214 = arith.constant 0 : index
    %c0_215 = arith.constant 0 : index
    %633 = vector.load %arg7[%c0_213, %c0_214, %c0_215] : memref<8x8x128xf32, #tpu.memory_space<vmem>>, vector<8x8x128xf32>
    tpu.vector_store %arg7[%c0_213, %c0_214, %c0_215], %632 {strides = array<i32>} : memref<8x8x128xf32, #tpu.memory_space<vmem>>, vector<8x8x128xf32>,
    return
  }
}

</mosaic_0001>

<bundles_post_ra>
// kernel: tpu_custom_call.1
= control target key start
LH: loop header
LB: loop body
LE: loop exit
PB: predicated region body
PF: predicated region fallthrough
CT: control target
= control target key end

     0   :  { %12 = vsyncpa [#allocation5], 0  ;;  %s5355_s0 = inlined_call_operand.hbm [shape: bf16[64,128], index: 0, kind: input, shape index: {}]   ;;  %s5356_s1 = inlined_call_operand.hbm [shape: bf16[128,512], index: 1, kind: input, shape index: {}]   ;;  %s5357_s2 = inlined_call_operand.vmem [shape: f32[1,512], index: 2, kind: input, shape index: {}]   ;;  %s5358_s3 = inlined_call_operand.hbm [shape: bf16[256,1024], index: 3, kind: input, shape index: {}]   ;;  %s5359_s4 = inlined_call_operand.vmem [shape: f32[1,512], index: 4, kind: input, shape index: {}]   ;;  %s5360_s5 = inlined_call_operand.hbm [shape: bf16[128,128], index: 5, kind: input, shape index: {}]   ;;  %s5361_s6 = inlined_call_operand.vmem [shape: f32[1,128], index: 6, kind: input, shape index: {}]   ;;  %s5362_s7 = inlined_call_operand.hbm [shape: f32[8,8,128], index: 7, kind: output, shape index: {}]  }
   0x1   :  { %13 = vsyncpa [#allocation8], 0 }
   0x2   :  { %14 = vsyncpa [#allocation11], 0 }
   0x3   :  { %15 = vsyncpa [#allocation6], 0  ;;  %s3714_s24 = smov [#allocation7]   ;;  %s3596_s28 = scalar_lea.hbm %s5356_s1, 4096 }
   0x4   :  { %s33_s25 = sshll.u32 %s3714_s24, 4  ;;  %p3597_p0 = scmp.ne.s32.totalorder %s5356_s1, %s3596_s28  ;;  %s34_s25 = int_to_ptr.vmem [resolvable:$true] %s33_s25 }
   0x5   :  { %p3600_p1 = scmp.lt.u32.totalorder %s3596_s28, %s5356_s1 }
   0x7   :  { %p3602_p2 = pnand %p3600_p1, %p3597_p0 }
   0x9   :  { %3605 = shalt.err (!%p3602_p2)
}
   0xa   :  { %s3606_s10 = scalar_lea.vmem %s34_s25, 4096  ;;  %p3611_p4 = scmp.lt.s32.totalorder %s34_s25, %s34_s25 }
   0xb   :  { %p3607_p3 = scmp.ne.s32.totalorder %s34_s25, %s3606_s10  ;;  %p3612_p5 = scmp.lt.s32.totalorder %s3606_s10, %s3606_s10 }
   0xd   :  { %p3613_p6 = por %p3612_p5, %p3611_p4 }
   0xf   :  { %p3614_p7 = pnand %p3613_p6, %p3607_p3 }
  0x11   :  { %3617 = shalt.err (!%p3614_p7)
}
  0x12   :  { %s3715_s11 = smov 256   ;;  %s3716_s12 = smov 16  }
  0x13   :  { %39 = dma.hbm_to_vmem [thread:$0]  %s5356_s1, 4096, %s34_s25, [#allocation8], %s3715_s11, %s3715_s11, %s3716_s12  }
  0x14   :  { %s3717_s15 = smov [#allocation4]   ;;  %s3618_s19 = scalar_lea.hbm %s5355_s0, 512 }
  0x15   :  { %s21_s16 = sshll.u32 %s3717_s15, 4  ;;  %p3619_p8 = scmp.ne.s32.totalorder %s5355_s0, %s3618_s19  ;;  %s22_s16 = int_to_ptr.vmem [resolvable:$true] %s21_s16 }
  0x16   :  { %p3622_p9 = scmp.lt.u32.totalorder %s3618_s19, %s5355_s0 }
  0x18   :  { %p3624_p10 = pnand %p3622_p9, %p3619_p8 }
  0x1a   :  { %3627 = shalt.err (!%p3624_p10)
}
  0x1b   :  { %s3628_s24 = scalar_lea.vmem %s22_s16, 512  ;;  %p3633_p12 = scmp.lt.s32.totalorder %s22_s16, %s22_s16 }
  0x1c   :  { %p3629_p11 = scmp.ne.s32.totalorder %s22_s16, %s3628_s24  ;;  %p3634_p13 = scmp.lt.s32.totalorder %s3628_s24, %s3628_s24 }
  0x1e   :  { %p3635_p0 = por %p3634_p13, %p3633_p12 }
  0x20   :  { %p3636_p1 = pnand %p3635_p0, %p3629_p11 }
  0x22   :  { %3639 = shalt.err (!%p3636_p1)
}
  0x23   :  { %s3718_s1 = smov 64   ;;  %s3719_s25 = smov 4  }
  0x24   :  { %27 = dma.hbm_to_vmem [thread:$0]  %s5355_s0, 512, %s22_s16, [#allocation5], %s3718_s1, %s3718_s1, %s3719_s25  }
  0x25   :  { %s3720_s28 = smov [#allocation9]   ;;  %s3640_s9 = scalar_lea.hbm %s5358_s3, 16384 }
  0x26   :  { %s47_s29 = sshll.u32 %s3720_s28, 4  ;;  %p3641_p2 = scmp.ne.s32.totalorder %s5358_s3, %s3640_s9  ;;  %s48_s29 = int_to_ptr.vmem [resolvable:$true] %s47_s29 }
  0x27   :  { %p3644_p3 = scmp.lt.u32.totalorder %s3640_s9, %s5358_s3 }
  0x29   :  { %p3646_p4 = pnand %p3644_p3, %p3641_p2 }
  0x2b   :  { %3649 = shalt.err (!%p3646_p4)
}
  0x2c   :  { %s3650_s14 = scalar_lea.vmem %s48_s29, 16384  ;;  %p3655_p6 = scmp.lt.s32.totalorder %s48_s29, %s48_s29 }
  0x2d   :  { %p3651_p5 = scmp.ne.s32.totalorder %s48_s29, %s3650_s14  ;;  %p3656_p7 = scmp.lt.s32.totalorder %s3650_s14, %s3650_s14 }
  0x2f   :  { %p3657_p8 = por %p3656_p7, %p3655_p6 }
  0x31   :  { %p3658_p9 = pnand %p3657_p8, %p3651_p5 }
  0x33   :  { %3661 = shalt.err (!%p3658_p9)
}
  0x34   :  { %s3721_s0 = smov 512   ;;  %s3722_s15 = smov 32  }
  0x35   :  { %53 = dma.hbm_to_vmem [thread:$0]  %s5358_s3, 16384, %s48_s29, [#allocation8], %s3721_s0, %s3721_s0, %s3722_s15  }
  0x36   :  { %s3723_s18 = smov [#allocation10]   ;;  %s3662_s22 = scalar_lea.hbm %s5360_s5, 1024 }
  0x37   :  { %s61_s19 = sshll.u32 %s3723_s18, 4  ;;  %p3663_p10 = scmp.ne.s32.totalorder %s5360_s5, %s3662_s22  ;;  %s62_s19 = int_to_ptr.vmem [resolvable:$true] %s61_s19 }
  0x38   :  { %p3666_p11 = scmp.lt.u32.totalorder %s3662_s22, %s5360_s5 }
  0x3a   :  { %p3668_p12 = pnand %p3666_p11, %p3663_p10 }
  0x3c   :  { %3671 = shalt.err (!%p3668_p12)
}
  0x3d   :  { %s3672_s28 = scalar_lea.vmem %s62_s19, 1024  ;;  %p3677_p0 = scmp.lt.s32.totalorder %s62_s19, %s62_s19 }
  0x3e   :  { %p3673_p13 = scmp.ne.s32.totalorder %s62_s19, %s3672_s28  ;;  %p3678_p1 = scmp.lt.s32.totalorder %s3672_s28, %s3672_s28 }
  0x40   :  { %p3679_p2 = por %p3678_p1, %p3677_p0 }
  0x42   :  { %p3680_p3 = pnand %p3679_p2, %p3673_p13 }
  0x44   :  { %3683 = shalt.err (!%p3680_p3)
}
  0x45   :  { %67 = dma.hbm_to_vmem [thread:$0]  %s5360_s5, 1024, %s62_s19, [#allocation11], %s3718_s1, %s3718_s1, %s3719_s25  }
  0x46   :  { %3706 = dma.done.wait [#allocation5], 512  }
  0x47   :  { %3707 = vsyncadd [#allocation5], 4294966784 }
  0x48   :  { %3708 = dma.done.wait [#allocation8], 20480  }
  0x49   :  { %3709 = vsyncadd [#allocation8], 4294946816 }
  0x4a   :  { %3710 = dma.done.wait [#allocation11], 1024  }
  0x4b   :  { %3711 = vsyncadd [#allocation11], 4294966272  ;;  %v3724_v0 = vmov 0   ;;  %v3376_v1 = vld [vmem:[#allocation7 + $0x4] ss:$16 sps:$4 sm:$0xff]   ;;  %v3407_v23 = vld [vmem:[#allocation4 + $0x8] sm:$0xff]  }
  0x4c   :  { %361 = vmatprep.mubr.bf16.mxu1 %v3724_v0  ;;  %v3378_v2 = vld [vmem:[#allocation7] ss:$16 sps:$4 sm:$0xff]   ;;  %329 = vmatprep.subr.bf16.mxu1 %v3376_v1  ;;  %v3379_v3 = vld [vmem:[#allocation7 + $0x24] ss:$16 sps:$4 sm:$0xff]   ;;  %v3403_v17 = vld [vmem:[#allocation7 + $0xc] ss:$16 sps:$4 sm:$0xff]  }
  0x4d   :  { %330 = vmatpush1.bf16.msra.mxu1 %v3378_v2  ;;  %v3381_v4 = vld [vmem:[#allocation7 + $0x20] ss:$16 sps:$4 sm:$0xff]   ;;  %v3382_v5 = vld [vmem:[#allocation7 + $0x44] ss:$16 sps:$4 sm:$0xff]   ;;  %v3401_v19 = vld [vmem:[#allocation7 + $0x8] ss:$16 sps:$4 sm:$0xff]  }
  0x4e   :  { %331 = vmatprep.subr.bf16.mxu1 %v3379_v3  ;;  %v3384_v6 = vld [vmem:[#allocation7 + $0x40] ss:$16 sps:$4 sm:$0xff]   ;;  %v3385_v7 = vld [vmem:[#allocation7 + $0x64] ss:$16 sps:$4 sm:$0xff]   ;;  %v3406_v20 = vld [vmem:[#allocation7 + $0x2c] ss:$16 sps:$4 sm:$0xff]  }
  0x4f   :  { %v3387_v8 = vld [vmem:[#allocation7 + $0x60] ss:$16 sps:$4 sm:$0xff]   ;;  %v3388_v9 = vld [vmem:[#allocation7 + $0x84] ss:$16 sps:$4 sm:$0xff]   ;;  %v3404_v21 = vld [vmem:[#allocation7 + $0x28] ss:$16 sps:$4 sm:$0xff]  }
  0x50   :  { %v3390_v10 = vld [vmem:[#allocation7 + $0x80] ss:$16 sps:$4 sm:$0xff]   ;;  %v3391_v11 = vld [vmem:[#allocation7 + $0xa4] ss:$16 sps:$4 sm:$0xff]   ;;  %v3410_v22 = vld [vmem:[#allocation7 + $0x4c] ss:$16 sps:$4 sm:$0xff]  }
  0x51   :  { %332 = vmatpush1.bf16.msra.mxu1 %v3381_v4  ;;  %v3393_v12 = vld [vmem:[#allocation7 + $0xa0] ss:$16 sps:$4 sm:$0xff]   ;;  %v3394_v13 = vld [vmem:[#allocation7 + $0xc4] ss:$16 sps:$4 sm:$0xff]   ;;  %v3408_v24 = vld [vmem:[#allocation7 + $0x48] ss:$16 sps:$4 sm:$0xff]  }
  0x52   :  { %333 = vmatprep.subr.bf16.mxu1 %v3382_v5  ;;  %v3396_v14 = vld [vmem:[#allocation7 + $0xc0] ss:$16 sps:$4 sm:$0xff]   ;;  %v3397_v15 = vld [vmem:[#allocation7 + $0xe4] ss:$16 sps:$4 sm:$0xff]   ;;  %v3413_v25 = vld [vmem:[#allocation7 + $0x6c] ss:$16 sps:$4 sm:$0xff]  }
  0x53   :  { %v3399_v16 = vld [vmem:[#allocation7 + $0xe0] ss:$16 sps:$4 sm:$0xff]   ;;  %v3411_v26 = vld [vmem:[#allocation7 + $0x68] ss:$16 sps:$4 sm:$0xff]   ;;  %v3417_v27 = vld [vmem:[#allocation7 + $0x8c] ss:$16 sps:$4 sm:$0xff]  }
  0x54   :  { %v3400_v18 = vld [vmem:[#allocation4] sm:$0xff]   ;;  %v3414_v28 = vld [vmem:[#allocation4 + $0x10] sm:$0xff]   ;;  %v3415_v29 = vld [vmem:[#allocation7 + $0x88] ss:$16 sps:$4 sm:$0xff]  }
  0x55   :  { %334 = vmatpush1.bf16.msra.mxu1 %v3384_v6  ;;  %v3420_v30 = vld [vmem:[#allocation7 + $0xac] ss:$16 sps:$4 sm:$0xff]   ;;  %v3418_v31 = vld [vmem:[#allocation7 + $0xa8] ss:$16 sps:$4 sm:$0xff]   ;;  %v507_v37 = vld [vmem:[#allocation9] sm:$0xff] }
  0x56   :  { %335 = vmatprep.subr.bf16.mxu1 %v3385_v7  ;;  %v3424_v32 = vld [vmem:[#allocation7 + $0xcc] ss:$16 sps:$4 sm:$0xff]   ;;  %v3422_v34 = vld [vmem:[#allocation7 + $0xc8] ss:$16 sps:$4 sm:$0xff]   ;;  %v511_v38 = vld [vmem:[#allocation9 + $0x20] sm:$0xff] }
  0x57   :  { %v3421_v33 = vld [vmem:[#allocation4 + $0x18] sm:$0xff]   ;;  %v508_v39 = vld [vmem:[#allocation9 + $0x8] sm:$0xff]  ;;  %v3831_v40 = vcombine.high %v507_v37, %v511_v38  ;;  %v3835_v43 = vcombine.low %v507_v37, %v511_v38  ;;  %v515_v45 = vld [vmem:[#allocation9 + $0x40] sm:$0xff] }
  0x58   :  { %v3427_v35 = vld [vmem:[#allocation7 + $0xec] ss:$16 sps:$4 sm:$0xff]   ;;  %v3425_v36 = vld [vmem:[#allocation7 + $0xe8] ss:$16 sps:$4 sm:$0xff]   ;;  %v519_v46 = vld [vmem:[#allocation9 + $0x60] sm:$0xff] }
  0x59   :  { %336 = vmatpush1.bf16.msra.mxu1 %v3387_v8  ;;  %5657 = vst [vmem:[#allocation17_spill] sm:$0xff] %v3831_v40  ;;  %v512_v41 = vld [vmem:[#allocation9 + $0x28] sm:$0xff]  ;;  %5659 = vst [vmem:[#allocation19_spill] sm:$0xff] %v3835_v43  ;;  %1321 = vmatprep.subr.bf16.mxu0 %v3831_v40  ;;  %v3843_v48 = vcombine.high %v515_v45, %v519_v46  ;;  %v3847_v51 = vcombine.low %v515_v45, %v519_v46  ;;  %v523_v53 = vld [vmem:[#allocation9 + $0x80] sm:$0xff] }
  0x5a   :  { %337 = vmatprep.subr.bf16.mxu1 %v3388_v9  ;;  %v3833_v42 = vcombine.high %v508_v39, %v512_v41  ;;  %v3837_v44 = vcombine.low %v508_v39, %v512_v41  ;;  %1322 = vmatpush1.bf16.msra.mxu0 %v3835_v43  ;;  %v516_v47 = vld [vmem:[#allocation9 + $0x48] sm:$0xff]  ;;  %v527_v54 = vld [vmem:[#allocation9 + $0xa0] sm:$0xff] }
  0x5b   :  { %5661 = vst [vmem:[#allocation21_spill] sm:$0xff] %v3843_v48  ;;  %v520_v49 = vld [vmem:[#allocation9 + $0x68] sm:$0xff]  ;;  %5663 = vst [vmem:[#allocation23_spill] sm:$0xff] %v3847_v51  ;;  %1323 = vmatprep.subr.bf16.mxu0 %v3843_v48  ;;  %v3855_v56 = vcombine.high %v523_v53, %v527_v54  ;;  %v3859_v59 = vcombine.low %v523_v53, %v527_v54  ;;  %v531_v61 = vld [vmem:[#allocation9 + $0xc0] sm:$0xff] }
  0x5c   :  { %5658 = vst [vmem:[#allocation18_spill] sm:$0xff] %v3833_v42  ;;  %5660 = vst [vmem:[#allocation20_spill] sm:$0xff] %v3837_v44  ;;  %v3845_v50 = vcombine.high %v516_v47, %v520_v49  ;;  %v3849_v52 = vcombine.low %v516_v47, %v520_v49  ;;  %v524_v55 = vld [vmem:[#allocation9 + $0x88] sm:$0xff]  ;;  %v535_v62 = vld [vmem:[#allocation9 + $0xe0] sm:$0xff] }
  0x5d   :  { %338 = vmatpush1.bf16.msra.mxu1 %v3390_v10  ;;  %5665 = vst [vmem:[#allocation25_spill] sm:$0xff] %v3855_v56  ;;  %v528_v57 = vld [vmem:[#allocation9 + $0xa8] sm:$0xff]  ;;  %5667 = vst [vmem:[#allocation27_spill] sm:$0xff] %v3859_v59  ;;  %v3871_v3 = vcombine.low %v531_v61, %v535_v62  ;;  %v539_v5 = vld [vmem:[#allocation9 + $0x100] sm:$0xff] }
  0x5e   :  { %339 = vmatprep.subr.bf16.mxu1 %v3391_v11  ;;  %5662 = vst [vmem:[#allocation22_spill] sm:$0xff] %v3845_v50  ;;  %5664 = vst [vmem:[#allocation24_spill] sm:$0xff] %v3849_v52  ;;  %1324 = vmatpush1.bf16.msra.mxu0 %v3847_v51  ;;  %v3857_v58 = vcombine.high %v524_v55, %v528_v57  ;;  %v3861_v60 = vcombine.low %v524_v55, %v528_v57  ;;  %v532_v63 = vld [vmem:[#allocation9 + $0xc8] sm:$0xff]  ;;  %v543_v6 = vld [vmem:[#allocation9 + $0x120] sm:$0xff] }
  0x5f   :  { %1325 = vmatprep.subr.bf16.mxu0 %v3855_v56  ;;  %v536_v1 = vld [vmem:[#allocation9 + $0xe8] sm:$0xff]  ;;  %5671 = vst [vmem:[#allocation31_spill] sm:$0xff] %v3871_v3  ;;  %v3879_v8 = vcombine.high %v539_v5, %v543_v6  ;;  %v3883_v11 = vcombine.low %v539_v5, %v543_v6  ;;  %v571_v37 = vld [vmem:[#allocation9 + $0x200] sm:$0xff] }
  0x60   :  { %5666 = vst [vmem:[#allocation26_spill] sm:$0xff] %v3857_v58  ;;  %5668 = vst [vmem:[#allocation28_spill] sm:$0xff] %v3861_v60  ;;  %v3869_v2 = vcombine.high %v532_v63, %v536_v1  ;;  %v3873_v4 = vcombine.low %v532_v63, %v536_v1  ;;  %v540_v7 = vld [vmem:[#allocation9 + $0x108] sm:$0xff]  ;;  %v575_v38 = vld [vmem:[#allocation9 + $0x220] sm:$0xff] }
  0x61   :  { %340 = vmatpush1.bf16.msra.mxu1 %v3393_v12  ;;  %5673 = vst [vmem:[#allocation33_spill] sm:$0xff] %v3879_v8  ;;  %v544_v9 = vld [vmem:[#allocation9 + $0x128] sm:$0xff]  ;;  %5675 = vst [vmem:[#allocation35_spill] sm:$0xff] %v3883_v11  ;;  %v3927_v41 = vcombine.high %v571_v37, %v575_v38  ;;  %v3931_v47 = vcombine.low %v571_v37, %v575_v38  ;;  %v579_v53 = vld [vmem:[#allocation9 + $0x240] sm:$0xff] }
  0x62   :  { %341 = vmatprep.subr.bf16.mxu1 %v3394_v13  ;;  %1326 = vmatpush1.bf16.msra.mxu0 %v3859_v59  ;;  %5670 = vst [vmem:[#allocation30_spill] sm:$0xff] %v3869_v2  ;;  %5672 = vst [vmem:[#allocation32_spill] sm:$0xff] %v3873_v4  ;;  %v3881_v10 = vcombine.high %v540_v7, %v544_v9  ;;  %v3885_v12 = vcombine.low %v540_v7, %v544_v9  ;;  %v547_v13 = vld [vmem:[#allocation9 + $0x140] sm:$0xff]  ;;  %v572_v39 = vld [vmem:[#allocation9 + $0x208] sm:$0xff] }
  0x63   :  { %5689 = vst [vmem:[#allocation49_spill] sm:$0xff] %v3927_v41  ;;  %v576_v45 = vld [vmem:[#allocation9 + $0x228] sm:$0xff]  ;;  %5691 = vst [vmem:[#allocation51_spill] sm:$0xff] %v3931_v47  ;;  %v583_v54 = vld [vmem:[#allocation9 + $0x260] sm:$0xff] }
  0x64   :  { %5674 = vst [vmem:[#allocation34_spill] sm:$0xff] %v3881_v10  ;;  %5676 = vst [vmem:[#allocation36_spill] sm:$0xff] %v3885_v12  ;;  %v3929_v46 = vcombine.high %v572_v39, %v576_v45  ;;  %v3933_v49 = vcombine.low %v572_v39, %v576_v45  ;;  %v580_v55 = vld [vmem:[#allocation9 + $0x248] sm:$0xff]  ;;  %v3939_v57 = vcombine.high %v579_v53, %v583_v54  ;;  %v587_v5 = vld [vmem:[#allocation9 + $0x280] sm:$0xff] }
  0x65   :  { %342 = vmatpush1.bf16.msra.mxu1 %v3396_v14  ;;  %v551_v14 = vld [vmem:[#allocation9 + $0x160] sm:$0xff]  ;;  %v3943_v63 = vcombine.low %v579_v53, %v583_v54  ;;  %v588_v7 = vld [vmem:[#allocation9 + $0x288] sm:$0xff] }
  0x66   :  { %343 = vmatprep.subr.bf16.mxu1 %v3397_v15  ;;  %v548_v15 = vld [vmem:[#allocation9 + $0x148] sm:$0xff]  ;;  %5690 = vst [vmem:[#allocation50_spill] sm:$0xff] %v3929_v46  ;;  %5692 = vst [vmem:[#allocation52_spill] sm:$0xff] %v3933_v49  ;;  %v591_v6 = vld [vmem:[#allocation9 + $0x2a0] sm:$0xff] }
  0x67   :  { %5693 = vst [vmem:[#allocation53_spill] sm:$0xff] %v3939_v57  ;;  %5695 = vst [vmem:[#allocation55_spill] sm:$0xff] %v3943_v63  ;;  %v3951_v9 = vcombine.high %v587_v5, %v591_v6  ;;  %v603_v37 = vld [vmem:[#allocation9 + $0x300] sm:$0xff]  ;;  %v604_v39 = vld [vmem:[#allocation9 + $0x308] sm:$0xff] }
  0x68   :  { %v607_v38 = vld [vmem:[#allocation9 + $0x320] sm:$0xff]  ;;  %v608_v53 = vld [vmem:[#allocation9 + $0x328] sm:$0xff] }
  0x69   :  { %344 = vmatpush1.bf16.msra.mxu1 %v3399_v16  ;;  %v3891_v16 = vcombine.high %v547_v13, %v551_v14  ;;  %5697 = vst [vmem:[#allocation57_spill] sm:$0xff] %v3951_v9  ;;  %v3975_v45 = vcombine.high %v603_v37, %v607_v38  ;;  %v3977_v54 = vcombine.high %v604_v39, %v608_v53 }
  0x6a   :  { %402 = vmatprep.subr.bf16.mxu1 %v3403_v17  ;;  %v552_v17 = vld [vmem:[#allocation9 + $0x168] sm:$0xff] }
  0x6b   :  { %5677 = vst [vmem:[#allocation37_spill] sm:$0xff] %v3891_v16  ;;  %5705 = vst [vmem:[#allocation65_spill] sm:$0xff] %v3975_v45 }
  0x6c   :  { %362 = vmatmul.mubr.bf16.vlgmr.msra.gmra.mrb[0].mxu1 %v3400_v18  ;;  %5706 = vst [vmem:[#allocation66_spill] sm:$0xff] %v3977_v54 }
  0x6d   :  { %403 = vmatpush1.bf16.msra.mxu1 %v3401_v19  ;;  %371 = vmatprep.mubr.bf16.mxu1 %v3724_v0  ;;  %v3895_v19 = vcombine.low %v547_v13, %v551_v14  ;;  %v592_v13 = vld [vmem:[#allocation9 + $0x2a8] sm:$0xff] }
  0x6e   :  { %404 = vmatprep.subr.bf16.mxu1 %v3406_v20  ;;  %v3897_v20 = vcombine.low %v548_v15, %v552_v17  ;;  %v3953_v14 = vcombine.high %v588_v7, %v592_v13 }
  0x6f   :  { %5679 = vst [vmem:[#allocation39_spill] sm:$0xff] %v3895_v19 }
  0x70   :  { %5680 = vst [vmem:[#allocation40_spill] sm:$0xff] %v3897_v20  ;;  %5698 = vst [vmem:[#allocation58_spill] sm:$0xff] %v3953_v14 }
  0x71   :  { %405 = vmatpush1.bf16.msra.mxu1 %v3404_v21  ;;  %v555_v21 = vld [vmem:[#allocation9 + $0x180] sm:$0xff] }
  0x72   :  { %406 = vmatprep.subr.bf16.mxu1 %v3410_v22  ;;  %v559_v22 = vld [vmem:[#allocation9 + $0x1a0] sm:$0xff] }
  0x74   :  { %372 = vmatmul.mubr.bf16.gmra.mrb[4].mxu1 %v3407_v23 }
  0x75   :  { %407 = vmatpush1.bf16.msra.mxu1 %v3408_v24  ;;  %381 = vmatprep.mubr.bf16.mxu1 %v3724_v0  ;;  %v3903_v24 = vcombine.high %v555_v21, %v559_v22 }
  0x76   :  { %408 = vmatprep.subr.bf16.mxu1 %v3413_v25  ;;  %v560_v25 = vld [vmem:[#allocation9 + $0x1a8] sm:$0xff] }
  0x77   :  { %5681 = vst [vmem:[#allocation41_spill] sm:$0xff] %v3903_v24 }
  0x79   :  { %409 = vmatpush1.bf16.msra.mxu1 %v3411_v26 }
  0x7a   :  { %410 = vmatprep.subr.bf16.mxu1 %v3417_v27  ;;  %v3907_v27 = vcombine.low %v555_v21, %v559_v22  ;;  %v595_v21 = vld [vmem:[#allocation9 + $0x2c0] sm:$0xff] }
  0x7b   :  { %v599_v22 = vld [vmem:[#allocation9 + $0x2e0] sm:$0xff] }
  0x7c   :  { %382 = vmatmul.mubr.bf16.gmra.mrb[8].mxu1 %v3414_v28  ;;  %5683 = vst [vmem:[#allocation43_spill] sm:$0xff] %v3907_v27 }
  0x7d   :  { %411 = vmatpush1.bf16.msra.mxu1 %v3415_v29  ;;  %391 = vmatprep.mubr.bf16.mxu1 %v3724_v0  ;;  %v563_v29 = vld [vmem:[#allocation9 + $0x1c0] sm:$0xff] }
  0x7e   :  { %412 = vmatprep.subr.bf16.mxu1 %v3420_v30  ;;  %v567_v30 = vld [vmem:[#allocation9 + $0x1e0] sm:$0xff] }
  0x81   :  { %413 = vmatpush1.bf16.msra.mxu1 %v3418_v31  ;;  %v564_v31 = vld [vmem:[#allocation9 + $0x1c8] sm:$0xff] }
  0x82   :  { %414 = vmatprep.subr.bf16.mxu1 %v3424_v32  ;;  %v3915_v32 = vcombine.high %v563_v29, %v567_v30 }
  0x84   :  { %392 = vmatmul.mubr.bf16.gmra.mrb[12].mxu1 %v3421_v33  ;;  %5685 = vst [vmem:[#allocation45_spill] sm:$0xff] %v3915_v32 }
  0x85   :  { %415 = vmatpush1.bf16.msra.mxu1 %v3422_v34  ;;  %434 = vmatprep.mubr.bf16.mxu1 %v3724_v0 }
  0x86   :  { %416 = vmatprep.subr.bf16.mxu1 %v3427_v35  ;;  %v3919_v35 = vcombine.low %v563_v29, %v567_v30  ;;  %v600_v29 = vld [vmem:[#allocation9 + $0x2e8] sm:$0xff] }
  0x88   :  { %5687 = vst [vmem:[#allocation47_spill] sm:$0xff] %v3919_v35 }
  0x89   :  { %417 = vmatpush1.bf16.msra.mxu1 %v3425_v36 }
  0x8a   :  { %1362 = vmatprep.subr.bf16.mxu1 %v3833_v42 }
  0x8c   :  { %435 = vmatmul.mubr.bf16.vlgmr.msra.gmra.mrb[16].mxu1 %v3400_v18  ;;  %v3893_v18 = vcombine.high %v548_v15, %v552_v17  ;;  %v3955_v15 = vcombine.low %v587_v5, %v591_v6  ;;  %v3957_v17 = vcombine.low %v588_v7, %v592_v13  ;;  %v611_v5 = vld [vmem:[#allocation9 + $0x340] sm:$0xff]  ;;  %v612_v7 = vld [vmem:[#allocation9 + $0x348] sm:$0xff] }
  0x8d   :  { %444 = vmatprep.mubr.bf16.mxu1 %v3724_v0  ;;  %1363 = vmatpush1.bf16.msra.mxu1 %v3837_v44  ;;  %v615_v6 = vld [vmem:[#allocation9 + $0x360] sm:$0xff] }
  0x8e   :  { %1364 = vmatprep.subr.bf16.mxu1 %v3845_v50  ;;  %5678 = vst [vmem:[#allocation38_spill] sm:$0xff] %v3893_v18  ;;  %5699 = vst [vmem:[#allocation59_spill] sm:$0xff] %v3955_v15  ;;  %v3987_v13 = vcombine.high %v611_v5, %v615_v6 }
  0x8f   :  { %5700 = vst [vmem:[#allocation60_spill] sm:$0xff] %v3957_v17 }
  0x90   :  { %5709 = vst [vmem:[#allocation69_spill] sm:$0xff] %v3987_v13 }
  0x91   :  { %1365 = vmatpush1.bf16.msra.mxu1 %v3849_v52 }
  0x92   :  { %1366 = vmatprep.subr.bf16.mxu1 %v3857_v58 }
  0x94   :  { %445 = vmatmul.mubr.bf16.gmra.mrb[20].mxu1 %v3407_v23  ;;  %v556_v23 = vld [vmem:[#allocation9 + $0x188] sm:$0xff] }
  0x95   :  { %454 = vmatprep.mubr.bf16.mxu1 %v3724_v0  ;;  %1367 = vmatpush1.bf16.msra.mxu1 %v3861_v60  ;;  %v3905_v26 = vcombine.high %v556_v23, %v560_v25 }
  0x96   :  { %1368 = vmatprep.subr.bf16.mxu1 %v3869_v2 }
  0x97   :  { %5682 = vst [vmem:[#allocation42_spill] sm:$0xff] %v3905_v26 }
  0x99   :  { %1369 = vmatpush1.bf16.msra.mxu1 %v3873_v4 }
  0x9a   :  { %1370 = vmatprep.subr.bf16.mxu1 %v3881_v10 }
  0x9c   :  { %455 = vmatmul.mubr.bf16.gmra.mrb[24].mxu1 %v3414_v28  ;;  %v3909_v28 = vcombine.low %v556_v23, %v560_v25  ;;  %v596_v23 = vld [vmem:[#allocation9 + $0x2c8] sm:$0xff]  ;;  %v3963_v25 = vcombine.high %v595_v21, %v599_v22 }
  0x9d   :  { %464 = vmatprep.mubr.bf16.mxu1 %v3724_v0  ;;  %v3867_v0 = vcombine.high %v531_v61, %v535_v62  ;;  %1371 = vmatpush1.bf16.msra.mxu1 %v3885_v12  ;;  %v584_v61 = vld [vmem:[#allocation9 + $0x268] sm:$0xff]  ;;  %v3965_v30 = vcombine.high %v596_v23, %v600_v29 }
  0x9e   :  { %1372 = vmatprep.subr.bf16.mxu1 %v3893_v18  ;;  %5684 = vst [vmem:[#allocation44_spill] sm:$0xff] %v3909_v28  ;;  %v3941_v62 = vcombine.high %v580_v55, %v584_v61  ;;  %v3945_v1 = vcombine.low %v580_v55, %v584_v61  ;;  %5701 = vst [vmem:[#allocation61_spill] sm:$0xff] %v3963_v25  ;;  %v3979_v55 = vcombine.low %v603_v37, %v607_v38  ;;  %v619_v37 = vld [vmem:[#allocation9 + $0x380] sm:$0xff] }
  0x9f   :  { %5669 = vst [vmem:[#allocation29_spill] sm:$0xff] %v3867_v0  ;;  %1327 = vmatprep.subr.bf16.mxu0 %v3867_v0  ;;  %5702 = vst [vmem:[#allocation62_spill] sm:$0xff] %v3965_v30  ;;  %v3981_v61 = vcombine.low %v604_v39, %v608_v53  ;;  %v623_v38 = vld [vmem:[#allocation9 + $0x3a0] sm:$0xff]  ;;  %v620_v39 = vld [vmem:[#allocation9 + $0x388] sm:$0xff] }
  0xa0   :  { %1328 = vmatpush1.bf16.msra.mxu0 %v3871_v3  ;;  %5694 = vst [vmem:[#allocation54_spill] sm:$0xff] %v3941_v62  ;;  %5696 = vst [vmem:[#allocation56_spill] sm:$0xff] %v3945_v1  ;;  %v3999_v53 = vcombine.high %v619_v37, %v623_v38 }
  0xa1   :  { %1329 = vmatprep.subr.bf16.mxu0 %v3879_v8  ;;  %1373 = vmatpush1.bf16.msra.mxu1 %v3897_v20  ;;  %5707 = vst [vmem:[#allocation67_spill] sm:$0xff] %v3979_v55  ;;  %5708 = vst [vmem:[#allocation68_spill] sm:$0xff] %v3981_v61 }
  0xa2   :  { %1374 = vmatprep.subr.bf16.mxu1 %v3905_v26  ;;  %5713 = vst [vmem:[#allocation73_spill] sm:$0xff] %v3999_v53 }
  0xa4   :  { %465 = vmatmul.mubr.bf16.gmra.mrb[28].mxu1 %v3421_v33  ;;  %1330 = vmatpush1.bf16.msra.mxu0 %v3883_v11  ;;  %v568_v33 = vld [vmem:[#allocation9 + $0x1e8] sm:$0xff] }
  0xa5   :  { %1331 = vmatprep.subr.bf16.mxu0 %v3891_v16  ;;  %1375 = vmatpush1.bf16.msra.mxu1 %v3909_v28  ;;  %v3917_v34 = vcombine.high %v564_v31, %v568_v33  ;;  %v3921_v36 = vcombine.low %v564_v31, %v568_v33  ;;  %v3967_v31 = vcombine.low %v595_v21, %v599_v22  ;;  %v616_v21 = vld [vmem:[#allocation9 + $0x368] sm:$0xff] }
  0xa6   :  { %v3969_v33 = vcombine.low %v596_v23, %v600_v29  ;;  %v3989_v22 = vcombine.high %v612_v7, %v616_v21  ;;  %v3991_v23 = vcombine.low %v611_v5, %v615_v6  ;;  %v3993_v29 = vcombine.low %v612_v7, %v616_v21  ;;  %v627_v7 = vld [vmem:[#allocation9 + $0x3c0] sm:$0xff] }
  0xa7   :  { %5686 = vst [vmem:[#allocation46_spill] sm:$0xff] %v3917_v34  ;;  %5688 = vst [vmem:[#allocation48_spill] sm:$0xff] %v3921_v36  ;;  %1376 = vmatprep.subr.bf16.mxu1 %v3917_v34  ;;  %v4003_v5 = vcombine.low %v619_v37, %v623_v38  ;;  %v631_v21 = vld [vmem:[#allocation9 + $0x3e0] sm:$0xff]  ;;  %v509_v38 = vld [vmem:[#allocation9 + $0x10] sm:$0xff] }
  0xa8   :  { %1332 = vmatpush1.bf16.msra.mxu0 %v3895_v19  ;;  %5703 = vst [vmem:[#allocation63_spill] sm:$0xff] %v3967_v31  ;;  %5704 = vst [vmem:[#allocation64_spill] sm:$0xff] %v3969_v33  ;;  %v4015_v37 = vcombine.low %v627_v7, %v631_v21 }
  0xa9   :  { %1333 = vmatprep.subr.bf16.mxu0 %v3903_v24  ;;  %1377 = vmatpush1.bf16.msra.mxu1 %v3921_v36  ;;  %5710 = vst [vmem:[#allocation70_spill] sm:$0xff] %v3989_v22  ;;  %5711 = vst [vmem:[#allocation71_spill] sm:$0xff] %v3991_v23 }
  0xaa   :  { %1378 = vmatprep.subr.bf16.mxu1 %v3929_v46  ;;  %5712 = vst [vmem:[#allocation72_spill] sm:$0xff] %v3993_v29  ;;  %5715 = vst [vmem:[#allocation75_spill] sm:$0xff] %v4003_v5 }
  0xab   :  { %5719 = vst [vmem:[#allocation79_spill] sm:$0xff] %v4015_v37 }
  0xac   :  { %1334 = vmatpush1.bf16.msra.mxu0 %v3907_v27 }
  0xad   :  { %1335 = vmatprep.subr.bf16.mxu0 %v3915_v32  ;;  %1379 = vmatpush1.bf16.msra.mxu1 %v3933_v49 }
  0xae   :  { %1380 = vmatprep.subr.bf16.mxu1 %v3941_v62 }
  0xb0   :  { %1336 = vmatpush1.bf16.msra.mxu0 %v3919_v35 }
  0xb1   :  { %1337 = vmatprep.subr.bf16.mxu0 %v3927_v41  ;;  %1381 = vmatpush1.bf16.msra.mxu1 %v3945_v1 }
  0xb2   :  { %1382 = vmatprep.subr.bf16.mxu1 %v3953_v14 }
  0xb4   :  { %1338 = vmatpush1.bf16.msra.mxu0 %v3931_v47 }
  0xb5   :  { %1339 = vmatprep.subr.bf16.mxu0 %v3939_v57  ;;  %1383 = vmatpush1.bf16.msra.mxu1 %v3957_v17 }
  0xb6   :  { %1384 = vmatprep.subr.bf16.mxu1 %v3965_v30 }
  0xb8   :  { %1340 = vmatpush1.bf16.msra.mxu0 %v3943_v63 }
  0xb9   :  { %1341 = vmatprep.subr.bf16.mxu0 %v3951_v9  ;;  %1385 = vmatpush1.bf16.msra.mxu1 %v3969_v33 }
  0xba   :  { %1386 = vmatprep.subr.bf16.mxu1 %v3977_v54 }
  0xbc   :  { %1342 = vmatpush1.bf16.msra.mxu0 %v3955_v15 }
  0xbd   :  { %1343 = vmatprep.subr.bf16.mxu0 %v3963_v25  ;;  %1387 = vmatpush1.bf16.msra.mxu1 %v3981_v61  ;;  %v624_v61 = vld [vmem:[#allocation9 + $0x3a8] sm:$0xff] }
  0xbe   :  { %1388 = vmatprep.subr.bf16.mxu1 %v3989_v22  ;;  %v4005_v6 = vcombine.low %v620_v39, %v624_v61  ;;  %v632_v22 = vld [vmem:[#allocation9 + $0x3e8] sm:$0xff] }
  0xc0   :  { %1344 = vmatpush1.bf16.msra.mxu0 %v3967_v31  ;;  %5716 = vst [vmem:[#allocation76_spill] sm:$0xff] %v4005_v6 }
  0xc1   :  { %1345 = vmatprep.subr.bf16.mxu0 %v3975_v45  ;;  %1389 = vmatpush1.bf16.msra.mxu1 %v3993_v29  ;;  %v4011_v29 = vcombine.high %v627_v7, %v631_v21  ;;  %v125_v21 = vlaneseq }
  0xc3   :  { %5717 = vst [vmem:[#allocation77_spill] sm:$0xff] %v4011_v29 }
  0xc4   :  { %1346 = vmatpush1.bf16.msra.mxu0 %v3979_v55  ;;  %v4001_v55 = vcombine.high %v620_v39, %v624_v61  ;;  %v513_v39 = vld [vmem:[#allocation9 + $0x30] sm:$0xff] }
  0xc5   :  { %1347 = vmatprep.subr.bf16.mxu0 %v3987_v13  ;;  %v4027_v7 = vcombine.low %v509_v38, %v513_v39 }
  0xc6   :  { %5714 = vst [vmem:[#allocation74_spill] sm:$0xff] %v4001_v55  ;;  %1390 = vmatprep.subr.bf16.mxu1 %v4001_v55  ;;  %v514_v55 = vld [vmem:[#allocation9 + $0x38] sm:$0xff] }
  0xc7   :  { %1391 = vmatpush1.bf16.msra.mxu1 %v4005_v6  ;;  %v4023_v6 = vcombine.high %v509_v38, %v513_v39  ;;  %v123_v38 = vld [vmem:[%s5357_s2] sm:$0xf] }
  0xc8   :  { %1348 = vmatpush1.bf16.msra.mxu0 %v3991_v23  ;;  %v628_v23 = vld [vmem:[#allocation9 + $0x3c8] sm:$0xff] }
  0xc9   :  { %1349 = vmatprep.subr.bf16.mxu0 %v3999_v53  ;;  %v4013_v13 = vcombine.high %v628_v23, %v632_v22  ;;  %v4017_v61 = vcombine.low %v628_v23, %v632_v22  ;;  %5721 = vst [vmem:[#allocation81_spill] sm:$0xff] %v4023_v6  ;;  %v5389_v22 = vmov 0.0|0.0  }
  0xca   :  { %1353 = vmatprep.mubr.bf16.mxu0 %v5389_v22  ;;  %1394 = vmatprep.mubr.bf16.mxu1 %v5389_v22 }
  0xcb   :  { %5718 = vst [vmem:[#allocation78_spill] sm:$0xff] %v4013_v13  ;;  %5720 = vst [vmem:[#allocation80_spill] sm:$0xff] %v4017_v61  ;;  %1392 = vmatprep.subr.bf16.mxu1 %v4013_v13 }
  0xcc   :  { %1350 = vmatpush1.bf16.msra.mxu0 %v4003_v5  ;;  %v510_v5 = vld [vmem:[#allocation9 + $0x18] sm:$0xff]  ;;  %1393 = vmatpush1.bf16.msra.mxu1 %v4017_v61  ;;  %v4035_v61 = vshrl.u32 %v125_v21, 7 }
  0xcd   :  { %1351 = vmatprep.subr.bf16.mxu0 %v4011_v29  ;;  %v4025_v53 = vcombine.high %v510_v5, %v514_v55  ;;  %v4031_v23 = vcombine.low %v510_v5, %v514_v55 }
  0xce   :  { %5724 = vst [vmem:[#allocation84_spill] sm:$0xff] %v4035_v61  ;;  %v5414_v39 = vsub.s32 1, %v4035_v61 }
  0xcf   :  { %5722 = vst [vmem:[#allocation82_spill] sm:$0xff] %v4025_v53  ;;  %5723 = vst [vmem:[#allocation83_spill] sm:$0xff] %v4031_v23  ;;  %1444 = vmatprep.subr.bf16.mxu1 %v4025_v53 }
  0xd0   :  { %1352 = vmatpush1.bf16.msra.mxu0 %v4015_v37  ;;  %v5409_v37 = vsub.s32 0, %v4035_v61  ;;  %v132_v22 = vrot.slane %v123_v38, %v5414_v39 }
  0xd1   :  { %1403 = vmatprep.subr.bf16.mxu0 %v4023_v6 }
  0xd2   :  { %v128_v55 = vrot.slane %v123_v38, %v5409_v37 }
 0x13f   :  { %v363_v13 = vpop.f32.mrb[0].mxu1 }
 0x140   :  { %v365_v5 = vpop.f32.mrb[1].mxu1 }
 0x141   :  { %v367_v53 = vpop.f32.mrb[2].mxu1  ;;  %v366_v39 = vadd.f32 %v365_v5, %v132_v22 }
 0x142   :  { %v4046_v6 = vadd.f32 %v367_v53, %v128_v55  ;;  %v369_v21 = vpop.f32.mrb[3].mxu1 }
 0x143   :  { %v4048_v29 = vadd.f32 %v369_v21, %v132_v22 }
 0x144   :  { %5725 = vst [vmem:[#allocation85_spill] sm:$0xff] %v4046_v6 }
 0x145   :  { %5726 = vst [vmem:[#allocation86_spill] sm:$0xff] %v4048_v29  ;;  %v364_v29 = vadd.f32 %v363_v13, %v128_v55 }
 0x147   :  { %v373_v54 = vpop.f32.mrb[4].mxu1 }
 0x148   :  { %v4050_v45 = vadd.f32 %v373_v54, %v128_v55  ;;  %v375_v33 = vpop.f32.mrb[5].mxu1 }
 0x149   :  { %v4052_v31 = vadd.f32 %v375_v33, %v132_v22  ;;  %v377_v30 = vpop.f32.mrb[6].mxu1 }
 0x14a   :  { %5727 = vst [vmem:[#allocation87_spill] sm:$0xff] %v4050_v45  ;;  %v4054_v25 = vadd.f32 %v377_v30, %v128_v55  ;;  %v379_v37 = vpop.f32.mrb[7].mxu1  ;;  %v661_v30 = vmul.f32 0.5, %v364_v29 }
 0x14b   :  { %5728 = vst [vmem:[#allocation88_spill] sm:$0xff] %v4052_v31  ;;  %v4056_v17 = vadd.f32 %v379_v37, %v132_v22  ;;  %v665_v31 = vmul.f32 0.5, %v366_v39 }
 0x14c   :  { %5729 = vst [vmem:[#allocation89_spill] sm:$0xff] %v4054_v25 }
 0x14d   :  { %5730 = vst [vmem:[#allocation90_spill] sm:$0xff] %v4056_v17  ;;  %3436 = vtanh.f32 %v665_v31 }
 0x14e   :  { %3438 = vtanh.f32 %v661_v30 }
 0x14f   :  { %v383_v15 = vpop.f32.mrb[8].mxu1 }
 0x150   :  { %v4058_v14 = vadd.f32 %v383_v15, %v128_v55  ;;  %v385_v53 = vpop.f32.mrb[9].mxu1  ;;  %v5417_v15 = vsub.s32 2, %v4035_v61 }
 0x151   :  { %v4060_v6 = vadd.f32 %v385_v53, %v132_v22  ;;  %v387_v21 = vpop.f32.mrb[10].mxu1 }
 0x152   :  { %5731 = vst [vmem:[#allocation91_spill] sm:$0xff] %v4058_v14  ;;  %v4062_v54 = vadd.f32 %v387_v21, %v128_v55  ;;  %v389_v45 = vpop.f32.mrb[11].mxu1  ;;  %v136_v29 = vrot.slane %v123_v38, %v5417_v15 }
 0x153   :  { %5732 = vst [vmem:[#allocation92_spill] sm:$0xff] %v4060_v6  ;;  %v4064_v33 = vadd.f32 %v389_v45, %v132_v22  ;;  %v5418_v6 = vsub.s32 3, %v4035_v61 }
 0x154   :  { %5733 = vst [vmem:[#allocation93_spill] sm:$0xff] %v4062_v54 }
 0x155   :  { %5734 = vst [vmem:[#allocation94_spill] sm:$0xff] %v4064_v33 }
 0x157   :  { %v393_v25 = vpop.f32.mrb[12].mxu1  ;;  %v3437_v33 = vpop.eup %3436 }
 0x158   :  { %v4066_v37 = vadd.f32 %v393_v25, %v128_v55  ;;  %v395_v17 = vpop.f32.mrb[13].mxu1  ;;  %v140_v25 = vrot.slane %v123_v38, %v5418_v6 }
 0x159   :  { %v4069_v5 = vadd.f32 %v395_v17, %v132_v22  ;;  %v397_v53 = vpop.f32.mrb[14].mxu1 }
 0x15a   :  { %5735 = vst [vmem:[#allocation95_spill] sm:$0xff] %v4066_v37  ;;  %v4072_v13 = vadd.f32 %v397_v53, %v128_v55  ;;  %v399_v21 = vpop.f32.mrb[15].mxu1  ;;  %v667_v53 = vmul.f32 0.5, %v3437_v33 }
 0x15b   :  { %5736 = vst [vmem:[#allocation96_spill] sm:$0xff] %v4069_v5  ;;  %v4074_v45 = vadd.f32 %v399_v21, %v132_v22  ;;  %v3439_v22 = vpop.eup %3438 }
 0x15c   :  { %5737 = vst [vmem:[#allocation97_spill] sm:$0xff] %v4072_v13  ;;  %v668_v6 = vadd.f32 0.5, %v667_v53 }
 0x15d   :  { %5738 = vst [vmem:[#allocation98_spill] sm:$0xff] %v4074_v45  ;;  %v663_v45 = vmul.f32 0.5, %v3439_v22 }
 0x15f   :  { %v436_v31 = vpop.f32.mrb[16].mxu1 }
 0x160   :  { %v437_v39 = vadd.f32 %v436_v31, %v136_v29  ;;  %v438_v37 = vpop.f32.mrb[17].mxu1 }
 0x161   :  { %v439_v17 = vadd.f32 %v438_v37, %v140_v25  ;;  %v440_v5 = vpop.f32.mrb[18].mxu1 }
 0x162   :  { %3440 = vtanh.f32 %v437_v39  ;;  %v4080_v54 = vadd.f32 %v440_v5, %v136_v29  ;;  %v442_v55 = vpop.f32.mrb[19].mxu1  ;;  %v664_v39 = vadd.f32 0.5, %v663_v45 }
 0x163   :  { %v4082_v30 = vadd.f32 %v442_v55, %v140_v25  ;;  %v670_v21 = vmul.f32 0.5, %v439_v17 }
 0x165   :  { %5739 = vst [vmem:[#allocation99_spill] sm:$0xff] %v4082_v30  ;;  %3442 = vtanh.f32 %v670_v21  ;;  %v674_v30 = vmul.f32 0.0, %v668_v6 }
 0x167   :  { %v446_v15 = vpop.f32.mrb[20].mxu1 }
 0x168   :  { %v4084_v13 = vadd.f32 %v446_v15, %v136_v29  ;;  %v448_v38 = vpop.f32.mrb[21].mxu1 }
 0x169   :  { %v4086_v31 = vadd.f32 %v448_v38, %v140_v25  ;;  %v450_v37 = vpop.f32.mrb[22].mxu1 }
 0x16a   :  { %5740 = vst [vmem:[#allocation100_spill] sm:$0xff] %v4084_v13  ;;  %v4088_v14 = vadd.f32 %v450_v37, %v136_v29  ;;  %v452_v5 = vpop.f32.mrb[23].mxu1 }
 0x16b   :  { %5741 = vst [vmem:[#allocation101_spill] sm:$0xff] %v4086_v31  ;;  %v4090_v61 = vadd.f32 %v452_v5, %v140_v25  ;;  %v522_v31 = vld [vmem:[#allocation9 + $0x78] sm:$0xff] }
 0x16c   :  { %5742 = vst [vmem:[#allocation102_spill] sm:$0xff] %v4088_v14  ;;  %v3441_v55 = vpop.eup %3440 }
 0x16d   :  { %5743 = vst [vmem:[#allocation103_spill] sm:$0xff] %v4090_v61  ;;  %v675_v33 = vmul.f32 %v3441_v55, %v664_v39 }
 0x16f   :  { %v4092_v17 = vadd.f32 %v675_v33, %v674_v30  ;;  %v456_v22 = vpop.f32.mrb[24].mxu1  ;;  %v3443_v45 = vpop.eup %3442 }
 0x170   :  { %v4094_v15 = vadd.f32 %v456_v22, %v136_v29  ;;  %v458_v13 = vpop.f32.mrb[25].mxu1  ;;  %v672_v61 = vmul.f32 0.5, %v3443_v45 }
 0x171   :  { %5744 = vst [vmem:[#allocation104_spill] sm:$0xff] %v4092_v17  ;;  %3444 = vtanh.f32 %v4092_v17  ;;  %v4097_v53 = vadd.f32 %v458_v13, %v140_v25  ;;  %v460_v21 = vpop.f32.mrb[26].mxu1 }
 0x172   :  { %5745 = vst [vmem:[#allocation105_spill] sm:$0xff] %v4094_v15  ;;  %v4099_v38 = vadd.f32 %v460_v21, %v136_v29  ;;  %v462_v37 = vpop.f32.mrb[27].mxu1  ;;  %v673_v22 = vadd.f32 0.5, %v672_v61  ;;  %v517_v15 = vld [vmem:[#allocation9 + $0x50] sm:$0xff]  ;;  %v526_v61 = vld [vmem:[#allocation9 + $0x98] sm:$0xff] }
 0x173   :  { %5746 = vst [vmem:[#allocation106_spill] sm:$0xff] %v4097_v53  ;;  %v4101_v5 = vadd.f32 %v462_v37, %v140_v25  ;;  %v521_v21 = vld [vmem:[#allocation9 + $0x70] sm:$0xff] }
 0x174   :  { %5747 = vst [vmem:[#allocation107_spill] sm:$0xff] %v4099_v38  ;;  %v518_v38 = vld [vmem:[#allocation9 + $0x58] sm:$0xff] }
 0x175   :  { %5748 = vst [vmem:[#allocation108_spill] sm:$0xff] %v4101_v5  ;;  %v530_v5 = vld [vmem:[#allocation9 + $0xb8] sm:$0xff] }
 0x177   :  { %v466_v6 = vpop.f32.mrb[28].mxu1 }
 0x178   :  { %v4103_v39 = vadd.f32 %v466_v6, %v136_v29  ;;  %v468_v30 = vpop.f32.mrb[29].mxu1  ;;  %v4113_v6 = vcombine.high %v517_v15, %v521_v21 }
 0x179   :  { %v4105_v55 = vadd.f32 %v468_v30, %v140_v25  ;;  %v470_v33 = vpop.f32.mrb[30].mxu1  ;;  %v525_v30 = vld [vmem:[#allocation9 + $0x90] sm:$0xff] }
 0x17a   :  { %5749 = vst [vmem:[#allocation109_spill] sm:$0xff] %v4103_v39  ;;  %v4107_v14 = vadd.f32 %v470_v33, %v136_v29  ;;  %v472_v13 = vpop.f32.mrb[31].mxu1  ;;  %5753 = vst [vmem:[#allocation113_spill] sm:$0xff] %v4113_v6  ;;  %v4115_v39 = vcombine.high %v518_v38, %v522_v31  ;;  %v4121_v29 = vcombine.low %v517_v15, %v521_v21 }
 0x17b   :  { %5750 = vst [vmem:[#allocation110_spill] sm:$0xff] %v4105_v55  ;;  %v3445_v53 = vpop.eup %3444  ;;  %v4109_v17 = vadd.f32 %v472_v13, %v140_v25  ;;  %v529_v55 = vld [vmem:[#allocation9 + $0xb0] sm:$0xff]  ;;  %v4123_v25 = vcombine.low %v518_v38, %v522_v31  ;;  %v4129_v33 = vcombine.high %v526_v61, %v530_v5  ;;  %v4137_v15 = vcombine.low %v526_v61, %v530_v5 }
 0x17c   :  { %5751 = vst [vmem:[#allocation111_spill] sm:$0xff] %v4107_v14  ;;  %v678_v37 = vmul.f32 %v3445_v53, %v673_v22  ;;  %5754 = vst [vmem:[#allocation114_spill] sm:$0xff] %v4115_v39  ;;  %v4127_v53 = vcombine.high %v525_v30, %v529_v55  ;;  %v533_v22 = vld [vmem:[#allocation9 + $0xd0] sm:$0xff]  ;;  %v5759_v14 = vmov 0.0|0.0   ;;  %v4135_v31 = vcombine.low %v525_v30, %v529_v55 }
 0x17d   :  { %5752 = vst [vmem:[#allocation112_spill] sm:$0xff] %v4109_v17  ;;  %5755 = vst [vmem:[#allocation115_spill] sm:$0xff] %v4121_v29  ;;  %v537_v13 = vld [vmem:[#allocation9 + $0xf0] sm:$0xff]  ;;  %v538_v17 = vld [vmem:[#allocation9 + $0xf8] sm:$0xff] }
 0x17e   :  { %v4111_v45 = vpack.c.bf16 %v678_v37, %v678_v37  ;;  %5756 = vst [vmem:[#allocation116_spill] sm:$0xff] %v4123_v25  ;;  %5757 = vst [vmem:[#allocation117_spill] sm:$0xff] %v4127_v53  ;;  %v534_v37 = vld [vmem:[#allocation9 + $0xd8] sm:$0xff]  ;;  %v4141_v38 = vcombine.high %v533_v22, %v537_v13  ;;  %v4147_v55 = vcombine.low %v533_v22, %v537_v13 }
 0x17f   :  { %5758 = vst [vmem:[#allocation118_spill] sm:$0xff] %v4129_v33  ;;  %5760 = vst [vmem:[#allocation119_spill] sm:$0xff] %v4135_v31  ;;  %v4143_v21 = vcombine.high %v534_v37, %v538_v17  ;;  %v4149_v5 = vcombine.low %v534_v37, %v538_v17 }
 0x180   :  { %1354 = vmatmul.mubr.bf16.vlgmr.msra.gmra.mrb[0].mxu0 %v4111_v45  ;;  %1395 = vmatmul.mubr.bf16.vlgmr.msra.gmra.mrb[32].mxu1 %v4111_v45  ;;  %5761 = vst [vmem:[#allocation120_spill] sm:$0xff] %v4137_v15  ;;  %5762 = vst [vmem:[#allocation121_spill] sm:$0xff] %v4141_v38 }
 0x181   :  { %1404 = vmatpush1.bf16.msra.mxu0 %v4027_v7  ;;  %1445 = vmatpush1.bf16.msra.mxu1 %v4031_v23  ;;  %5763 = vst [vmem:[#allocation122_spill] sm:$0xff] %v4143_v21  ;;  %v542_v23 = vld [vmem:[#allocation9 + $0x118] sm:$0xff]  ;;  %5764 = vst [vmem:[#allocation123_spill] sm:$0xff] %v4147_v55 }
 0x182   :  { %1405 = vmatprep.subr.bf16.mxu0 %v4113_v6  ;;  %1446 = vmatprep.subr.bf16.mxu1 %v4115_v39  ;;  %v541_v39 = vld [vmem:[#allocation9 + $0x110] sm:$0xff]  ;;  %5765 = vst [vmem:[#allocation124_spill] sm:$0xff] %v4149_v5 }
 0x183   :  { %1435 = vmatprep.mubr.bf16.mxu0 %v5759_v14  ;;  %1476 = vmatprep.mubr.bf16.mxu1 %v5759_v14  ;;  %v545_v6 = vld [vmem:[#allocation9 + $0x130] sm:$0xff]  ;;  %v546_v14 = vld [vmem:[#allocation9 + $0x138] sm:$0xff] }
 0x184   :  { %v4153_v30 = vcombine.high %v541_v39, %v545_v6  ;;  %v4155_v61 = vcombine.high %v542_v23, %v546_v14  ;;  %v4159_v22 = vcombine.low %v541_v39, %v545_v6  ;;  %v4161_v17 = vcombine.low %v542_v23, %v546_v14 }
 0x185   :  { %1406 = vmatpush1.bf16.msra.mxu0 %v4121_v29  ;;  %1447 = vmatpush1.bf16.msra.mxu1 %v4123_v25  ;;  %v550_v25 = vld [vmem:[#allocation9 + $0x158] sm:$0xff] }
 0x186   :  { %1407 = vmatprep.subr.bf16.mxu0 %v4127_v53  ;;  %1448 = vmatprep.subr.bf16.mxu1 %v4129_v33  ;;  %5766 = vst [vmem:[#allocation125_spill] sm:$0xff] %v4153_v30  ;;  %5767 = vst [vmem:[#allocation126_spill] sm:$0xff] %v4155_v61  ;;  %v549_v33 = vld [vmem:[#allocation9 + $0x150] sm:$0xff]  ;;  %v554_v29 = vld [vmem:[#allocation9 + $0x178] sm:$0xff] }
 0x187   :  { %v553_v53 = vld [vmem:[#allocation9 + $0x170] sm:$0xff]  ;;  %5768 = vst [vmem:[#allocation127_spill] sm:$0xff] %v4159_v22  ;;  %5769 = vst [vmem:[#allocation128_spill] sm:$0xff] %v4161_v17  ;;  %v4167_v37 = vcombine.high %v550_v25, %v554_v29  ;;  %v4173_v23 = vcombine.low %v550_v25, %v554_v29 }
 0x188   :  { %v4165_v13 = vcombine.high %v549_v33, %v553_v53  ;;  %v4171_v39 = vcombine.low %v549_v33, %v553_v53 }
 0x189   :  { %1408 = vmatpush1.bf16.msra.mxu0 %v4135_v31  ;;  %1449 = vmatpush1.bf16.msra.mxu1 %v4137_v15  ;;  %5771 = vst [vmem:[#allocation130_spill] sm:$0xff] %v4167_v37  ;;  %v558_v15 = vld [vmem:[#allocation9 + $0x198] sm:$0xff]  ;;  %5773 = vst [vmem:[#allocation132_spill] sm:$0xff] %v4173_v23 }
 0x18a   :  { %1409 = vmatprep.subr.bf16.mxu0 %v4141_v38  ;;  %1450 = vmatprep.subr.bf16.mxu1 %v4143_v21  ;;  %5770 = vst [vmem:[#allocation129_spill] sm:$0xff] %v4165_v13  ;;  %v557_v21 = vld [vmem:[#allocation9 + $0x190] sm:$0xff]  ;;  %v562_v31 = vld [vmem:[#allocation9 + $0x1b8] sm:$0xff]  ;;  %5772 = vst [vmem:[#allocation131_spill] sm:$0xff] %v4171_v39 }
 0x18b   :  { %v561_v38 = vld [vmem:[#allocation9 + $0x1b0] sm:$0xff]  ;;  %v4179_v14 = vcombine.high %v558_v15, %v562_v31  ;;  %v4185_v29 = vcombine.low %v558_v15, %v562_v31 }
 0x18c   :  { %v4177_v6 = vcombine.high %v557_v21, %v561_v38  ;;  %v4183_v53 = vcombine.low %v557_v21, %v561_v38 }
 0x18d   :  { %1410 = vmatpush1.bf16.msra.mxu0 %v4147_v55  ;;  %1451 = vmatpush1.bf16.msra.mxu1 %v4149_v5  ;;  %5775 = vst [vmem:[#allocation134_spill] sm:$0xff] %v4179_v14  ;;  %v566_v5 = vld [vmem:[#allocation9 + $0x1d8] sm:$0xff]  ;;  %5777 = vst [vmem:[#allocation136_spill] sm:$0xff] %v4185_v29 }
 0x18e   :  { %1411 = vmatprep.subr.bf16.mxu0 %v4153_v30  ;;  %1452 = vmatprep.subr.bf16.mxu1 %v4155_v61  ;;  %5774 = vst [vmem:[#allocation133_spill] sm:$0xff] %v4177_v6  ;;  %v565_v61 = vld [vmem:[#allocation9 + $0x1d0] sm:$0xff]  ;;  %v570_v55 = vld [vmem:[#allocation9 + $0x1f8] sm:$0xff]  ;;  %5776 = vst [vmem:[#allocation135_spill] sm:$0xff] %v4183_v53 }
 0x18f   :  { %v569_v30 = vld [vmem:[#allocation9 + $0x1f0] sm:$0xff]  ;;  %v4191_v33 = vcombine.high %v566_v5, %v570_v55  ;;  %v4197_v31 = vcombine.low %v566_v5, %v570_v55 }
 0x190   :  { %v4189_v25 = vcombine.high %v565_v61, %v569_v30  ;;  %v4195_v38 = vcombine.low %v565_v61, %v569_v30 }
 0x191   :  { %1412 = vmatpush1.bf16.msra.mxu0 %v4159_v22  ;;  %1453 = vmatpush1.bf16.msra.mxu1 %v4161_v17  ;;  %5779 = vst [vmem:[#allocation138_spill] sm:$0xff] %v4191_v33  ;;  %v574_v17 = vld [vmem:[#allocation9 + $0x218] sm:$0xff]  ;;  %5781 = vst [vmem:[#allocation140_spill] sm:$0xff] %v4197_v31 }
 0x192   :  { %1413 = vmatprep.subr.bf16.mxu0 %v4165_v13  ;;  %1454 = vmatprep.subr.bf16.mxu1 %v4167_v37  ;;  %5778 = vst [vmem:[#allocation137_spill] sm:$0xff] %v4189_v25  ;;  %v573_v37 = vld [vmem:[#allocation9 + $0x210] sm:$0xff]  ;;  %v578_v22 = vld [vmem:[#allocation9 + $0x238] sm:$0xff]  ;;  %5780 = vst [vmem:[#allocation139_spill] sm:$0xff] %v4195_v38 }
 0x193   :  { %v577_v13 = vld [vmem:[#allocation9 + $0x230] sm:$0xff]  ;;  %v4203_v21 = vcombine.high %v574_v17, %v578_v22  ;;  %v4209_v55 = vcombine.low %v574_v17, %v578_v22 }
 0x194   :  { %v4201_v15 = vcombine.high %v573_v37, %v577_v13  ;;  %v4207_v30 = vcombine.low %v573_v37, %v577_v13 }
 0x195   :  { %1414 = vmatpush1.bf16.msra.mxu0 %v4171_v39  ;;  %1455 = vmatpush1.bf16.msra.mxu1 %v4173_v23  ;;  %5783 = vst [vmem:[#allocation142_spill] sm:$0xff] %v4203_v21  ;;  %v582_v23 = vld [vmem:[#allocation9 + $0x258] sm:$0xff]  ;;  %5785 = vst [vmem:[#allocation144_spill] sm:$0xff] %v4209_v55 }
 0x196   :  { %1415 = vmatprep.subr.bf16.mxu0 %v4177_v6  ;;  %1456 = vmatprep.subr.bf16.mxu1 %v4179_v14  ;;  %5782 = vst [vmem:[#allocation141_spill] sm:$0xff] %v4201_v15  ;;  %v581_v14 = vld [vmem:[#allocation9 + $0x250] sm:$0xff]  ;;  %v586_v39 = vld [vmem:[#allocation9 + $0x278] sm:$0xff]  ;;  %5784 = vst [vmem:[#allocation143_spill] sm:$0xff] %v4207_v30 }
 0x197   :  { %v585_v6 = vld [vmem:[#allocation9 + $0x270] sm:$0xff]  ;;  %v4215_v61 = vcombine.high %v582_v23, %v586_v39  ;;  %v4221_v22 = vcombine.low %v582_v23, %v586_v39 }
 0x198   :  { %v4213_v5 = vcombine.high %v581_v14, %v585_v6  ;;  %v4219_v13 = vcombine.low %v581_v14, %v585_v6 }
 0x199   :  { %1416 = vmatpush1.bf16.msra.mxu0 %v4183_v53  ;;  %1457 = vmatpush1.bf16.msra.mxu1 %v4185_v29  ;;  %5787 = vst [vmem:[#allocation146_spill] sm:$0xff] %v4215_v61  ;;  %v590_v29 = vld [vmem:[#allocation9 + $0x298] sm:$0xff]  ;;  %5789 = vst [vmem:[#allocation148_spill] sm:$0xff] %v4221_v22 }
 0x19a   :  { %1417 = vmatprep.subr.bf16.mxu0 %v4189_v25  ;;  %1458 = vmatprep.subr.bf16.mxu1 %v4191_v33  ;;  %5786 = vst [vmem:[#allocation145_spill] sm:$0xff] %v4213_v5  ;;  %v589_v33 = vld [vmem:[#allocation9 + $0x290] sm:$0xff]  ;;  %v594_v53 = vld [vmem:[#allocation9 + $0x2b8] sm:$0xff]  ;;  %5788 = vst [vmem:[#allocation147_spill] sm:$0xff] %v4219_v13 }
 0x19b   :  { %v593_v25 = vld [vmem:[#allocation9 + $0x2b0] sm:$0xff]  ;;  %v4227_v37 = vcombine.high %v590_v29, %v594_v53  ;;  %v4233_v39 = vcombine.low %v590_v29, %v594_v53 }
 0x19c   :  { %v4225_v17 = vcombine.high %v589_v33, %v593_v25  ;;  %v4231_v6 = vcombine.low %v589_v33, %v593_v25 }
 0x19d   :  { %1418 = vmatpush1.bf16.msra.mxu0 %v4195_v38  ;;  %1459 = vmatpush1.bf16.msra.mxu1 %v4197_v31  ;;  %5791 = vst [vmem:[#allocation150_spill] sm:$0xff] %v4227_v37  ;;  %v598_v31 = vld [vmem:[#allocation9 + $0x2d8] sm:$0xff]  ;;  %5793 = vst [vmem:[#allocation152_spill] sm:$0xff] %v4233_v39 }
 0x19e   :  { %1419 = vmatprep.subr.bf16.mxu0 %v4201_v15  ;;  %1460 = vmatprep.subr.bf16.mxu1 %v4203_v21  ;;  %5790 = vst [vmem:[#allocation149_spill] sm:$0xff] %v4225_v17  ;;  %v597_v21 = vld [vmem:[#allocation9 + $0x2d0] sm:$0xff]  ;;  %v602_v38 = vld [vmem:[#allocation9 + $0x2f8] sm:$0xff]  ;;  %5792 = vst [vmem:[#allocation151_spill] sm:$0xff] %v4231_v6 }
 0x19f   :  { %v601_v15 = vld [vmem:[#allocation9 + $0x2f0] sm:$0xff]  ;;  %v4239_v14 = vcombine.high %v598_v31, %v602_v38  ;;  %v4245_v53 = vcombine.low %v598_v31, %v602_v38 }
 0x1a0   :  { %v4237_v23 = vcombine.high %v597_v21, %v601_v15  ;;  %v4243_v25 = vcombine.low %v597_v21, %v601_v15 }
 0x1a1   :  { %1420 = vmatpush1.bf16.msra.mxu0 %v4207_v30  ;;  %1461 = vmatpush1.bf16.msra.mxu1 %v4209_v55  ;;  %5795 = vst [vmem:[#allocation154_spill] sm:$0xff] %v4239_v14  ;;  %v606_v55 = vld [vmem:[#allocation9 + $0x318] sm:$0xff]  ;;  %5797 = vst [vmem:[#allocation156_spill] sm:$0xff] %v4245_v53 }
 0x1a2   :  { %1421 = vmatprep.subr.bf16.mxu0 %v4213_v5  ;;  %1462 = vmatprep.subr.bf16.mxu1 %v4215_v61  ;;  %5794 = vst [vmem:[#allocation153_spill] sm:$0xff] %v4237_v23  ;;  %v605_v61 = vld [vmem:[#allocation9 + $0x310] sm:$0xff]  ;;  %v610_v30 = vld [vmem:[#allocation9 + $0x338] sm:$0xff]  ;;  %5796 = vst [vmem:[#allocation155_spill] sm:$0xff] %v4243_v25 }
 0x1a3   :  { %v609_v5 = vld [vmem:[#allocation9 + $0x330] sm:$0xff]  ;;  %v4251_v33 = vcombine.high %v606_v55, %v610_v30  ;;  %v4257_v38 = vcombine.low %v606_v55, %v610_v30 }
 0x1a4   :  { %v4249_v29 = vcombine.high %v605_v61, %v609_v5  ;;  %v4255_v15 = vcombine.low %v605_v61, %v609_v5 }
 0x1a5   :  { %1422 = vmatpush1.bf16.msra.mxu0 %v4219_v13  ;;  %1463 = vmatpush1.bf16.msra.mxu1 %v4221_v22  ;;  %5799 = vst [vmem:[#allocation158_spill] sm:$0xff] %v4251_v33  ;;  %v614_v22 = vld [vmem:[#allocation9 + $0x358] sm:$0xff]  ;;  %5801 = vst [vmem:[#allocation160_spill] sm:$0xff] %v4257_v38 }
 0x1a6   :  { %1423 = vmatprep.subr.bf16.mxu0 %v4225_v17  ;;  %1464 = vmatprep.subr.bf16.mxu1 %v4227_v37  ;;  %5798 = vst [vmem:[#allocation157_spill] sm:$0xff] %v4249_v29  ;;  %v613_v37 = vld [vmem:[#allocation9 + $0x350] sm:$0xff]  ;;  %v618_v13 = vld [vmem:[#allocation9 + $0x378] sm:$0xff]  ;;  %5800 = vst [vmem:[#allocation159_spill] sm:$0xff] %v4255_v15 }
 0x1a7   :  { %v617_v17 = vld [vmem:[#allocation9 + $0x370] sm:$0xff]  ;;  %v4263_v21 = vcombine.high %v614_v22, %v618_v13  ;;  %v4269_v30 = vcombine.low %v614_v22, %v618_v13 }
 0x1a8   :  { %v4261_v31 = vcombine.high %v613_v37, %v617_v17  ;;  %v4267_v5 = vcombine.low %v613_v37, %v617_v17 }
 0x1a9   :  { %1424 = vmatpush1.bf16.msra.mxu0 %v4231_v6  ;;  %1465 = vmatpush1.bf16.msra.mxu1 %v4233_v39  ;;  %5803 = vst [vmem:[#allocation162_spill] sm:$0xff] %v4263_v21  ;;  %v622_v39 = vld [vmem:[#allocation9 + $0x398] sm:$0xff]  ;;  %5805 = vst [vmem:[#allocation164_spill] sm:$0xff] %v4269_v30 }
 0x1aa   :  { %1425 = vmatprep.subr.bf16.mxu0 %v4237_v23  ;;  %1466 = vmatprep.subr.bf16.mxu1 %v4239_v14  ;;  %5802 = vst [vmem:[#allocation161_spill] sm:$0xff] %v4261_v31  ;;  %v621_v14 = vld [vmem:[#allocation9 + $0x390] sm:$0xff]  ;;  %v626_v6 = vld [vmem:[#allocation9 + $0x3b8] sm:$0xff]  ;;  %5804 = vst [vmem:[#allocation163_spill] sm:$0xff] %v4267_v5 }
 0x1ab   :  { %v625_v23 = vld [vmem:[#allocation9 + $0x3b0] sm:$0xff]  ;;  %v4275_v61 = vcombine.high %v622_v39, %v626_v6  ;;  %v4281_v13 = vcombine.low %v622_v39, %v626_v6  ;;  %v5816_v39 = vld [vmem:[#allocation60_spill] sm:$0xff] }
 0x1ac   :  { %v4273_v55 = vcombine.high %v621_v14, %v625_v23  ;;  %v4279_v17 = vcombine.low %v621_v14, %v625_v23  ;;  %v5815_v6 = vld [vmem:[#allocation59_spill] sm:$0xff]  ;;  %v5817_v23 = vld [vmem:[#allocation61_spill] sm:$0xff]  ;;  %v5818_v14 = vld [vmem:[#allocation62_spill] sm:$0xff] }
 0x1ad   :  { %1426 = vmatpush1.bf16.msra.mxu0 %v4243_v25  ;;  %1467 = vmatpush1.bf16.msra.mxu1 %v4245_v53  ;;  %5807 = vst [vmem:[#allocation166_spill] sm:$0xff] %v4275_v61  ;;  %v630_v53 = vld [vmem:[#allocation9 + $0x3d8] sm:$0xff]  ;;  %5809 = vst [vmem:[#allocation168_spill] sm:$0xff] %v4281_v13 }
 0x1ae   :  { %1427 = vmatprep.subr.bf16.mxu0 %v4249_v29  ;;  %1468 = vmatprep.subr.bf16.mxu1 %v4251_v33  ;;  %5806 = vst [vmem:[#allocation165_spill] sm:$0xff] %v4273_v55  ;;  %v629_v33 = vld [vmem:[#allocation9 + $0x3d0] sm:$0xff]  ;;  %v634_v25 = vld [vmem:[#allocation9 + $0x3f8] sm:$0xff]  ;;  %5808 = vst [vmem:[#allocation167_spill] sm:$0xff] %v4279_v17 }
 0x1af   :  { %v633_v29 = vld [vmem:[#allocation9 + $0x3f0] sm:$0xff]  ;;  %v4287_v37 = vcombine.high %v630_v53, %v634_v25 }
 0x1b0   :  { %v4285_v22 = vcombine.high %v629_v33, %v633_v29 }
 0x1b1   :  { %1428 = vmatpush1.bf16.msra.mxu0 %v4255_v15  ;;  %1469 = vmatpush1.bf16.msra.mxu1 %v4257_v38  ;;  %5811 = vst [vmem:[#allocation170_spill] sm:$0xff] %v4287_v37 }
 0x1b2   :  { %1429 = vmatprep.subr.bf16.mxu0 %v4261_v31  ;;  %1470 = vmatprep.subr.bf16.mxu1 %v4263_v21  ;;  %5810 = vst [vmem:[#allocation169_spill] sm:$0xff] %v4285_v22  ;;  %v4291_v21 = vcombine.low %v629_v33, %v633_v29  ;;  %v5821_v29 = vld [vmem:[#allocation65_spill] sm:$0xff]  ;;  %v5822_v33 = vld [vmem:[#allocation66_spill] sm:$0xff] }
 0x1b4   :  { %5812 = vst [vmem:[#allocation171_spill] sm:$0xff] %v4291_v21 }
 0x1b5   :  { %1430 = vmatpush1.bf16.msra.mxu0 %v4267_v5  ;;  %1471 = vmatpush1.bf16.msra.mxu1 %v4269_v30  ;;  %v4293_v5 = vcombine.low %v630_v53, %v634_v25  ;;  %v5819_v25 = vld [vmem:[#allocation63_spill] sm:$0xff]  ;;  %v5820_v53 = vld [vmem:[#allocation64_spill] sm:$0xff] }
 0x1b6   :  { %1431 = vmatprep.subr.bf16.mxu0 %v4273_v55  ;;  %1472 = vmatprep.subr.bf16.mxu1 %v4275_v61 }
 0x1b7   :  { %5813 = vst [vmem:[#allocation172_spill] sm:$0xff] %v4293_v5 }
 0x1b9   :  { %1432 = vmatpush1.bf16.msra.mxu0 %v4279_v17  ;;  %1473 = vmatpush1.bf16.msra.mxu1 %v4281_v13 }
 0x1ba   :  { %1433 = vmatprep.subr.bf16.mxu0 %v4285_v22  ;;  %1474 = vmatprep.subr.bf16.mxu1 %v4287_v37 }
 0x1bd   :  { %1434 = vmatpush1.bf16.msra.mxu0 %v4291_v21  ;;  %1475 = vmatpush1.bf16.msra.mxu1 %v4293_v5 }
 0x1be   :  { %1537 = vmatprep.subr.bf16.mxu0 %v3831_v40  ;;  %1578 = vmatprep.subr.bf16.mxu1 %v3833_v42 }
 0x1c0   :  { %1436 = vmatmul.mubr.bf16.vlgmr.msra.gmra.mrb[4].mxu0 %v4111_v45  ;;  %1477 = vmatmul.mubr.bf16.vlgmr.msra.gmra.mrb[36].mxu1 %v4111_v45  ;;  %v5814_v45 = vld [vmem:[#allocation58_spill] sm:$0xff] }
 0x1c1   :  { %1538 = vmatpush1.bf16.msra.mxu0 %v3835_v43  ;;  %1579 = vmatpush1.bf16.msra.mxu1 %v3837_v44 }
 0x1c2   :  { %1539 = vmatprep.subr.bf16.mxu0 %v3843_v48  ;;  %1580 = vmatprep.subr.bf16.mxu1 %v3845_v50 }
 0x1c5   :  { %1540 = vmatpush1.bf16.msra.mxu0 %v3847_v51  ;;  %1581 = vmatpush1.bf16.msra.mxu1 %v3849_v52 }
 0x1c6   :  { %1541 = vmatprep.subr.bf16.mxu0 %v3855_v56  ;;  %1582 = vmatprep.subr.bf16.mxu1 %v3857_v58 }
 0x1c9   :  { %1542 = vmatpush1.bf16.msra.mxu0 %v3859_v59  ;;  %1583 = vmatpush1.bf16.msra.mxu1 %v3861_v60 }
 0x1ca   :  { %1543 = vmatprep.subr.bf16.mxu0 %v3867_v0  ;;  %1584 = vmatprep.subr.bf16.mxu1 %v3869_v2 }
 0x1cd   :  { %1544 = vmatpush1.bf16.msra.mxu0 %v3871_v3  ;;  %1585 = vmatpush1.bf16.msra.mxu1 %v3873_v4 }
 0x1ce   :  { %1545 = vmatprep.subr.bf16.mxu0 %v3879_v8  ;;  %1586 = vmatprep.subr.bf16.mxu1 %v3881_v10 }
 0x1d1   :  { %1546 = vmatpush1.bf16.msra.mxu0 %v3883_v11  ;;  %1587 = vmatpush1.bf16.msra.mxu1 %v3885_v12 }
 0x1d2   :  { %1547 = vmatprep.subr.bf16.mxu0 %v3891_v16  ;;  %1588 = vmatprep.subr.bf16.mxu1 %v3893_v18 }
 0x1d5   :  { %1548 = vmatpush1.bf16.msra.mxu0 %v3895_v19  ;;  %1589 = vmatpush1.bf16.msra.mxu1 %v3897_v20 }
 0x1d6   :  { %1549 = vmatprep.subr.bf16.mxu0 %v3903_v24  ;;  %1590 = vmatprep.subr.bf16.mxu1 %v3905_v26 }
 0x1d9   :  { %1550 = vmatpush1.bf16.msra.mxu0 %v3907_v27  ;;  %1591 = vmatpush1.bf16.msra.mxu1 %v3909_v28 }
 0x1da   :  { %1551 = vmatprep.subr.bf16.mxu0 %v3915_v32  ;;  %1592 = vmatprep.subr.bf16.mxu1 %v3917_v34 }
 0x1dd   :  { %1552 = vmatpush1.bf16.msra.mxu0 %v3919_v35  ;;  %1593 = vmatpush1.bf16.msra.mxu1 %v3921_v36 }
 0x1de   :  { %1553 = vmatprep.subr.bf16.mxu0 %v3927_v41  ;;  %1594 = vmatprep.subr.bf16.mxu1 %v3929_v46 }
 0x1e1   :  { %1554 = vmatpush1.bf16.msra.mxu0 %v3931_v47  ;;  %1595 = vmatpush1.bf16.msra.mxu1 %v3933_v49  ;;  %v5841_v49 = vld [vmem:[#allocation99_spill] sm:$0xff] }
 0x1e2   :  { %1555 = vmatprep.subr.bf16.mxu0 %v3939_v57  ;;  %1596 = vmatprep.subr.bf16.mxu1 %v3941_v62  ;;  %v5840_v57 = vld [vmem:[#allocation86_spill] sm:$0xff] }
 0x1e5   :  { %1556 = vmatpush1.bf16.msra.mxu0 %v3943_v63  ;;  %1597 = vmatpush1.bf16.msra.mxu1 %v3945_v1  ;;  %v5823_v1 = vld [vmem:[#allocation67_spill] sm:$0xff]  ;;  %v5839_v63 = vld [vmem:[#allocation85_spill] sm:$0xff] }
 0x1e6   :  { %1557 = vmatprep.subr.bf16.mxu0 %v3951_v9  ;;  %1598 = vmatprep.subr.bf16.mxu1 %v5814_v45  ;;  %v5824_v9 = vld [vmem:[#allocation68_spill] sm:$0xff]  ;;  %v5825_v45 = vld [vmem:[#allocation69_spill] sm:$0xff] }
 0x1e9   :  { %1558 = vmatpush1.bf16.msra.mxu0 %v5815_v6  ;;  %1599 = vmatpush1.bf16.msra.mxu1 %v5816_v39  ;;  %v5826_v6 = vld [vmem:[#allocation70_spill] sm:$0xff]  ;;  %v5827_v39 = vld [vmem:[#allocation71_spill] sm:$0xff] }
 0x1ea   :  { %1559 = vmatprep.subr.bf16.mxu0 %v5817_v23  ;;  %1600 = vmatprep.subr.bf16.mxu1 %v5818_v14  ;;  %v5828_v23 = vld [vmem:[#allocation72_spill] sm:$0xff]  ;;  %v5829_v14 = vld [vmem:[#allocation73_spill] sm:$0xff] }
 0x1ed   :  { %1560 = vmatpush1.bf16.msra.mxu0 %v5819_v25  ;;  %1601 = vmatpush1.bf16.msra.mxu1 %v5820_v53  ;;  %v5830_v25 = vld [vmem:[#allocation74_spill] sm:$0xff]  ;;  %v5831_v53 = vld [vmem:[#allocation75_spill] sm:$0xff] }
 0x1ee   :  { %1561 = vmatprep.subr.bf16.mxu0 %v5821_v29  ;;  %1602 = vmatprep.subr.bf16.mxu1 %v5822_v33  ;;  %v5832_v29 = vld [vmem:[#allocation76_spill] sm:$0xff]  ;;  %v5833_v33 = vld [vmem:[#allocation77_spill] sm:$0xff] }
 0x1f1   :  { %1562 = vmatpush1.bf16.msra.mxu0 %v5823_v1  ;;  %1603 = vmatpush1.bf16.msra.mxu1 %v5824_v9  ;;  %v5834_v1 = vld [vmem:[#allocation78_spill] sm:$0xff]  ;;  %v5835_v9 = vld [vmem:[#allocation79_spill] sm:$0xff] }
 0x1f2   :  { %1563 = vmatprep.subr.bf16.mxu0 %v5825_v45  ;;  %1604 = vmatprep.subr.bf16.mxu1 %v5826_v6  ;;  %v5836_v45 = vld [vmem:[#allocation80_spill] sm:$0xff]  ;;  %v5837_v6 = vld [vmem:[#allocation81_spill] sm:$0xff] }
 0x1f5   :  { %1564 = vmatpush1.bf16.msra.mxu0 %v5827_v39  ;;  %1605 = vmatpush1.bf16.msra.mxu1 %v5828_v23  ;;  %v5838_v39 = vld [vmem:[#allocation82_spill] sm:$0xff] }
 0x1f6   :  { %1565 = vmatprep.subr.bf16.mxu0 %v5829_v14  ;;  %1606 = vmatprep.subr.bf16.mxu1 %v5830_v25 }
 0x1f9   :  { %1566 = vmatpush1.bf16.msra.mxu0 %v5831_v53  ;;  %1607 = vmatpush1.bf16.msra.mxu1 %v5832_v29 }
 0x1fa   :  { %1567 = vmatprep.subr.bf16.mxu0 %v5833_v33  ;;  %1608 = vmatprep.subr.bf16.mxu1 %v5834_v1 }
 0x1fd   :  { %1568 = vmatpush1.bf16.msra.mxu0 %v5835_v9  ;;  %1609 = vmatpush1.bf16.msra.mxu1 %v5836_v45 }
 0x1fe   :  { %1619 = vmatprep.subr.bf16.mxu0 %v5837_v6  ;;  %1660 = vmatprep.subr.bf16.mxu1 %v5838_v39 }
 0x253   :  { %v1355_v23 = vpop.f32.mrb[0].mxu0  ;;  %v1396_v14 = vpop.f32.mrb[32].mxu1 }
 0x254   :  { %v1513_v25 = vadd.f32 %v1355_v23, %v5839_v63  ;;  %v1515_v53 = vadd.f32 %v1396_v14, %v4080_v54  ;;  %v1357_v62 = vpop.f32.mrb[1].mxu0  ;;  %v1398_v29 = vpop.f32.mrb[33].mxu1 }
 0x255   :  { %v1514_v33 = vadd.f32 %v1357_v62, %v5840_v57  ;;  %v1516_v1 = vadd.f32 %v1398_v29, %v5841_v49  ;;  %v1359_v47 = vpop.f32.mrb[2].mxu0  ;;  %v1400_v9 = vpop.f32.mrb[34].mxu1  ;;  %v5842_v57 = vld [vmem:[#allocation104_spill] sm:$0xff] }
 0x256   :  { %v1517_v46 = vmul.f32 0.5, %v1513_v25  ;;  %v1360_v45 = vpop.f32.mrb[3].mxu0  ;;  %v1401_v41 = vpop.f32.mrb[35].mxu1  ;;  %v5843_v47 = vld [vmem:[#allocation84_spill] sm:$0xff] }
 0x257   :  { %v1521_v6 = vmul.f32 0.5, %v1514_v33  ;;  %v635_v41 = vld [vmem:[%s5359_s4] sm:$0xf]  ;;  %v5846_v45 = vsub.s32 1, %v5843_v47 }
 0x258   :  { %3446 = vtanh.f32 %v1517_v46  ;;  %v5844_v46 = vsub.s32 0, %v5843_v47 }
 0x259   :  { %3448 = vtanh.f32 %v1521_v6  ;;  %v4383_v6 = vrot.slane %v635_v41, %v5846_v45  ;;  %v5850_v45 = vsub.s32 3, %v5843_v47 }
 0x25a   :  { %3450 = vtanh.f32 %v1515_v53  ;;  %v4379_v9 = vrot.slane %v635_v41, %v5844_v46 }
 0x25b   :  { %5847 = vst [vmem:[#allocation86_spill] sm:$0xff] %v4383_v6 }
 0x25c   :  { %5845 = vst [vmem:[#allocation85_spill] sm:$0xff] %v4379_v9 }
 0x262   :  { %v3447_v39 = vpop.eup %3446 }
 0x263   :  { %v3449_v36 = vpop.eup %3448  ;;  %v1519_v63 = vmul.f32 0.5, %v3447_v39 }
 0x264   :  { %v1523_v23 = vmul.f32 0.5, %v3449_v36  ;;  %v3451_v14 = vpop.eup %3450 }
 0x265   :  { %v1520_v54 = vadd.f32 0.5, %v1519_v63 }
 0x266   :  { %v1524_v35 = vadd.f32 0.5, %v1523_v23 }
 0x267   :  { %v1531_v34 = vmul.f32 %v3451_v14, %v1520_v54 }
 0x268   :  { %v1530_v62 = vmul.f32 %v1524_v35, %v5842_v57  ;;  %v5848_v35 = vsub.s32 2, %v5843_v47 }
 0x26a   :  { %v4372_v49 = vadd.f32 %v1531_v34, %v1530_v62  ;;  %v4388_v34 = vrot.slane %v635_v41, %v5848_v35 }
 0x26c   :  { %5849 = vst [vmem:[#allocation99_spill] sm:$0xff] %v4388_v34 }
 0x293   :  { %v1437_v36 = vpop.f32.mrb[4].mxu0  ;;  %v1478_v39 = vpop.f32.mrb[36].mxu1 }
 0x294   :  { %v1485_v25 = vadd.f32 %v1437_v36, %v4379_v9  ;;  %v1439_v53 = vpop.f32.mrb[5].mxu0  ;;  %v1480_v29 = vpop.f32.mrb[37].mxu1  ;;  %v1487_v46 = vadd.f32 %v1478_v39, %v4388_v34  ;;  %v4394_v36 = vrot.slane %v635_v41, %v5850_v45  ;;  %v1526_v9 = vmul.f32 0.5, %v1516_v1 }
 0x295   :  { %v1486_v33 = vadd.f32 %v1439_v53, %v4383_v6  ;;  %v1441_v63 = vpop.f32.mrb[6].mxu0  ;;  %v1482_v23 = vpop.f32.mrb[38].mxu1 }
 0x296   :  { %v1489_v54 = vmul.f32 0.5, %v1485_v25  ;;  %v1442_v14 = vpop.f32.mrb[7].mxu0  ;;  %v1483_v57 = vpop.f32.mrb[39].mxu1  ;;  %5851 = vst [vmem:[#allocation104_spill] sm:$0xff] %v4394_v36  ;;  %v1488_v35 = vadd.f32 %v1480_v29, %v4394_v36 }
 0x297   :  { %v1493_v62 = vmul.f32 0.5, %v1486_v33 }
 0x298   :  { %3452 = vtanh.f32 %v1489_v54  ;;  %v1498_v32 = vmul.f32 0.5, %v1488_v35 }
 0x299   :  { %3454 = vtanh.f32 %v1493_v62 }
 0x29a   :  { %3456 = vtanh.f32 %v1487_v46 }
 0x29b   :  { %3458 = vtanh.f32 %v1526_v9 }
 0x29c   :  { %3460 = vtanh.f32 %v1498_v32 }
 0x29d   :  { %3462 = vtanh.f32 %v4372_v49 }
 0x2a2   :  { %v3453_v53 = vpop.eup %3452 }
 0x2a3   :  { %v3455_v63 = vpop.eup %3454  ;;  %v1491_v25 = vmul.f32 0.5, %v3453_v53 }
 0x2a4   :  { %v1495_v23 = vmul.f32 0.5, %v3455_v63  ;;  %v3457_v54 = vpop.eup %3456 }
 0x2a5   :  { %v1492_v33 = vadd.f32 0.5, %v1491_v25  ;;  %v3459_v47 = vpop.eup %3458 }
 0x2a6   :  { %v1496_v14 = vadd.f32 0.5, %v1495_v23  ;;  %v3461_v1 = vpop.eup %3460  ;;  %v1528_v29 = vmul.f32 0.5, %v3459_v47  ;;  %v5853_v23 = vld [vmem:[#allocation83_spill] sm:$0xff]  ;;  %v5859_v47 = vld [vmem:[#allocation118_spill] sm:$0xff] }
 0x2a7   :  { %v1503_v39 = vmul.f32 %v3457_v54, %v1492_v33  ;;  %v1500_v62 = vmul.f32 0.5, %v3461_v1  ;;  %v3463_v46 = vpop.eup %3462  ;;  %v5854_v33 = vld [vmem:[#allocation113_spill] sm:$0xff]  ;;  %v5855_v54 = vld [vmem:[#allocation114_spill] sm:$0xff]  ;;  %v5860_v1 = vld [vmem:[#allocation119_spill] sm:$0xff] }
 0x2a8   :  { %v1502_v57 = vmul.f32 0.0, %v1496_v14  ;;  %v1529_v9 = vadd.f32 0.5, %v1528_v29  ;;  %v5856_v14 = vld [vmem:[#allocation115_spill] sm:$0xff]  ;;  %v5861_v29 = vld [vmem:[#allocation120_spill] sm:$0xff] }
 0x2a9   :  { %v1501_v45 = vadd.f32 0.5, %v1500_v62  ;;  %v5862_v62 = vld [vmem:[#allocation121_spill] sm:$0xff] }
 0x2aa   :  { %v4398_v41 = vadd.f32 %v1503_v39, %v1502_v57  ;;  %v1534_v32 = vmul.f32 %v3463_v46, %v1529_v9  ;;  %v5857_v39 = vld [vmem:[#allocation116_spill] sm:$0xff]  ;;  %v5858_v57 = vld [vmem:[#allocation117_spill] sm:$0xff]  ;;  %v5863_v46 = vld [vmem:[#allocation122_spill] sm:$0xff] }
 0x2ab   :  { %v5864_v9 = vld [vmem:[#allocation123_spill] sm:$0xff] }
 0x2ac   :  { %3464 = vtanh.f32 %v4398_v41  ;;  %v4405_v25 = vpack.c.bf16 %v1534_v32, %v1534_v32  ;;  %v5867_v32 = vld [vmem:[#allocation126_spill] sm:$0xff] }
 0x2b6   :  { %v3465_v35 = vpop.eup %3464 }
 0x2b7   :  { %v4401_v53 = vmul.f32 %v3465_v35, %v1501_v45  ;;  %v5865_v45 = vld [vmem:[#allocation124_spill] sm:$0xff]  ;;  %v5866_v35 = vld [vmem:[#allocation125_spill] sm:$0xff] }
 0x2b9   :  { %5852 = vst [vmem:[#allocation84_spill] sm:$0xff] %v4401_v53  ;;  %v1536_v63 = vpack.c.bf16 %v4401_v53, %v4401_v53  ;;  %v5869_v53 = vld [vmem:[#allocation128_spill] sm:$0xff] }
 0x2bb   :  { %1569 = vmatprep.mubr.bf16.mxu0 %v1536_v63  ;;  %1610 = vmatprep.mubr.bf16.mxu1 %v1536_v63 }
 0x2bc   :  { %1570 = vmatmul.mubr.bf16.vlgmr.msra.gmra.mrb[8].mxu0 %v4405_v25  ;;  %1611 = vmatmul.mubr.bf16.vlgmr.msra.gmra.mrb[40].mxu1 %v4405_v25 }
 0x2bd   :  { %1620 = vmatpush1.bf16.msra.mxu0 %v4027_v7  ;;  %1661 = vmatpush1.bf16.msra.mxu1 %v5853_v23 }
 0x2be   :  { %1651 = vmatprep.mubr.bf16.mxu0 %v1536_v63  ;;  %1692 = vmatprep.mubr.bf16.mxu1 %v1536_v63  ;;  %v5868_v63 = vld [vmem:[#allocation127_spill] sm:$0xff] }
 0x2bf   :  { %1621 = vmatprep.subr.bf16.mxu0 %v5854_v33  ;;  %1662 = vmatprep.subr.bf16.mxu1 %v5855_v54 }
 0x2c1   :  { %1622 = vmatpush1.bf16.msra.mxu0 %v5856_v14  ;;  %1663 = vmatpush1.bf16.msra.mxu1 %v5857_v39 }
 0x2c2   :  { %1623 = vmatprep.subr.bf16.mxu0 %v5858_v57  ;;  %1664 = vmatprep.subr.bf16.mxu1 %v5859_v47  ;;  %v5870_v47 = vld [vmem:[#allocation129_spill] sm:$0xff] }
 0x2c5   :  { %1624 = vmatpush1.bf16.msra.mxu0 %v5860_v1  ;;  %1665 = vmatpush1.bf16.msra.mxu1 %v5861_v29  ;;  %v5871_v1 = vld [vmem:[#allocation130_spill] sm:$0xff]  ;;  %v5872_v29 = vld [vmem:[#allocation131_spill] sm:$0xff] }
 0x2c6   :  { %1625 = vmatprep.subr.bf16.mxu0 %v5862_v62  ;;  %1666 = vmatprep.subr.bf16.mxu1 %v5863_v46  ;;  %v5873_v62 = vld [vmem:[#allocation132_spill] sm:$0xff]  ;;  %v5874_v46 = vld [vmem:[#allocation133_spill] sm:$0xff] }
 0x2c9   :  { %1626 = vmatpush1.bf16.msra.mxu0 %v5864_v9  ;;  %1667 = vmatpush1.bf16.msra.mxu1 %v5865_v45  ;;  %v5875_v9 = vld [vmem:[#allocation134_spill] sm:$0xff]  ;;  %v5876_v45 = vld [vmem:[#allocation135_spill] sm:$0xff] }
 0x2ca   :  { %1627 = vmatprep.subr.bf16.mxu0 %v5866_v35  ;;  %1668 = vmatprep.subr.bf16.mxu1 %v5867_v32  ;;  %v5877_v35 = vld [vmem:[#allocation136_spill] sm:$0xff]  ;;  %v5878_v32 = vld [vmem:[#allocation137_spill] sm:$0xff] }
 0x2cd   :  { %1628 = vmatpush1.bf16.msra.mxu0 %v5868_v63  ;;  %1669 = vmatpush1.bf16.msra.mxu1 %v5869_v53  ;;  %v5879_v63 = vld [vmem:[#allocation138_spill] sm:$0xff]  ;;  %v5880_v53 = vld [vmem:[#allocation139_spill] sm:$0xff] }
 0x2ce   :  { %1629 = vmatprep.subr.bf16.mxu0 %v5870_v47  ;;  %1670 = vmatprep.subr.bf16.mxu1 %v5871_v1  ;;  %v5881_v47 = vld [vmem:[#allocation140_spill] sm:$0xff]  ;;  %v5882_v1 = vld [vmem:[#allocation141_spill] sm:$0xff] }
 0x2d1   :  { %1630 = vmatpush1.bf16.msra.mxu0 %v5872_v29  ;;  %1671 = vmatpush1.bf16.msra.mxu1 %v5873_v62  ;;  %v5883_v29 = vld [vmem:[#allocation142_spill] sm:$0xff]  ;;  %v5884_v62 = vld [vmem:[#allocation143_spill] sm:$0xff] }
 0x2d2   :  { %1631 = vmatprep.subr.bf16.mxu0 %v5874_v46  ;;  %1672 = vmatprep.subr.bf16.mxu1 %v5875_v9  ;;  %v5885_v46 = vld [vmem:[#allocation144_spill] sm:$0xff]  ;;  %v5886_v9 = vld [vmem:[#allocation145_spill] sm:$0xff] }
 0x2d5   :  { %1632 = vmatpush1.bf16.msra.mxu0 %v5876_v45  ;;  %1673 = vmatpush1.bf16.msra.mxu1 %v5877_v35  ;;  %v5887_v45 = vld [vmem:[#allocation146_spill] sm:$0xff]  ;;  %v5888_v35 = vld [vmem:[#allocation147_spill] sm:$0xff] }
 0x2d6   :  { %1633 = vmatprep.subr.bf16.mxu0 %v5878_v32  ;;  %1674 = vmatprep.subr.bf16.mxu1 %v5879_v63  ;;  %v5889_v32 = vld [vmem:[#allocation148_spill] sm:$0xff]  ;;  %v5890_v63 = vld [vmem:[#allocation149_spill] sm:$0xff] }
 0x2d9   :  { %1634 = vmatpush1.bf16.msra.mxu0 %v5880_v53  ;;  %1675 = vmatpush1.bf16.msra.mxu1 %v5881_v47  ;;  %v5891_v53 = vld [vmem:[#allocation150_spill] sm:$0xff]  ;;  %v5892_v47 = vld [vmem:[#allocation151_spill] sm:$0xff] }
 0x2da   :  { %1635 = vmatprep.subr.bf16.mxu0 %v5882_v1  ;;  %1676 = vmatprep.subr.bf16.mxu1 %v5883_v29  ;;  %v5893_v1 = vld [vmem:[#allocation152_spill] sm:$0xff]  ;;  %v5894_v29 = vld [vmem:[#allocation153_spill] sm:$0xff] }
 0x2dd   :  { %1636 = vmatpush1.bf16.msra.mxu0 %v5884_v62  ;;  %1677 = vmatpush1.bf16.msra.mxu1 %v5885_v46  ;;  %v5895_v62 = vld [vmem:[#allocation154_spill] sm:$0xff]  ;;  %v5896_v46 = vld [vmem:[#allocation155_spill] sm:$0xff] }
 0x2de   :  { %1637 = vmatprep.subr.bf16.mxu0 %v5886_v9  ;;  %1678 = vmatprep.subr.bf16.mxu1 %v5887_v45  ;;  %v5897_v9 = vld [vmem:[#allocation156_spill] sm:$0xff]  ;;  %v5898_v45 = vld [vmem:[#allocation157_spill] sm:$0xff] }
 0x2e1   :  { %1638 = vmatpush1.bf16.msra.mxu0 %v5888_v35  ;;  %1679 = vmatpush1.bf16.msra.mxu1 %v5889_v32  ;;  %v5899_v35 = vld [vmem:[#allocation158_spill] sm:$0xff] }
 0x2e2   :  { %1639 = vmatprep.subr.bf16.mxu0 %v5890_v63  ;;  %1680 = vmatprep.subr.bf16.mxu1 %v5891_v53 }
 0x2e5   :  { %1640 = vmatpush1.bf16.msra.mxu0 %v5892_v47  ;;  %1681 = vmatpush1.bf16.msra.mxu1 %v5893_v1  ;;  %v5900_v47 = vld [vmem:[#allocation162_spill] sm:$0xff]  ;;  %v5901_v1 = vld [vmem:[#allocation163_spill] sm:$0xff] }
 0x2e6   :  { %1641 = vmatprep.subr.bf16.mxu0 %v5894_v29  ;;  %1682 = vmatprep.subr.bf16.mxu1 %v5895_v62 }
 0x2e9   :  { %1642 = vmatpush1.bf16.msra.mxu0 %v5896_v46  ;;  %1683 = vmatpush1.bf16.msra.mxu1 %v5897_v9 }
 0x2ea   :  { %1643 = vmatprep.subr.bf16.mxu0 %v5898_v45  ;;  %1684 = vmatprep.subr.bf16.mxu1 %v5899_v35 }
 0x2ed   :  { %1644 = vmatpush1.bf16.msra.mxu0 %v4255_v15  ;;  %1685 = vmatpush1.bf16.msra.mxu1 %v4257_v38 }
 0x2ee   :  { %1645 = vmatprep.subr.bf16.mxu0 %v4261_v31  ;;  %1686 = vmatprep.subr.bf16.mxu1 %v5900_v47 }
 0x2f1   :  { %1646 = vmatpush1.bf16.msra.mxu0 %v5901_v1  ;;  %1687 = vmatpush1.bf16.msra.mxu1 %v4269_v30 }
 0x2f2   :  { %1647 = vmatprep.subr.bf16.mxu0 %v4273_v55  ;;  %1688 = vmatprep.subr.bf16.mxu1 %v4275_v61 }
 0x2f5   :  { %1648 = vmatpush1.bf16.msra.mxu0 %v4279_v17  ;;  %1689 = vmatpush1.bf16.msra.mxu1 %v4281_v13 }
 0x2f6   :  { %1649 = vmatprep.subr.bf16.mxu0 %v4285_v22  ;;  %1690 = vmatprep.subr.bf16.mxu1 %v4287_v37 }
 0x2f9   :  { %1650 = vmatpush1.bf16.msra.mxu0 %v4291_v21  ;;  %1691 = vmatpush1.bf16.msra.mxu1 %v4293_v5 }
 0x2fa   :  { %1754 = vmatprep.subr.bf16.mxu0 %v3831_v40  ;;  %1795 = vmatprep.subr.bf16.mxu1 %v3833_v42 }
 0x2fc   :  { %1652 = vmatmul.mubr.bf16.vlgmr.msra.gmra.mrb[12].mxu0 %v4405_v25  ;;  %1693 = vmatmul.mubr.bf16.vlgmr.msra.gmra.mrb[44].mxu1 %v4405_v25  ;;  %v5902_v25 = vld [vmem:[#allocation45_spill] sm:$0xff] }
 0x2fd   :  { %1755 = vmatpush1.bf16.msra.mxu0 %v3835_v43  ;;  %1796 = vmatpush1.bf16.msra.mxu1 %v3837_v44 }
 0x2fe   :  { %1756 = vmatprep.subr.bf16.mxu0 %v3843_v48  ;;  %1797 = vmatprep.subr.bf16.mxu1 %v3845_v50 }
 0x301   :  { %1757 = vmatpush1.bf16.msra.mxu0 %v3847_v51  ;;  %1798 = vmatpush1.bf16.msra.mxu1 %v3849_v52 }
 0x302   :  { %1758 = vmatprep.subr.bf16.mxu0 %v3855_v56  ;;  %1799 = vmatprep.subr.bf16.mxu1 %v3857_v58 }
 0x305   :  { %1759 = vmatpush1.bf16.msra.mxu0 %v3859_v59  ;;  %1800 = vmatpush1.bf16.msra.mxu1 %v3861_v60 }
 0x306   :  { %1760 = vmatprep.subr.bf16.mxu0 %v3867_v0  ;;  %1801 = vmatprep.subr.bf16.mxu1 %v3869_v2  ;;  %v5943_v2 = vld [vmem:[#allocation101_spill] sm:$0xff] }
 0x309   :  { %1761 = vmatpush1.bf16.msra.mxu0 %v3871_v3  ;;  %1802 = vmatpush1.bf16.msra.mxu1 %v3873_v4  ;;  %v5942_v3 = vld [vmem:[#allocation88_spill] sm:$0xff] }
 0x30a   :  { %1762 = vmatprep.subr.bf16.mxu0 %v3879_v8  ;;  %1803 = vmatprep.subr.bf16.mxu1 %v3881_v10  ;;  %v5940_v10 = vld [vmem:[#allocation87_spill] sm:$0xff]  ;;  %v5941_v8 = vld [vmem:[#allocation100_spill] sm:$0xff] }
 0x30d   :  { %1763 = vmatpush1.bf16.msra.mxu0 %v3883_v11  ;;  %1804 = vmatpush1.bf16.msra.mxu1 %v3885_v12  ;;  %v5903_v11 = vld [vmem:[#allocation46_spill] sm:$0xff]  ;;  %v5904_v12 = vld [vmem:[#allocation47_spill] sm:$0xff] }
 0x30e   :  { %1764 = vmatprep.subr.bf16.mxu0 %v3891_v16  ;;  %1805 = vmatprep.subr.bf16.mxu1 %v3893_v18  ;;  %v5905_v16 = vld [vmem:[#allocation48_spill] sm:$0xff]  ;;  %v5906_v18 = vld [vmem:[#allocation49_spill] sm:$0xff] }
 0x311   :  { %1765 = vmatpush1.bf16.msra.mxu0 %v3895_v19  ;;  %1806 = vmatpush1.bf16.msra.mxu1 %v3897_v20  ;;  %v5907_v19 = vld [vmem:[#allocation50_spill] sm:$0xff]  ;;  %v5908_v20 = vld [vmem:[#allocation51_spill] sm:$0xff] }
 0x312   :  { %1766 = vmatprep.subr.bf16.mxu0 %v3903_v24  ;;  %1807 = vmatprep.subr.bf16.mxu1 %v3905_v26  ;;  %v5909_v24 = vld [vmem:[#allocation52_spill] sm:$0xff]  ;;  %v5910_v26 = vld [vmem:[#allocation53_spill] sm:$0xff] }
 0x315   :  { %1767 = vmatpush1.bf16.msra.mxu0 %v3907_v27  ;;  %1808 = vmatpush1.bf16.msra.mxu1 %v3909_v28  ;;  %v5911_v27 = vld [vmem:[#allocation54_spill] sm:$0xff]  ;;  %v5912_v28 = vld [vmem:[#allocation55_spill] sm:$0xff] }
 0x316   :  { %1768 = vmatprep.subr.bf16.mxu0 %v5902_v25  ;;  %1809 = vmatprep.subr.bf16.mxu1 %v5903_v11  ;;  %v5913_v25 = vld [vmem:[#allocation56_spill] sm:$0xff]  ;;  %v5914_v11 = vld [vmem:[#allocation57_spill] sm:$0xff] }
 0x319   :  { %1769 = vmatpush1.bf16.msra.mxu0 %v5904_v12  ;;  %1810 = vmatpush1.bf16.msra.mxu1 %v5905_v16  ;;  %v5915_v12 = vld [vmem:[#allocation58_spill] sm:$0xff]  ;;  %v5916_v16 = vld [vmem:[#allocation59_spill] sm:$0xff] }
 0x31a   :  { %1770 = vmatprep.subr.bf16.mxu0 %v5906_v18  ;;  %1811 = vmatprep.subr.bf16.mxu1 %v5907_v19  ;;  %v5917_v18 = vld [vmem:[#allocation60_spill] sm:$0xff]  ;;  %v5918_v19 = vld [vmem:[#allocation61_spill] sm:$0xff] }
 0x31d   :  { %1771 = vmatpush1.bf16.msra.mxu0 %v5908_v20  ;;  %1812 = vmatpush1.bf16.msra.mxu1 %v5909_v24  ;;  %v5919_v20 = vld [vmem:[#allocation62_spill] sm:$0xff]  ;;  %v5920_v24 = vld [vmem:[#allocation63_spill] sm:$0xff] }
 0x31e   :  { %1772 = vmatprep.subr.bf16.mxu0 %v5910_v26  ;;  %1813 = vmatprep.subr.bf16.mxu1 %v5911_v27  ;;  %v5921_v26 = vld [vmem:[#allocation64_spill] sm:$0xff]  ;;  %v5922_v27 = vld [vmem:[#allocation65_spill] sm:$0xff] }
 0x321   :  { %1773 = vmatpush1.bf16.msra.mxu0 %v5912_v28  ;;  %1814 = vmatpush1.bf16.msra.mxu1 %v5913_v25  ;;  %v5923_v28 = vld [vmem:[#allocation66_spill] sm:$0xff]  ;;  %v5924_v25 = vld [vmem:[#allocation67_spill] sm:$0xff] }
 0x322   :  { %1774 = vmatprep.subr.bf16.mxu0 %v5914_v11  ;;  %1815 = vmatprep.subr.bf16.mxu1 %v5915_v12  ;;  %v5925_v11 = vld [vmem:[#allocation68_spill] sm:$0xff]  ;;  %v5926_v12 = vld [vmem:[#allocation69_spill] sm:$0xff] }
 0x325   :  { %1775 = vmatpush1.bf16.msra.mxu0 %v5916_v16  ;;  %1816 = vmatpush1.bf16.msra.mxu1 %v5917_v18  ;;  %v5927_v16 = vld [vmem:[#allocation70_spill] sm:$0xff]  ;;  %v5928_v18 = vld [vmem:[#allocation71_spill] sm:$0xff] }
 0x326   :  { %1776 = vmatprep.subr.bf16.mxu0 %v5918_v19  ;;  %1817 = vmatprep.subr.bf16.mxu1 %v5919_v20  ;;  %v5929_v19 = vld [vmem:[#allocation72_spill] sm:$0xff]  ;;  %v5930_v20 = vld [vmem:[#allocation73_spill] sm:$0xff] }
 0x329   :  { %1777 = vmatpush1.bf16.msra.mxu0 %v5920_v24  ;;  %1818 = vmatpush1.bf16.msra.mxu1 %v5921_v26  ;;  %v5931_v24 = vld [vmem:[#allocation74_spill] sm:$0xff]  ;;  %v5932_v26 = vld [vmem:[#allocation75_spill] sm:$0xff] }
 0x32a   :  { %1778 = vmatprep.subr.bf16.mxu0 %v5922_v27  ;;  %1819 = vmatprep.subr.bf16.mxu1 %v5923_v28  ;;  %v5933_v27 = vld [vmem:[#allocation76_spill] sm:$0xff]  ;;  %v5934_v28 = vld [vmem:[#allocation77_spill] sm:$0xff] }
 0x32d   :  { %1779 = vmatpush1.bf16.msra.mxu0 %v5924_v25  ;;  %1820 = vmatpush1.bf16.msra.mxu1 %v5925_v11  ;;  %v5935_v25 = vld [vmem:[#allocation78_spill] sm:$0xff]  ;;  %v5936_v11 = vld [vmem:[#allocation79_spill] sm:$0xff] }
 0x32e   :  { %1780 = vmatprep.subr.bf16.mxu0 %v5926_v12  ;;  %1821 = vmatprep.subr.bf16.mxu1 %v5927_v16  ;;  %v5937_v12 = vld [vmem:[#allocation80_spill] sm:$0xff]  ;;  %v5938_v16 = vld [vmem:[#allocation81_spill] sm:$0xff] }
 0x331   :  { %1781 = vmatpush1.bf16.msra.mxu0 %v5928_v18  ;;  %1822 = vmatpush1.bf16.msra.mxu1 %v5929_v19  ;;  %v5939_v18 = vld [vmem:[#allocation82_spill] sm:$0xff] }
 0x332   :  { %1782 = vmatprep.subr.bf16.mxu0 %v5930_v20  ;;  %1823 = vmatprep.subr.bf16.mxu1 %v5931_v24 }
 0x335   :  { %1783 = vmatpush1.bf16.msra.mxu0 %v5932_v26  ;;  %1824 = vmatpush1.bf16.msra.mxu1 %v5933_v27 }
 0x336   :  { %1784 = vmatprep.subr.bf16.mxu0 %v5934_v28  ;;  %1825 = vmatprep.subr.bf16.mxu1 %v5935_v25 }
 0x339   :  { %1785 = vmatpush1.bf16.msra.mxu0 %v5936_v11  ;;  %1826 = vmatpush1.bf16.msra.mxu1 %v5937_v12 }
 0x33a   :  { %1836 = vmatprep.subr.bf16.mxu0 %v5938_v16  ;;  %1877 = vmatprep.subr.bf16.mxu1 %v5939_v18 }
 0x38f   :  { %v1571_v19 = vpop.f32.mrb[8].mxu0  ;;  %v1612_v20 = vpop.f32.mrb[40].mxu1 }
 0x390   :  { %v1730_v24 = vadd.f32 %v1571_v19, %v5940_v10  ;;  %v1732_v26 = vadd.f32 %v1612_v20, %v5941_v8  ;;  %v1573_v4 = vpop.f32.mrb[9].mxu0  ;;  %v1614_v27 = vpop.f32.mrb[41].mxu1 }
 0x391   :  { %v1731_v28 = vadd.f32 %v1573_v4, %v5942_v3  ;;  %v1733_v25 = vadd.f32 %v1614_v27, %v5943_v2  ;;  %v1575_v0 = vpop.f32.mrb[10].mxu0  ;;  %v1616_v11 = vpop.f32.mrb[42].mxu1 }
 0x392   :  { %v1734_v60 = vmul.f32 0.5, %v1730_v24  ;;  %v1576_v12 = vpop.f32.mrb[11].mxu0  ;;  %v1617_v59 = vpop.f32.mrb[43].mxu1  ;;  %v5944_v11 = vld [vmem:[#allocation85_spill] sm:$0xff] }
 0x393   :  { %v1738_v16 = vmul.f32 0.5, %v1731_v28 }
 0x394   :  { %3466 = vtanh.f32 %v1734_v60 }
 0x395   :  { %3468 = vtanh.f32 %v1738_v16 }
 0x396   :  { %3470 = vtanh.f32 %v1732_v26 }
 0x39e   :  { %v3467_v18 = vpop.eup %3466 }
 0x39f   :  { %v3469_v58 = vpop.eup %3468  ;;  %v1736_v10 = vmul.f32 0.5, %v3467_v18 }
 0x3a0   :  { %v1740_v19 = vmul.f32 0.5, %v3469_v58  ;;  %v3471_v20 = vpop.eup %3470 }
 0x3a1   :  { %v1737_v8 = vadd.f32 0.5, %v1736_v10 }
 0x3a2   :  { %v1741_v56 = vadd.f32 0.5, %v1740_v19 }
 0x3a3   :  { %v1748_v52 = vmul.f32 %v3471_v20, %v1737_v8 }
 0x3a4   :  { %v1747_v3 = vmul.f32 %v1741_v56, %v4372_v49  ;;  %v1743_v56 = vmul.f32 0.5, %v1733_v25 }
 0x3a6   :  { %v4544_v2 = vadd.f32 %v1748_v52, %v1747_v3 }
 0x3cf   :  { %v1653_v0 = vpop.f32.mrb[12].mxu0  ;;  %v1694_v4 = vpop.f32.mrb[44].mxu1 }
 0x3d0   :  { %v1701_v59 = vadd.f32 %v1653_v0, %v5944_v11  ;;  %v1655_v12 = vpop.f32.mrb[13].mxu0  ;;  %v1696_v60 = vpop.f32.mrb[45].mxu1  ;;  %v1703_v10 = vadd.f32 %v1694_v4, %v4388_v34 }
 0x3d1   :  { %v1702_v16 = vadd.f32 %v1655_v12, %v4383_v6  ;;  %v1657_v24 = vpop.f32.mrb[14].mxu0  ;;  %v1698_v26 = vpop.f32.mrb[46].mxu1  ;;  %v1704_v52 = vadd.f32 %v1696_v60, %v4394_v36 }
 0x3d2   :  { %v1705_v18 = vmul.f32 0.5, %v1701_v59  ;;  %v1658_v58 = vpop.f32.mrb[15].mxu0  ;;  %v1699_v27 = vpop.f32.mrb[47].mxu1 }
 0x3d3   :  { %v1709_v28 = vmul.f32 0.5, %v1702_v16  ;;  %v1714_v49 = vmul.f32 0.5, %v1704_v52 }
 0x3d4   :  { %3472 = vtanh.f32 %v1705_v18 }
 0x3d5   :  { %3474 = vtanh.f32 %v1709_v28 }
 0x3d6   :  { %3476 = vtanh.f32 %v1703_v10 }
 0x3d7   :  { %3478 = vtanh.f32 %v1743_v56 }
 0x3d8   :  { %3480 = vtanh.f32 %v1714_v49 }
 0x3d9   :  { %3482 = vtanh.f32 %v4544_v2 }
 0x3de   :  { %v3473_v19 = vpop.eup %3472 }
 0x3df   :  { %v3475_v8 = vpop.eup %3474  ;;  %v1707_v20 = vmul.f32 0.5, %v3473_v19  ;;  %v5946_v19 = vld [vmem:[#allocation118_spill] sm:$0xff] }
 0x3e0   :  { %v1711_v3 = vmul.f32 0.5, %v3475_v8  ;;  %v3477_v59 = vpop.eup %3476  ;;  %v5947_v8 = vld [vmem:[#allocation119_spill] sm:$0xff] }
 0x3e1   :  { %v1708_v0 = vadd.f32 0.5, %v1707_v20  ;;  %v3479_v25 = vpop.eup %3478  ;;  %v5948_v20 = vld [vmem:[#allocation120_spill] sm:$0xff] }
 0x3e2   :  { %v1712_v12 = vadd.f32 0.5, %v1711_v3  ;;  %v3481_v60 = vpop.eup %3480  ;;  %v1745_v26 = vmul.f32 0.5, %v3479_v25  ;;  %v5949_v3 = vld [vmem:[#allocation121_spill] sm:$0xff]  ;;  %v5955_v25 = vld [vmem:[#allocation127_spill] sm:$0xff] }
 0x3e3   :  { %v1719_v24 = vmul.f32 %v3477_v59, %v1708_v0  ;;  %v1716_v18 = vmul.f32 0.5, %v3481_v60  ;;  %v3483_v58 = vpop.eup %3482  ;;  %v5950_v0 = vld [vmem:[#allocation122_spill] sm:$0xff]  ;;  %v5951_v59 = vld [vmem:[#allocation123_spill] sm:$0xff]  ;;  %v5956_v60 = vld [vmem:[#allocation128_spill] sm:$0xff] }
 0x3e4   :  { %v1718_v16 = vmul.f32 %v1712_v12, %v4398_v41  ;;  %v1746_v27 = vadd.f32 0.5, %v1745_v26  ;;  %v5952_v12 = vld [vmem:[#allocation124_spill] sm:$0xff]  ;;  %v5957_v26 = vld [vmem:[#allocation129_spill] sm:$0xff] }
 0x3e5   :  { %v1717_v28 = vadd.f32 0.5, %v1716_v18  ;;  %v5958_v18 = vld [vmem:[#allocation130_spill] sm:$0xff] }
 0x3e6   :  { %v4552_v4 = vadd.f32 %v1719_v24, %v1718_v16  ;;  %v1751_v52 = vmul.f32 %v3483_v58, %v1746_v27  ;;  %v5953_v24 = vld [vmem:[#allocation125_spill] sm:$0xff]  ;;  %v5954_v16 = vld [vmem:[#allocation126_spill] sm:$0xff]  ;;  %v5959_v58 = vld [vmem:[#allocation131_spill] sm:$0xff] }
 0x3e7   :  { %v5960_v27 = vld [vmem:[#allocation132_spill] sm:$0xff] }
 0x3e8   :  { %3484 = vtanh.f32 %v4552_v4  ;;  %v4559_v49 = vpack.c.bf16 %v1751_v52, %v1751_v52  ;;  %v5963_v52 = vld [vmem:[#allocation135_spill] sm:$0xff] }
 0x3f2   :  { %v3485_v10 = vpop.eup %3484 }
 0x3f3   :  { %v4555_v56 = vmul.f32 %v3485_v10, %v1717_v28  ;;  %v5961_v28 = vld [vmem:[#allocation133_spill] sm:$0xff]  ;;  %v5962_v10 = vld [vmem:[#allocation134_spill] sm:$0xff] }
 0x3f5   :  { %5945 = vst [vmem:[#allocation83_spill] sm:$0xff] %v4555_v56  ;;  %v1753_v41 = vpack.c.bf16 %v4555_v56, %v4555_v56  ;;  %v5965_v56 = vld [vmem:[#allocation137_spill] sm:$0xff] }
 0x3f7   :  { %1786 = vmatprep.mubr.bf16.mxu0 %v1753_v41  ;;  %1827 = vmatprep.mubr.bf16.mxu1 %v1753_v41 }
 0x3f8   :  { %1787 = vmatmul.mubr.bf16.vlgmr.msra.gmra.mrb[16].mxu0 %v4559_v49  ;;  %1828 = vmatmul.mubr.bf16.vlgmr.msra.gmra.mrb[48].mxu1 %v4559_v49 }
 0x3f9   :  { %1837 = vmatpush1.bf16.msra.mxu0 %v4027_v7  ;;  %1878 = vmatpush1.bf16.msra.mxu1 %v5853_v23 }
 0x3fa   :  { %1868 = vmatprep.mubr.bf16.mxu0 %v1753_v41  ;;  %1909 = vmatprep.mubr.bf16.mxu1 %v1753_v41  ;;  %v5964_v41 = vld [vmem:[#allocation136_spill] sm:$0xff] }
 0x3fb   :  { %1838 = vmatprep.subr.bf16.mxu0 %v5854_v33  ;;  %1879 = vmatprep.subr.bf16.mxu1 %v5855_v54 }
 0x3fd   :  { %1839 = vmatpush1.bf16.msra.mxu0 %v5856_v14  ;;  %1880 = vmatpush1.bf16.msra.mxu1 %v5857_v39 }
 0x3fe   :  { %1840 = vmatprep.subr.bf16.mxu0 %v5858_v57  ;;  %1881 = vmatprep.subr.bf16.mxu1 %v5946_v19 }
 0x401   :  { %1841 = vmatpush1.bf16.msra.mxu0 %v5947_v8  ;;  %1882 = vmatpush1.bf16.msra.mxu1 %v5948_v20 }
 0x402   :  { %1842 = vmatprep.subr.bf16.mxu0 %v5949_v3  ;;  %1883 = vmatprep.subr.bf16.mxu1 %v5950_v0 }
 0x405   :  { %1843 = vmatpush1.bf16.msra.mxu0 %v5951_v59  ;;  %1884 = vmatpush1.bf16.msra.mxu1 %v5952_v12 }
 0x406   :  { %1844 = vmatprep.subr.bf16.mxu0 %v5953_v24  ;;  %1885 = vmatprep.subr.bf16.mxu1 %v5954_v16 }
 0x409   :  { %1845 = vmatpush1.bf16.msra.mxu0 %v5955_v25  ;;  %1886 = vmatpush1.bf16.msra.mxu1 %v5956_v60  ;;  %v5966_v25 = vld [vmem:[#allocation138_spill] sm:$0xff]  ;;  %v5967_v60 = vld [vmem:[#allocation139_spill] sm:$0xff] }
 0x40a   :  { %1846 = vmatprep.subr.bf16.mxu0 %v5957_v26  ;;  %1887 = vmatprep.subr.bf16.mxu1 %v5958_v18  ;;  %v5968_v26 = vld [vmem:[#allocation140_spill] sm:$0xff]  ;;  %v5969_v18 = vld [vmem:[#allocation141_spill] sm:$0xff] }
 0x40d   :  { %1847 = vmatpush1.bf16.msra.mxu0 %v5959_v58  ;;  %1888 = vmatpush1.bf16.msra.mxu1 %v5960_v27  ;;  %v5970_v58 = vld [vmem:[#allocation142_spill] sm:$0xff]  ;;  %v5971_v27 = vld [vmem:[#allocation143_spill] sm:$0xff] }
 0x40e   :  { %1848 = vmatprep.subr.bf16.mxu0 %v5961_v28  ;;  %1889 = vmatprep.subr.bf16.mxu1 %v5962_v10  ;;  %v5972_v28 = vld [vmem:[#allocation144_spill] sm:$0xff]  ;;  %v5973_v10 = vld [vmem:[#allocation145_spill] sm:$0xff] }
 0x411   :  { %1849 = vmatpush1.bf16.msra.mxu0 %v5963_v52  ;;  %1890 = vmatpush1.bf16.msra.mxu1 %v5964_v41  ;;  %v5974_v52 = vld [vmem:[#allocation146_spill] sm:$0xff]  ;;  %v5975_v41 = vld [vmem:[#allocation147_spill] sm:$0xff] }
 0x412   :  { %1850 = vmatprep.subr.bf16.mxu0 %v5965_v56  ;;  %1891 = vmatprep.subr.bf16.mxu1 %v5966_v25 }
 0x415   :  { %1851 = vmatpush1.bf16.msra.mxu0 %v5967_v60  ;;  %1892 = vmatpush1.bf16.msra.mxu1 %v5968_v26  ;;  %v5976_v26 = vld [vmem:[#allocation151_spill] sm:$0xff] }
 0x416   :  { %1852 = vmatprep.subr.bf16.mxu0 %v5969_v18  ;;  %1893 = vmatprep.subr.bf16.mxu1 %v5970_v58  ;;  %v5977_v18 = vld [vmem:[#allocation152_spill] sm:$0xff] }
 0x419   :  { %1853 = vmatpush1.bf16.msra.mxu0 %v5971_v27  ;;  %1894 = vmatpush1.bf16.msra.mxu1 %v5972_v28 }
 0x41a   :  { %1854 = vmatprep.subr.bf16.mxu0 %v5973_v10  ;;  %1895 = vmatprep.subr.bf16.mxu1 %v5974_v52 }
 0x41d   :  { %1855 = vmatpush1.bf16.msra.mxu0 %v5975_v41  ;;  %1896 = vmatpush1.bf16.msra.mxu1 %v5889_v32 }
 0x41e   :  { %1856 = vmatprep.subr.bf16.mxu0 %v5890_v63  ;;  %1897 = vmatprep.subr.bf16.mxu1 %v5891_v53 }
 0x421   :  { %1857 = vmatpush1.bf16.msra.mxu0 %v5976_v26  ;;  %1898 = vmatpush1.bf16.msra.mxu1 %v5977_v18 }
 0x422   :  { %1858 = vmatprep.subr.bf16.mxu0 %v5894_v29  ;;  %1899 = vmatprep.subr.bf16.mxu1 %v5895_v62 }
 0x425   :  { %1859 = vmatpush1.bf16.msra.mxu0 %v5896_v46  ;;  %1900 = vmatpush1.bf16.msra.mxu1 %v5897_v9 }
 0x426   :  { %1860 = vmatprep.subr.bf16.mxu0 %v5898_v45  ;;  %1901 = vmatprep.subr.bf16.mxu1 %v5899_v35 }
 0x429   :  { %1861 = vmatpush1.bf16.msra.mxu0 %v4255_v15  ;;  %1902 = vmatpush1.bf16.msra.mxu1 %v4257_v38 }
 0x42a   :  { %1862 = vmatprep.subr.bf16.mxu0 %v4261_v31  ;;  %1903 = vmatprep.subr.bf16.mxu1 %v5900_v47 }
 0x42d   :  { %1863 = vmatpush1.bf16.msra.mxu0 %v5901_v1  ;;  %1904 = vmatpush1.bf16.msra.mxu1 %v4269_v30 }
 0x42e   :  { %1864 = vmatprep.subr.bf16.mxu0 %v4273_v55  ;;  %1905 = vmatprep.subr.bf16.mxu1 %v4275_v61  ;;  %v6039_v61 = vld [vmem:[#allocation90_spill] sm:$0xff]  ;;  %v6040_v55 = vld [vmem:[#allocation103_spill] sm:$0xff] }
 0x431   :  { %1865 = vmatpush1.bf16.msra.mxu0 %v4279_v17  ;;  %1906 = vmatpush1.bf16.msra.mxu1 %v4281_v13  ;;  %v6038_v13 = vld [vmem:[#allocation102_spill] sm:$0xff] }
 0x432   :  { %1866 = vmatprep.subr.bf16.mxu0 %v4285_v22  ;;  %1907 = vmatprep.subr.bf16.mxu1 %v4287_v37  ;;  %v5982_v37 = vld [vmem:[#allocation28_spill] sm:$0xff]  ;;  %v6037_v22 = vld [vmem:[#allocation89_spill] sm:$0xff] }
 0x435   :  { %1867 = vmatpush1.bf16.msra.mxu0 %v4291_v21  ;;  %1908 = vmatpush1.bf16.msra.mxu1 %v4293_v5  ;;  %v5978_v21 = vld [vmem:[#allocation24_spill] sm:$0xff]  ;;  %v5979_v5 = vld [vmem:[#allocation25_spill] sm:$0xff] }
 0x436   :  { %1971 = vmatprep.subr.bf16.mxu0 %v3831_v40  ;;  %2012 = vmatprep.subr.bf16.mxu1 %v3833_v42  ;;  %v5980_v40 = vld [vmem:[#allocation26_spill] sm:$0xff]  ;;  %v5981_v42 = vld [vmem:[#allocation27_spill] sm:$0xff] }
 0x438   :  { %1869 = vmatmul.mubr.bf16.vlgmr.msra.gmra.mrb[20].mxu0 %v4559_v49  ;;  %1910 = vmatmul.mubr.bf16.vlgmr.msra.gmra.mrb[52].mxu1 %v4559_v49  ;;  %v5983_v49 = vld [vmem:[#allocation29_spill] sm:$0xff] }
 0x439   :  { %1972 = vmatpush1.bf16.msra.mxu0 %v3835_v43  ;;  %2013 = vmatpush1.bf16.msra.mxu1 %v3837_v44  ;;  %v5984_v43 = vld [vmem:[#allocation30_spill] sm:$0xff]  ;;  %v5985_v44 = vld [vmem:[#allocation31_spill] sm:$0xff] }
 0x43a   :  { %1973 = vmatprep.subr.bf16.mxu0 %v3843_v48  ;;  %2014 = vmatprep.subr.bf16.mxu1 %v3845_v50  ;;  %v5986_v48 = vld [vmem:[#allocation32_spill] sm:$0xff]  ;;  %v5987_v50 = vld [vmem:[#allocation33_spill] sm:$0xff] }
 0x43d   :  { %1974 = vmatpush1.bf16.msra.mxu0 %v3847_v51  ;;  %2015 = vmatpush1.bf16.msra.mxu1 %v5978_v21  ;;  %v5988_v51 = vld [vmem:[#allocation34_spill] sm:$0xff]  ;;  %v5989_v21 = vld [vmem:[#allocation35_spill] sm:$0xff] }
 0x43e   :  { %1975 = vmatprep.subr.bf16.mxu0 %v5979_v5  ;;  %2016 = vmatprep.subr.bf16.mxu1 %v5980_v40  ;;  %v5990_v5 = vld [vmem:[#allocation36_spill] sm:$0xff]  ;;  %v5991_v40 = vld [vmem:[#allocation37_spill] sm:$0xff] }
 0x441   :  { %1976 = vmatpush1.bf16.msra.mxu0 %v5981_v42  ;;  %2017 = vmatpush1.bf16.msra.mxu1 %v5982_v37  ;;  %v5992_v42 = vld [vmem:[#allocation38_spill] sm:$0xff]  ;;  %v5993_v37 = vld [vmem:[#allocation39_spill] sm:$0xff] }
 0x442   :  { %1977 = vmatprep.subr.bf16.mxu0 %v5983_v49  ;;  %2018 = vmatprep.subr.bf16.mxu1 %v5984_v43  ;;  %v5994_v49 = vld [vmem:[#allocation40_spill] sm:$0xff]  ;;  %v5995_v43 = vld [vmem:[#allocation41_spill] sm:$0xff] }
 0x445   :  { %1978 = vmatpush1.bf16.msra.mxu0 %v5985_v44  ;;  %2019 = vmatpush1.bf16.msra.mxu1 %v5986_v48  ;;  %v5996_v44 = vld [vmem:[#allocation42_spill] sm:$0xff]  ;;  %v5997_v48 = vld [vmem:[#allocation43_spill] sm:$0xff] }
 0x446   :  { %1979 = vmatprep.subr.bf16.mxu0 %v5987_v50  ;;  %2020 = vmatprep.subr.bf16.mxu1 %v5988_v51  ;;  %v5998_v50 = vld [vmem:[#allocation44_spill] sm:$0xff]  ;;  %v5999_v51 = vld [vmem:[#allocation45_spill] sm:$0xff] }
 0x449   :  { %1980 = vmatpush1.bf16.msra.mxu0 %v5989_v21  ;;  %2021 = vmatpush1.bf16.msra.mxu1 %v5990_v5  ;;  %v6000_v21 = vld [vmem:[#allocation46_spill] sm:$0xff]  ;;  %v6001_v5 = vld [vmem:[#allocation47_spill] sm:$0xff] }
 0x44a   :  { %1981 = vmatprep.subr.bf16.mxu0 %v5991_v40  ;;  %2022 = vmatprep.subr.bf16.mxu1 %v5992_v42  ;;  %v6002_v40 = vld [vmem:[#allocation48_spill] sm:$0xff]  ;;  %v6003_v42 = vld [vmem:[#allocation49_spill] sm:$0xff] }
 0x44d   :  { %1982 = vmatpush1.bf16.msra.mxu0 %v5993_v37  ;;  %2023 = vmatpush1.bf16.msra.mxu1 %v5994_v49  ;;  %v6004_v37 = vld [vmem:[#allocation50_spill] sm:$0xff]  ;;  %v6005_v49 = vld [vmem:[#allocation51_spill] sm:$0xff] }
 0x44e   :  { %1983 = vmatprep.subr.bf16.mxu0 %v5995_v43  ;;  %2024 = vmatprep.subr.bf16.mxu1 %v5996_v44  ;;  %v6006_v43 = vld [vmem:[#allocation52_spill] sm:$0xff]  ;;  %v6007_v44 = vld [vmem:[#allocation53_spill] sm:$0xff] }
 0x451   :  { %1984 = vmatpush1.bf16.msra.mxu0 %v5997_v48  ;;  %2025 = vmatpush1.bf16.msra.mxu1 %v5998_v50  ;;  %v6008_v48 = vld [vmem:[#allocation54_spill] sm:$0xff]  ;;  %v6009_v50 = vld [vmem:[#allocation55_spill] sm:$0xff] }
 0x452   :  { %1985 = vmatprep.subr.bf16.mxu0 %v5999_v51  ;;  %2026 = vmatprep.subr.bf16.mxu1 %v6000_v21  ;;  %v6010_v51 = vld [vmem:[#allocation56_spill] sm:$0xff]  ;;  %v6011_v21 = vld [vmem:[#allocation57_spill] sm:$0xff] }
 0x455   :  { %1986 = vmatpush1.bf16.msra.mxu0 %v6001_v5  ;;  %2027 = vmatpush1.bf16.msra.mxu1 %v6002_v40  ;;  %v6012_v5 = vld [vmem:[#allocation58_spill] sm:$0xff]  ;;  %v6013_v40 = vld [vmem:[#allocation59_spill] sm:$0xff] }
 0x456   :  { %1987 = vmatprep.subr.bf16.mxu0 %v6003_v42  ;;  %2028 = vmatprep.subr.bf16.mxu1 %v6004_v37  ;;  %v6014_v42 = vld [vmem:[#allocation60_spill] sm:$0xff]  ;;  %v6015_v37 = vld [vmem:[#allocation61_spill] sm:$0xff] }
 0x459   :  { %1988 = vmatpush1.bf16.msra.mxu0 %v6005_v49  ;;  %2029 = vmatpush1.bf16.msra.mxu1 %v6006_v43  ;;  %v6016_v49 = vld [vmem:[#allocation62_spill] sm:$0xff]  ;;  %v6017_v43 = vld [vmem:[#allocation63_spill] sm:$0xff] }
 0x45a   :  { %1989 = vmatprep.subr.bf16.mxu0 %v6007_v44  ;;  %2030 = vmatprep.subr.bf16.mxu1 %v6008_v48  ;;  %v6018_v44 = vld [vmem:[#allocation64_spill] sm:$0xff]  ;;  %v6019_v48 = vld [vmem:[#allocation65_spill] sm:$0xff] }
 0x45d   :  { %1990 = vmatpush1.bf16.msra.mxu0 %v6009_v50  ;;  %2031 = vmatpush1.bf16.msra.mxu1 %v6010_v51  ;;  %v6020_v50 = vld [vmem:[#allocation66_spill] sm:$0xff]  ;;  %v6021_v51 = vld [vmem:[#allocation67_spill] sm:$0xff] }
 0x45e   :  { %1991 = vmatprep.subr.bf16.mxu0 %v6011_v21  ;;  %2032 = vmatprep.subr.bf16.mxu1 %v6012_v5  ;;  %v6022_v21 = vld [vmem:[#allocation68_spill] sm:$0xff]  ;;  %v6023_v5 = vld [vmem:[#allocation69_spill] sm:$0xff] }
 0x461   :  { %1992 = vmatpush1.bf16.msra.mxu0 %v6013_v40  ;;  %2033 = vmatpush1.bf16.msra.mxu1 %v6014_v42  ;;  %v6024_v40 = vld [vmem:[#allocation70_spill] sm:$0xff]  ;;  %v6025_v42 = vld [vmem:[#allocation71_spill] sm:$0xff] }
 0x462   :  { %1993 = vmatprep.subr.bf16.mxu0 %v6015_v37  ;;  %2034 = vmatprep.subr.bf16.mxu1 %v6016_v49  ;;  %v6026_v37 = vld [vmem:[#allocation72_spill] sm:$0xff]  ;;  %v6027_v49 = vld [vmem:[#allocation73_spill] sm:$0xff] }
 0x465   :  { %1994 = vmatpush1.bf16.msra.mxu0 %v6017_v43  ;;  %2035 = vmatpush1.bf16.msra.mxu1 %v6018_v44  ;;  %v6028_v43 = vld [vmem:[#allocation74_spill] sm:$0xff]  ;;  %v6029_v44 = vld [vmem:[#allocation75_spill] sm:$0xff] }
 0x466   :  { %1995 = vmatprep.subr.bf16.mxu0 %v6019_v48  ;;  %2036 = vmatprep.subr.bf16.mxu1 %v6020_v50  ;;  %v6030_v48 = vld [vmem:[#allocation76_spill] sm:$0xff]  ;;  %v6031_v50 = vld [vmem:[#allocation77_spill] sm:$0xff] }
 0x469   :  { %1996 = vmatpush1.bf16.msra.mxu0 %v6021_v51  ;;  %2037 = vmatpush1.bf16.msra.mxu1 %v6022_v21  ;;  %v6032_v51 = vld [vmem:[#allocation78_spill] sm:$0xff]  ;;  %v6033_v21 = vld [vmem:[#allocation79_spill] sm:$0xff] }
 0x46a   :  { %1997 = vmatprep.subr.bf16.mxu0 %v6023_v5  ;;  %2038 = vmatprep.subr.bf16.mxu1 %v6024_v40  ;;  %v6034_v5 = vld [vmem:[#allocation80_spill] sm:$0xff]  ;;  %v6035_v40 = vld [vmem:[#allocation81_spill] sm:$0xff] }
 0x46d   :  { %1998 = vmatpush1.bf16.msra.mxu0 %v6025_v42  ;;  %2039 = vmatpush1.bf16.msra.mxu1 %v6026_v37  ;;  %v6036_v42 = vld [vmem:[#allocation82_spill] sm:$0xff] }
 0x46e   :  { %1999 = vmatprep.subr.bf16.mxu0 %v6027_v49  ;;  %2040 = vmatprep.subr.bf16.mxu1 %v6028_v43 }
 0x471   :  { %2000 = vmatpush1.bf16.msra.mxu0 %v6029_v44  ;;  %2041 = vmatpush1.bf16.msra.mxu1 %v6030_v48 }
 0x472   :  { %2001 = vmatprep.subr.bf16.mxu0 %v6031_v50  ;;  %2042 = vmatprep.subr.bf16.mxu1 %v6032_v51 }
 0x475   :  { %2002 = vmatpush1.bf16.msra.mxu0 %v6033_v21  ;;  %2043 = vmatpush1.bf16.msra.mxu1 %v6034_v5 }
 0x476   :  { %2053 = vmatprep.subr.bf16.mxu0 %v6035_v40  ;;  %2094 = vmatprep.subr.bf16.mxu1 %v6036_v42 }
 0x4cb   :  { %v1788_v37 = vpop.f32.mrb[16].mxu0  ;;  %v1829_v49 = vpop.f32.mrb[48].mxu1 }
 0x4cc   :  { %v1947_v43 = vadd.f32 %v1788_v37, %v6037_v22  ;;  %v1949_v44 = vadd.f32 %v1829_v49, %v6038_v13  ;;  %v1790_v17 = vpop.f32.mrb[17].mxu0  ;;  %v1831_v48 = vpop.f32.mrb[49].mxu1 }
 0x4cd   :  { %v1948_v50 = vadd.f32 %v1790_v17, %v6039_v61  ;;  %v1950_v51 = vadd.f32 %v1831_v48, %v6040_v55  ;;  %v1792_v30 = vpop.f32.mrb[18].mxu0  ;;  %v1833_v21 = vpop.f32.mrb[50].mxu1 }
 0x4ce   :  { %v1951_v1 = vmul.f32 0.5, %v1947_v43  ;;  %v1793_v5 = vpop.f32.mrb[19].mxu0  ;;  %v1834_v47 = vpop.f32.mrb[51].mxu1 }
 0x4cf   :  { %v1955_v40 = vmul.f32 0.5, %v1948_v50 }
 0x4d0   :  { %3486 = vtanh.f32 %v1951_v1 }
 0x4d1   :  { %3488 = vtanh.f32 %v1955_v40 }
 0x4d2   :  { %3490 = vtanh.f32 %v1949_v44 }
 0x4da   :  { %v3487_v42 = vpop.eup %3486 }
 0x4db   :  { %v3489_v31 = vpop.eup %3488  ;;  %v1953_v22 = vmul.f32 0.5, %v3487_v42 }
 0x4dc   :  { %v1957_v37 = vmul.f32 0.5, %v3489_v31  ;;  %v3491_v49 = vpop.eup %3490 }
 0x4dd   :  { %v1954_v13 = vadd.f32 0.5, %v1953_v22 }
 0x4de   :  { %v1958_v38 = vadd.f32 0.5, %v1957_v37 }
 0x4df   :  { %v1965_v15 = vmul.f32 %v3491_v49, %v1954_v13 }
 0x4e0   :  { %v1964_v61 = vmul.f32 %v1958_v38, %v4544_v2  ;;  %v1960_v38 = vmul.f32 0.5, %v1950_v51 }
 0x4e2   :  { %v4698_v48 = vadd.f32 %v1965_v15, %v1964_v61 }
 0x50b   :  { %v1870_v21 = vpop.f32.mrb[20].mxu0  ;;  %v1911_v43 = vpop.f32.mrb[52].mxu1 }
 0x50c   :  { %v1918_v5 = vadd.f32 %v1870_v21, %v5944_v11  ;;  %v1872_v50 = vpop.f32.mrb[21].mxu0  ;;  %v1913_v30 = vpop.f32.mrb[53].mxu1  ;;  %v1920_v1 = vadd.f32 %v1911_v43, %v4388_v34 }
 0x50d   :  { %v1919_v40 = vadd.f32 %v1872_v50, %v4383_v6  ;;  %v1874_v44 = vpop.f32.mrb[22].mxu0  ;;  %v1915_v55 = vpop.f32.mrb[54].mxu1  ;;  %v1921_v15 = vadd.f32 %v1913_v30, %v4394_v36 }
 0x50e   :  { %v1922_v42 = vmul.f32 0.5, %v1918_v5  ;;  %v1875_v31 = vpop.f32.mrb[23].mxu0  ;;  %v1916_v17 = vpop.f32.mrb[55].mxu1 }
 0x50f   :  { %v1926_v47 = vmul.f32 0.5, %v1919_v40  ;;  %v1931_v2 = vmul.f32 0.5, %v1921_v15 }
 0x510   :  { %3492 = vtanh.f32 %v1922_v42 }
 0x511   :  { %3494 = vtanh.f32 %v1926_v47 }
 0x512   :  { %3496 = vtanh.f32 %v1920_v1 }
 0x513   :  { %3498 = vtanh.f32 %v1960_v38 }
 0x514   :  { %3500 = vtanh.f32 %v1931_v2  ;;  %v6042_v2 = vld [vmem:[#allocation127_spill] sm:$0xff] }
 0x515   :  { %3502 = vtanh.f32 %v4698_v48 }
 0x51a   :  { %v3493_v22 = vpop.eup %3492 }
 0x51b   :  { %v3495_v37 = vpop.eup %3494  ;;  %v1924_v13 = vmul.f32 0.5, %v3493_v22  ;;  %v6043_v22 = vld [vmem:[#allocation128_spill] sm:$0xff] }
 0x51c   :  { %v1928_v49 = vmul.f32 0.5, %v3495_v37  ;;  %v3497_v21 = vpop.eup %3496  ;;  %v6044_v37 = vld [vmem:[#allocation129_spill] sm:$0xff] }
 0x51d   :  { %v1925_v61 = vadd.f32 0.5, %v1924_v13  ;;  %v3499_v51 = vpop.eup %3498  ;;  %v6045_v13 = vld [vmem:[#allocation130_spill] sm:$0xff] }
 0x51e   :  { %v1929_v5 = vadd.f32 0.5, %v1928_v49  ;;  %v3501_v30 = vpop.eup %3500  ;;  %v1962_v44 = vmul.f32 0.5, %v3499_v51  ;;  %v6046_v49 = vld [vmem:[#allocation131_spill] sm:$0xff]  ;;  %v6052_v51 = vld [vmem:[#allocation140_spill] sm:$0xff] }
 0x51f   :  { %v1936_v50 = vmul.f32 %v3497_v21, %v1925_v61  ;;  %v1933_v55 = vmul.f32 0.5, %v3501_v30  ;;  %v3503_v42 = vpop.eup %3502  ;;  %v6047_v61 = vld [vmem:[#allocation132_spill] sm:$0xff]  ;;  %v6048_v21 = vld [vmem:[#allocation133_spill] sm:$0xff] }
 0x520   :  { %v1935_v40 = vmul.f32 %v1929_v5, %v4552_v4  ;;  %v1963_v31 = vadd.f32 0.5, %v1962_v44  ;;  %v6049_v5 = vld [vmem:[#allocation134_spill] sm:$0xff]  ;;  %v6053_v30 = vld [vmem:[#allocation141_spill] sm:$0xff]  ;;  %v6054_v44 = vld [vmem:[#allocation159_spill] sm:$0xff] }
 0x521   :  { %v1934_v17 = vadd.f32 0.5, %v1933_v55  ;;  %v6055_v55 = vld [vmem:[#allocation160_spill] sm:$0xff] }
 0x522   :  { %v4706_v43 = vadd.f32 %v1936_v50, %v1935_v40  ;;  %v1968_v1 = vmul.f32 %v3503_v42, %v1963_v31  ;;  %v6050_v50 = vld [vmem:[#allocation135_spill] sm:$0xff]  ;;  %v6051_v40 = vld [vmem:[#allocation136_spill] sm:$0xff]  ;;  %v6056_v42 = vld [vmem:[#allocation161_spill] sm:$0xff] }
 0x523   :  { %v6057_v31 = vld [vmem:[#allocation162_spill] sm:$0xff] }
 0x524   :  { %3504 = vtanh.f32 %v4706_v43  ;;  %v4713_v38 = vpack.c.bf16 %v1968_v1, %v1968_v1  ;;  %v6060_v1 = vld [vmem:[#allocation165_spill] sm:$0xff] }
 0x52e   :  { %v3505_v47 = vpop.eup %3504 }
 0x52f   :  { %v4709_v15 = vmul.f32 %v3505_v47, %v1934_v17  ;;  %v6058_v17 = vld [vmem:[#allocation163_spill] sm:$0xff]  ;;  %v6059_v47 = vld [vmem:[#allocation164_spill] sm:$0xff] }
 0x531   :  { %6041 = vst [vmem:[#allocation113_spill] sm:$0xff] %v4709_v15  ;;  %v1970_v4 = vpack.c.bf16 %v4709_v15, %v4709_v15  ;;  %v6062_v15 = vld [vmem:[#allocation167_spill] sm:$0xff] }
 0x533   :  { %2003 = vmatprep.mubr.bf16.mxu0 %v1970_v4  ;;  %2044 = vmatprep.mubr.bf16.mxu1 %v1970_v4 }
 0x534   :  { %2004 = vmatmul.mubr.bf16.vlgmr.msra.gmra.mrb[24].mxu0 %v4713_v38  ;;  %2045 = vmatmul.mubr.bf16.vlgmr.msra.gmra.mrb[56].mxu1 %v4713_v38 }
 0x535   :  { %2054 = vmatpush1.bf16.msra.mxu0 %v4027_v7  ;;  %2095 = vmatpush1.bf16.msra.mxu1 %v5853_v23 }
 0x536   :  { %2085 = vmatprep.mubr.bf16.mxu0 %v1970_v4  ;;  %2126 = vmatprep.mubr.bf16.mxu1 %v1970_v4  ;;  %v6061_v4 = vld [vmem:[#allocation166_spill] sm:$0xff] }
 0x537   :  { %2055 = vmatprep.subr.bf16.mxu0 %v5854_v33  ;;  %2096 = vmatprep.subr.bf16.mxu1 %v5855_v54 }
 0x539   :  { %2056 = vmatpush1.bf16.msra.mxu0 %v5856_v14  ;;  %2097 = vmatpush1.bf16.msra.mxu1 %v5857_v39 }
 0x53a   :  { %2057 = vmatprep.subr.bf16.mxu0 %v5858_v57  ;;  %2098 = vmatprep.subr.bf16.mxu1 %v5946_v19 }
 0x53d   :  { %2058 = vmatpush1.bf16.msra.mxu0 %v5947_v8  ;;  %2099 = vmatpush1.bf16.msra.mxu1 %v5948_v20 }
 0x53e   :  { %2059 = vmatprep.subr.bf16.mxu0 %v5949_v3  ;;  %2100 = vmatprep.subr.bf16.mxu1 %v5950_v0 }
 0x541   :  { %2060 = vmatpush1.bf16.msra.mxu0 %v5951_v59  ;;  %2101 = vmatpush1.bf16.msra.mxu1 %v5952_v12 }
 0x542   :  { %2061 = vmatprep.subr.bf16.mxu0 %v5953_v24  ;;  %2102 = vmatprep.subr.bf16.mxu1 %v5954_v16 }
 0x545   :  { %2062 = vmatpush1.bf16.msra.mxu0 %v6042_v2  ;;  %2103 = vmatpush1.bf16.msra.mxu1 %v6043_v22 }
 0x546   :  { %2063 = vmatprep.subr.bf16.mxu0 %v6044_v37  ;;  %2104 = vmatprep.subr.bf16.mxu1 %v6045_v13 }
 0x549   :  { %2064 = vmatpush1.bf16.msra.mxu0 %v6046_v49  ;;  %2105 = vmatpush1.bf16.msra.mxu1 %v6047_v61 }
 0x54a   :  { %2065 = vmatprep.subr.bf16.mxu0 %v6048_v21  ;;  %2106 = vmatprep.subr.bf16.mxu1 %v6049_v5 }
 0x54d   :  { %2066 = vmatpush1.bf16.msra.mxu0 %v6050_v50  ;;  %2107 = vmatpush1.bf16.msra.mxu1 %v6051_v40 }
 0x54e   :  { %2067 = vmatprep.subr.bf16.mxu0 %v5965_v56  ;;  %2108 = vmatprep.subr.bf16.mxu1 %v5966_v25 }
 0x551   :  { %2068 = vmatpush1.bf16.msra.mxu0 %v5967_v60  ;;  %2109 = vmatpush1.bf16.msra.mxu1 %v6052_v51 }
 0x552   :  { %2069 = vmatprep.subr.bf16.mxu0 %v6053_v30  ;;  %2110 = vmatprep.subr.bf16.mxu1 %v5970_v58 }
 0x555   :  { %2070 = vmatpush1.bf16.msra.mxu0 %v5971_v27  ;;  %2111 = vmatpush1.bf16.msra.mxu1 %v5972_v28 }
 0x556   :  { %2071 = vmatprep.subr.bf16.mxu0 %v5973_v10  ;;  %2112 = vmatprep.subr.bf16.mxu1 %v5974_v52 }
 0x559   :  { %2072 = vmatpush1.bf16.msra.mxu0 %v5975_v41  ;;  %2113 = vmatpush1.bf16.msra.mxu1 %v5889_v32 }
 0x55a   :  { %2073 = vmatprep.subr.bf16.mxu0 %v5890_v63  ;;  %2114 = vmatprep.subr.bf16.mxu1 %v5891_v53 }
 0x55d   :  { %2074 = vmatpush1.bf16.msra.mxu0 %v5976_v26  ;;  %2115 = vmatpush1.bf16.msra.mxu1 %v5977_v18 }
 0x55e   :  { %2075 = vmatprep.subr.bf16.mxu0 %v5894_v29  ;;  %2116 = vmatprep.subr.bf16.mxu1 %v5895_v62  ;;  %v6136_v62 = vld [vmem:[#allocation92_spill] sm:$0xff]  ;;  %v6137_v29 = vld [vmem:[#allocation106_spill] sm:$0xff] }
 0x561   :  { %2076 = vmatpush1.bf16.msra.mxu0 %v5896_v46  ;;  %2117 = vmatpush1.bf16.msra.mxu1 %v5897_v9  ;;  %v6135_v9 = vld [vmem:[#allocation105_spill] sm:$0xff] }
 0x562   :  { %2077 = vmatprep.subr.bf16.mxu0 %v5898_v45  ;;  %2118 = vmatprep.subr.bf16.mxu1 %v5899_v35  ;;  %v6063_v45 = vld [vmem:[#allocation168_spill] sm:$0xff]  ;;  %v6064_v35 = vld [vmem:[#allocation169_spill] sm:$0xff] }
 0x565   :  { %2078 = vmatpush1.bf16.msra.mxu0 %v6054_v44  ;;  %2119 = vmatpush1.bf16.msra.mxu1 %v6055_v55  ;;  %v6065_v44 = vld [vmem:[#allocation170_spill] sm:$0xff]  ;;  %v6066_v55 = vld [vmem:[#allocation171_spill] sm:$0xff] }
 0x566   :  { %2079 = vmatprep.subr.bf16.mxu0 %v6056_v42  ;;  %2120 = vmatprep.subr.bf16.mxu1 %v6057_v31  ;;  %v6067_v42 = vld [vmem:[#allocation172_spill] sm:$0xff]  ;;  %v6068_v31 = vld [vmem:[#allocation17_spill] sm:$0xff] }
 0x569   :  { %2080 = vmatpush1.bf16.msra.mxu0 %v6058_v17  ;;  %2121 = vmatpush1.bf16.msra.mxu1 %v6059_v47  ;;  %v6069_v17 = vld [vmem:[#allocation18_spill] sm:$0xff]  ;;  %v6134_v47 = vld [vmem:[#allocation91_spill] sm:$0xff] }
 0x56a   :  { %2081 = vmatprep.subr.bf16.mxu0 %v6060_v1  ;;  %2122 = vmatprep.subr.bf16.mxu1 %v6061_v4  ;;  %v6070_v4 = vld [vmem:[#allocation19_spill] sm:$0xff]  ;;  %v6079_v1 = vld [vmem:[#allocation28_spill] sm:$0xff] }
 0x56d   :  { %2082 = vmatpush1.bf16.msra.mxu0 %v6062_v15  ;;  %2123 = vmatpush1.bf16.msra.mxu1 %v6063_v45  ;;  %v6071_v15 = vld [vmem:[#allocation20_spill] sm:$0xff]  ;;  %v6072_v45 = vld [vmem:[#allocation21_spill] sm:$0xff] }
 0x56e   :  { %2083 = vmatprep.subr.bf16.mxu0 %v6064_v35  ;;  %2124 = vmatprep.subr.bf16.mxu1 %v6065_v44  ;;  %v6073_v35 = vld [vmem:[#allocation22_spill] sm:$0xff]  ;;  %v6074_v44 = vld [vmem:[#allocation23_spill] sm:$0xff] }
 0x571   :  { %2084 = vmatpush1.bf16.msra.mxu0 %v6066_v55  ;;  %2125 = vmatpush1.bf16.msra.mxu1 %v6067_v42  ;;  %v6075_v55 = vld [vmem:[#allocation24_spill] sm:$0xff]  ;;  %v6076_v42 = vld [vmem:[#allocation25_spill] sm:$0xff] }
 0x572   :  { %2188 = vmatprep.subr.bf16.mxu0 %v6068_v31  ;;  %2229 = vmatprep.subr.bf16.mxu1 %v6069_v17  ;;  %v6077_v31 = vld [vmem:[#allocation26_spill] sm:$0xff]  ;;  %v6078_v17 = vld [vmem:[#allocation27_spill] sm:$0xff] }
 0x574   :  { %2086 = vmatmul.mubr.bf16.vlgmr.msra.gmra.mrb[28].mxu0 %v4713_v38  ;;  %2127 = vmatmul.mubr.bf16.vlgmr.msra.gmra.mrb[60].mxu1 %v4713_v38  ;;  %v6080_v38 = vld [vmem:[#allocation29_spill] sm:$0xff] }
 0x575   :  { %2189 = vmatpush1.bf16.msra.mxu0 %v6070_v4  ;;  %2230 = vmatpush1.bf16.msra.mxu1 %v6071_v15  ;;  %v6081_v4 = vld [vmem:[#allocation30_spill] sm:$0xff]  ;;  %v6082_v15 = vld [vmem:[#allocation31_spill] sm:$0xff] }
 0x576   :  { %2190 = vmatprep.subr.bf16.mxu0 %v6072_v45  ;;  %2231 = vmatprep.subr.bf16.mxu1 %v6073_v35  ;;  %v6083_v45 = vld [vmem:[#allocation32_spill] sm:$0xff]  ;;  %v6084_v35 = vld [vmem:[#allocation33_spill] sm:$0xff] }
 0x579   :  { %2191 = vmatpush1.bf16.msra.mxu0 %v6074_v44  ;;  %2232 = vmatpush1.bf16.msra.mxu1 %v6075_v55  ;;  %v6085_v44 = vld [vmem:[#allocation34_spill] sm:$0xff]  ;;  %v6086_v55 = vld [vmem:[#allocation35_spill] sm:$0xff] }
 0x57a   :  { %2192 = vmatprep.subr.bf16.mxu0 %v6076_v42  ;;  %2233 = vmatprep.subr.bf16.mxu1 %v6077_v31  ;;  %v6087_v42 = vld [vmem:[#allocation36_spill] sm:$0xff]  ;;  %v6088_v31 = vld [vmem:[#allocation37_spill] sm:$0xff] }
 0x57d   :  { %2193 = vmatpush1.bf16.msra.mxu0 %v6078_v17  ;;  %2234 = vmatpush1.bf16.msra.mxu1 %v6079_v1  ;;  %v6089_v17 = vld [vmem:[#allocation38_spill] sm:$0xff]  ;;  %v6090_v1 = vld [vmem:[#allocation39_spill] sm:$0xff] }
 0x57e   :  { %2194 = vmatprep.subr.bf16.mxu0 %v6080_v38  ;;  %2235 = vmatprep.subr.bf16.mxu1 %v6081_v4  ;;  %v6091_v38 = vld [vmem:[#allocation40_spill] sm:$0xff]  ;;  %v6092_v4 = vld [vmem:[#allocation41_spill] sm:$0xff] }
 0x581   :  { %2195 = vmatpush1.bf16.msra.mxu0 %v6082_v15  ;;  %2236 = vmatpush1.bf16.msra.mxu1 %v6083_v45  ;;  %v6093_v15 = vld [vmem:[#allocation42_spill] sm:$0xff]  ;;  %v6094_v45 = vld [vmem:[#allocation43_spill] sm:$0xff] }
 0x582   :  { %2196 = vmatprep.subr.bf16.mxu0 %v6084_v35  ;;  %2237 = vmatprep.subr.bf16.mxu1 %v6085_v44  ;;  %v6095_v35 = vld [vmem:[#allocation44_spill] sm:$0xff]  ;;  %v6096_v44 = vld [vmem:[#allocation45_spill] sm:$0xff] }
 0x585   :  { %2197 = vmatpush1.bf16.msra.mxu0 %v6086_v55  ;;  %2238 = vmatpush1.bf16.msra.mxu1 %v6087_v42  ;;  %v6097_v55 = vld [vmem:[#allocation46_spill] sm:$0xff]  ;;  %v6098_v42 = vld [vmem:[#allocation47_spill] sm:$0xff] }
 0x586   :  { %2198 = vmatprep.subr.bf16.mxu0 %v6088_v31  ;;  %2239 = vmatprep.subr.bf16.mxu1 %v6089_v17  ;;  %v6099_v31 = vld [vmem:[#allocation48_spill] sm:$0xff]  ;;  %v6100_v17 = vld [vmem:[#allocation49_spill] sm:$0xff] }
 0x589   :  { %2199 = vmatpush1.bf16.msra.mxu0 %v6090_v1  ;;  %2240 = vmatpush1.bf16.msra.mxu1 %v6091_v38  ;;  %v6101_v1 = vld [vmem:[#allocation50_spill] sm:$0xff]  ;;  %v6102_v38 = vld [vmem:[#allocation51_spill] sm:$0xff] }
 0x58a   :  { %2200 = vmatprep.subr.bf16.mxu0 %v6092_v4  ;;  %2241 = vmatprep.subr.bf16.mxu1 %v6093_v15  ;;  %v6103_v4 = vld [vmem:[#allocation52_spill] sm:$0xff]  ;;  %v6104_v15 = vld [vmem:[#allocation53_spill] sm:$0xff] }
 0x58d   :  { %2201 = vmatpush1.bf16.msra.mxu0 %v6094_v45  ;;  %2242 = vmatpush1.bf16.msra.mxu1 %v6095_v35  ;;  %v6105_v45 = vld [vmem:[#allocation54_spill] sm:$0xff]  ;;  %v6106_v35 = vld [vmem:[#allocation55_spill] sm:$0xff] }
 0x58e   :  { %2202 = vmatprep.subr.bf16.mxu0 %v6096_v44  ;;  %2243 = vmatprep.subr.bf16.mxu1 %v6097_v55  ;;  %v6107_v44 = vld [vmem:[#allocation56_spill] sm:$0xff]  ;;  %v6108_v55 = vld [vmem:[#allocation57_spill] sm:$0xff] }
 0x591   :  { %2203 = vmatpush1.bf16.msra.mxu0 %v6098_v42  ;;  %2244 = vmatpush1.bf16.msra.mxu1 %v6099_v31  ;;  %v6109_v42 = vld [vmem:[#allocation58_spill] sm:$0xff]  ;;  %v6110_v31 = vld [vmem:[#allocation59_spill] sm:$0xff] }
 0x592   :  { %2204 = vmatprep.subr.bf16.mxu0 %v6100_v17  ;;  %2245 = vmatprep.subr.bf16.mxu1 %v6101_v1  ;;  %v6111_v17 = vld [vmem:[#allocation60_spill] sm:$0xff]  ;;  %v6112_v1 = vld [vmem:[#allocation61_spill] sm:$0xff] }
 0x595   :  { %2205 = vmatpush1.bf16.msra.mxu0 %v6102_v38  ;;  %2246 = vmatpush1.bf16.msra.mxu1 %v6103_v4  ;;  %v6113_v38 = vld [vmem:[#allocation62_spill] sm:$0xff]  ;;  %v6114_v4 = vld [vmem:[#allocation63_spill] sm:$0xff] }
 0x596   :  { %2206 = vmatprep.subr.bf16.mxu0 %v6104_v15  ;;  %2247 = vmatprep.subr.bf16.mxu1 %v6105_v45  ;;  %v6115_v15 = vld [vmem:[#allocation64_spill] sm:$0xff]  ;;  %v6116_v45 = vld [vmem:[#allocation65_spill] sm:$0xff] }
 0x599   :  { %2207 = vmatpush1.bf16.msra.mxu0 %v6106_v35  ;;  %2248 = vmatpush1.bf16.msra.mxu1 %v6107_v44  ;;  %v6117_v35 = vld [vmem:[#allocation66_spill] sm:$0xff]  ;;  %v6118_v44 = vld [vmem:[#allocation67_spill] sm:$0xff] }
 0x59a   :  { %2208 = vmatprep.subr.bf16.mxu0 %v6108_v55  ;;  %2249 = vmatprep.subr.bf16.mxu1 %v6109_v42  ;;  %v6119_v55 = vld [vmem:[#allocation68_spill] sm:$0xff]  ;;  %v6120_v42 = vld [vmem:[#allocation69_spill] sm:$0xff] }
 0x59d   :  { %2209 = vmatpush1.bf16.msra.mxu0 %v6110_v31  ;;  %2250 = vmatpush1.bf16.msra.mxu1 %v6111_v17  ;;  %v6121_v31 = vld [vmem:[#allocation70_spill] sm:$0xff]  ;;  %v6122_v17 = vld [vmem:[#allocation71_spill] sm:$0xff] }
 0x59e   :  { %2210 = vmatprep.subr.bf16.mxu0 %v6112_v1  ;;  %2251 = vmatprep.subr.bf16.mxu1 %v6113_v38  ;;  %v6123_v1 = vld [vmem:[#allocation72_spill] sm:$0xff]  ;;  %v6124_v38 = vld [vmem:[#allocation73_spill] sm:$0xff] }
 0x5a1   :  { %2211 = vmatpush1.bf16.msra.mxu0 %v6114_v4  ;;  %2252 = vmatpush1.bf16.msra.mxu1 %v6115_v15  ;;  %v6125_v4 = vld [vmem:[#allocation74_spill] sm:$0xff]  ;;  %v6126_v15 = vld [vmem:[#allocation75_spill] sm:$0xff] }
 0x5a2   :  { %2212 = vmatprep.subr.bf16.mxu0 %v6116_v45  ;;  %2253 = vmatprep.subr.bf16.mxu1 %v6117_v35  ;;  %v6127_v45 = vld [vmem:[#allocation76_spill] sm:$0xff]  ;;  %v6128_v35 = vld [vmem:[#allocation77_spill] sm:$0xff] }
 0x5a5   :  { %2213 = vmatpush1.bf16.msra.mxu0 %v6118_v44  ;;  %2254 = vmatpush1.bf16.msra.mxu1 %v6119_v55  ;;  %v6129_v44 = vld [vmem:[#allocation78_spill] sm:$0xff]  ;;  %v6130_v55 = vld [vmem:[#allocation79_spill] sm:$0xff] }
 0x5a6   :  { %2214 = vmatprep.subr.bf16.mxu0 %v6120_v42  ;;  %2255 = vmatprep.subr.bf16.mxu1 %v6121_v31  ;;  %v6131_v42 = vld [vmem:[#allocation80_spill] sm:$0xff]  ;;  %v6132_v31 = vld [vmem:[#allocation81_spill] sm:$0xff] }
 0x5a9   :  { %2215 = vmatpush1.bf16.msra.mxu0 %v6122_v17  ;;  %2256 = vmatpush1.bf16.msra.mxu1 %v6123_v1  ;;  %v6133_v17 = vld [vmem:[#allocation82_spill] sm:$0xff] }
 0x5aa   :  { %2216 = vmatprep.subr.bf16.mxu0 %v6124_v38  ;;  %2257 = vmatprep.subr.bf16.mxu1 %v6125_v4 }
 0x5ad   :  { %2217 = vmatpush1.bf16.msra.mxu0 %v6126_v15  ;;  %2258 = vmatpush1.bf16.msra.mxu1 %v6127_v45 }
 0x5ae   :  { %2218 = vmatprep.subr.bf16.mxu0 %v6128_v35  ;;  %2259 = vmatprep.subr.bf16.mxu1 %v6129_v44 }
 0x5b1   :  { %2219 = vmatpush1.bf16.msra.mxu0 %v6130_v55  ;;  %2260 = vmatpush1.bf16.msra.mxu1 %v6131_v42 }
 0x5b2   :  { %2270 = vmatprep.subr.bf16.mxu0 %v6132_v31  ;;  %2311 = vmatprep.subr.bf16.mxu1 %v6133_v17 }
 0x607   :  { %v2005_v1 = vpop.f32.mrb[24].mxu0  ;;  %v2046_v38 = vpop.f32.mrb[56].mxu1 }
 0x608   :  { %v2164_v4 = vadd.f32 %v2005_v1, %v6134_v47  ;;  %v2166_v15 = vadd.f32 %v2046_v38, %v6135_v9  ;;  %v2007_v46 = vpop.f32.mrb[25].mxu0  ;;  %v2048_v45 = vpop.f32.mrb[57].mxu1 }
 0x609   :  { %v2165_v35 = vadd.f32 %v2007_v46, %v6136_v62  ;;  %v2167_v44 = vadd.f32 %v2048_v45, %v6137_v29  ;;  %v2009_v18 = vpop.f32.mrb[26].mxu0  ;;  %v2050_v55 = vpop.f32.mrb[58].mxu1 }
 0x60a   :  { %v2168_v26 = vmul.f32 0.5, %v2164_v4  ;;  %v2010_v42 = vpop.f32.mrb[27].mxu0  ;;  %v2051_v53 = vpop.f32.mrb[59].mxu1 }
 0x60b   :  { %v2172_v31 = vmul.f32 0.5, %v2165_v35 }
 0x60c   :  { %3506 = vtanh.f32 %v2168_v26 }
 0x60d   :  { %3508 = vtanh.f32 %v2172_v31 }
 0x60e   :  { %3510 = vtanh.f32 %v2166_v15 }
 0x616   :  { %v3507_v17 = vpop.eup %3506 }
 0x617   :  { %v3509_v63 = vpop.eup %3508  ;;  %v2170_v47 = vmul.f32 0.5, %v3507_v17 }
 0x618   :  { %v2174_v1 = vmul.f32 0.5, %v3509_v63  ;;  %v3511_v38 = vpop.eup %3510 }
 0x619   :  { %v2171_v9 = vadd.f32 0.5, %v2170_v47 }
 0x61a   :  { %v2175_v32 = vadd.f32 0.5, %v2174_v1 }
 0x61b   :  { %v2182_v41 = vmul.f32 %v3511_v38, %v2171_v9 }
 0x61c   :  { %v2181_v62 = vmul.f32 %v2175_v32, %v4698_v48 }
 0x61e   :  { %v4852_v29 = vadd.f32 %v2182_v41, %v2181_v62  ;;  %v2177_v41 = vmul.f32 0.5, %v2167_v44 }
 0x647   :  { %v2087_v46 = vpop.f32.mrb[28].mxu0  ;;  %v2128_v45 = vpop.f32.mrb[60].mxu1 }
 0x648   :  { %v2135_v53 = vadd.f32 %v2087_v46, %v5944_v11  ;;  %v2089_v35 = vpop.f32.mrb[29].mxu0  ;;  %v2130_v26 = vpop.f32.mrb[61].mxu1  ;;  %v2137_v4 = vadd.f32 %v2128_v45, %v4388_v34 }
 0x649   :  { %v2136_v18 = vadd.f32 %v2089_v35, %v4383_v6  ;;  %v2091_v15 = vpop.f32.mrb[30].mxu0  ;;  %v2132_v55 = vpop.f32.mrb[62].mxu1  ;;  %v2138_v32 = vadd.f32 %v2130_v26, %v4394_v36 }
 0x64a   :  { %v2139_v42 = vmul.f32 0.5, %v2135_v53  ;;  %v2092_v63 = vpop.f32.mrb[31].mxu0  ;;  %v2133_v31 = vpop.f32.mrb[63].mxu1 }
 0x64b   :  { %v2143_v17 = vmul.f32 0.5, %v2136_v18  ;;  %v2148_v48 = vmul.f32 0.5, %v2138_v32 }
 0x64c   :  { %3512 = vtanh.f32 %v2139_v42 }
 0x64d   :  { %3514 = vtanh.f32 %v2143_v17 }
 0x64e   :  { %3516 = vtanh.f32 %v2137_v4 }
 0x64f   :  { %3518 = vtanh.f32 %v2177_v41 }
 0x650   :  { %3520 = vtanh.f32 %v2148_v48  ;;  %v6139_v48 = vld [vmem:[#allocation147_spill] sm:$0xff] }
 0x651   :  { %3522 = vtanh.f32 %v4852_v29 }
 0x656   :  { %v3513_v47 = vpop.eup %3512 }
 0x657   :  { %v3515_v1 = vpop.eup %3514  ;;  %v2141_v9 = vmul.f32 0.5, %v3513_v47  ;;  %v6140_v47 = vld [vmem:[#allocation148_spill] sm:$0xff] }
 0x658   :  { %v2145_v38 = vmul.f32 0.5, %v3515_v1  ;;  %v3517_v46 = vpop.eup %3516  ;;  %v6141_v1 = vld [vmem:[#allocation149_spill] sm:$0xff] }
 0x659   :  { %v2142_v62 = vadd.f32 0.5, %v2141_v9  ;;  %v3519_v44 = vpop.eup %3518  ;;  %v6142_v9 = vld [vmem:[#allocation150_spill] sm:$0xff] }
 0x65a   :  { %v2146_v53 = vadd.f32 0.5, %v2145_v38  ;;  %v3521_v26 = vpop.eup %3520  ;;  %v2179_v15 = vmul.f32 0.5, %v3519_v44  ;;  %v6143_v38 = vld [vmem:[#allocation151_spill] sm:$0xff]  ;;  %v6149_v44 = vld [vmem:[#allocation157_spill] sm:$0xff] }
 0x65b   :  { %v2153_v35 = vmul.f32 %v3517_v46, %v2142_v62  ;;  %v2150_v55 = vmul.f32 0.5, %v3521_v26  ;;  %v3523_v42 = vpop.eup %3522  ;;  %v6144_v62 = vld [vmem:[#allocation152_spill] sm:$0xff]  ;;  %v6145_v46 = vld [vmem:[#allocation153_spill] sm:$0xff]  ;;  %v6150_v26 = vld [vmem:[#allocation158_spill] sm:$0xff] }
 0x65c   :  { %v2152_v18 = vmul.f32 %v2146_v53, %v4706_v43  ;;  %v2180_v63 = vadd.f32 0.5, %v2179_v15  ;;  %v6146_v53 = vld [vmem:[#allocation154_spill] sm:$0xff]  ;;  %v6151_v15 = vld [vmem:[#allocation159_spill] sm:$0xff] }
 0x65d   :  { %v2151_v31 = vadd.f32 0.5, %v2150_v55  ;;  %v6152_v55 = vld [vmem:[#allocation160_spill] sm:$0xff] }
 0x65e   :  { %v4860_v45 = vadd.f32 %v2153_v35, %v2152_v18  ;;  %v2185_v4 = vmul.f32 %v3523_v42, %v2180_v63  ;;  %v6147_v35 = vld [vmem:[#allocation155_spill] sm:$0xff]  ;;  %v6148_v18 = vld [vmem:[#allocation156_spill] sm:$0xff]  ;;  %v6153_v42 = vld [vmem:[#allocation161_spill] sm:$0xff] }
 0x65f   :  { %v6154_v63 = vld [vmem:[#allocation162_spill] sm:$0xff] }
 0x660   :  { %3524 = vtanh.f32 %v4860_v45  ;;  %v4867_v41 = vpack.c.bf16 %v2185_v4, %v2185_v4  ;;  %v6157_v4 = vld [vmem:[#allocation165_spill] sm:$0xff] }
 0x66a   :  { %v3525_v17 = vpop.eup %3524 }
 0x66b   :  { %v4863_v32 = vmul.f32 %v3525_v17, %v2151_v31  ;;  %v6155_v31 = vld [vmem:[#allocation163_spill] sm:$0xff]  ;;  %v6156_v17 = vld [vmem:[#allocation164_spill] sm:$0xff] }
 0x66d   :  { %6138 = vst [vmem:[#allocation114_spill] sm:$0xff] %v4863_v32  ;;  %v2187_v43 = vpack.c.bf16 %v4863_v32, %v4863_v32  ;;  %v6159_v32 = vld [vmem:[#allocation167_spill] sm:$0xff] }
 0x66f   :  { %2220 = vmatprep.mubr.bf16.mxu0 %v2187_v43  ;;  %2261 = vmatprep.mubr.bf16.mxu1 %v2187_v43 }
 0x670   :  { %2221 = vmatmul.mubr.bf16.vlgmr.msra.gmra.mrb[32].mxu0 %v4867_v41  ;;  %2262 = vmatmul.mubr.bf16.vlgmr.msra.gmra.mrb[64].mxu1 %v4867_v41 }
 0x671   :  { %2271 = vmatpush1.bf16.msra.mxu0 %v4027_v7  ;;  %2312 = vmatpush1.bf16.msra.mxu1 %v5853_v23 }
 0x672   :  { %2302 = vmatprep.mubr.bf16.mxu0 %v2187_v43  ;;  %2343 = vmatprep.mubr.bf16.mxu1 %v2187_v43  ;;  %v6158_v43 = vld [vmem:[#allocation166_spill] sm:$0xff] }
 0x673   :  { %2272 = vmatprep.subr.bf16.mxu0 %v5854_v33  ;;  %2313 = vmatprep.subr.bf16.mxu1 %v5855_v54 }
 0x675   :  { %2273 = vmatpush1.bf16.msra.mxu0 %v5856_v14  ;;  %2314 = vmatpush1.bf16.msra.mxu1 %v5857_v39 }
 0x676   :  { %2274 = vmatprep.subr.bf16.mxu0 %v5858_v57  ;;  %2315 = vmatprep.subr.bf16.mxu1 %v5946_v19 }
 0x679   :  { %2275 = vmatpush1.bf16.msra.mxu0 %v5947_v8  ;;  %2316 = vmatpush1.bf16.msra.mxu1 %v5948_v20 }
 0x67a   :  { %2276 = vmatprep.subr.bf16.mxu0 %v5949_v3  ;;  %2317 = vmatprep.subr.bf16.mxu1 %v5950_v0 }
 0x67d   :  { %2277 = vmatpush1.bf16.msra.mxu0 %v5951_v59  ;;  %2318 = vmatpush1.bf16.msra.mxu1 %v5952_v12 }
 0x67e   :  { %2278 = vmatprep.subr.bf16.mxu0 %v5953_v24  ;;  %2319 = vmatprep.subr.bf16.mxu1 %v5954_v16 }
 0x681   :  { %2279 = vmatpush1.bf16.msra.mxu0 %v6042_v2  ;;  %2320 = vmatpush1.bf16.msra.mxu1 %v6043_v22 }
 0x682   :  { %2280 = vmatprep.subr.bf16.mxu0 %v6044_v37  ;;  %2321 = vmatprep.subr.bf16.mxu1 %v6045_v13 }
 0x685   :  { %2281 = vmatpush1.bf16.msra.mxu0 %v6046_v49  ;;  %2322 = vmatpush1.bf16.msra.mxu1 %v6047_v61 }
 0x686   :  { %2282 = vmatprep.subr.bf16.mxu0 %v6048_v21  ;;  %2323 = vmatprep.subr.bf16.mxu1 %v6049_v5 }
 0x689   :  { %2283 = vmatpush1.bf16.msra.mxu0 %v6050_v50  ;;  %2324 = vmatpush1.bf16.msra.mxu1 %v6051_v40 }
 0x68a   :  { %2284 = vmatprep.subr.bf16.mxu0 %v5965_v56  ;;  %2325 = vmatprep.subr.bf16.mxu1 %v5966_v25 }
 0x68d   :  { %2285 = vmatpush1.bf16.msra.mxu0 %v5967_v60  ;;  %2326 = vmatpush1.bf16.msra.mxu1 %v6052_v51 }
 0x68e   :  { %2286 = vmatprep.subr.bf16.mxu0 %v6053_v30  ;;  %2327 = vmatprep.subr.bf16.mxu1 %v5970_v58 }
 0x691   :  { %2287 = vmatpush1.bf16.msra.mxu0 %v5971_v27  ;;  %2328 = vmatpush1.bf16.msra.mxu1 %v5972_v28 }
 0x692   :  { %2288 = vmatprep.subr.bf16.mxu0 %v5973_v10  ;;  %2329 = vmatprep.subr.bf16.mxu1 %v5974_v52 }
 0x695   :  { %2289 = vmatpush1.bf16.msra.mxu0 %v6139_v48  ;;  %2330 = vmatpush1.bf16.msra.mxu1 %v6140_v47 }
 0x696   :  { %2290 = vmatprep.subr.bf16.mxu0 %v6141_v1  ;;  %2331 = vmatprep.subr.bf16.mxu1 %v6142_v9 }
 0x699   :  { %2291 = vmatpush1.bf16.msra.mxu0 %v6143_v38  ;;  %2332 = vmatpush1.bf16.msra.mxu1 %v6144_v62 }
 0x69a   :  { %2292 = vmatprep.subr.bf16.mxu0 %v6145_v46  ;;  %2333 = vmatprep.subr.bf16.mxu1 %v6146_v53  ;;  %v6233_v53 = vld [vmem:[#allocation94_spill] sm:$0xff]  ;;  %v6234_v46 = vld [vmem:[#allocation108_spill] sm:$0xff] }
 0x69d   :  { %2293 = vmatpush1.bf16.msra.mxu0 %v6147_v35  ;;  %2334 = vmatpush1.bf16.msra.mxu1 %v6148_v18  ;;  %v6232_v18 = vld [vmem:[#allocation107_spill] sm:$0xff] }
 0x69e   :  { %2294 = vmatprep.subr.bf16.mxu0 %v6149_v44  ;;  %2335 = vmatprep.subr.bf16.mxu1 %v6150_v26  ;;  %v6160_v44 = vld [vmem:[#allocation168_spill] sm:$0xff]  ;;  %v6161_v26 = vld [vmem:[#allocation169_spill] sm:$0xff] }
 0x6a1   :  { %2295 = vmatpush1.bf16.msra.mxu0 %v6151_v15  ;;  %2336 = vmatpush1.bf16.msra.mxu1 %v6152_v55  ;;  %v6162_v15 = vld [vmem:[#allocation170_spill] sm:$0xff]  ;;  %v6163_v55 = vld [vmem:[#allocation171_spill] sm:$0xff] }
 0x6a2   :  { %2296 = vmatprep.subr.bf16.mxu0 %v6153_v42  ;;  %2337 = vmatprep.subr.bf16.mxu1 %v6154_v63  ;;  %v6164_v42 = vld [vmem:[#allocation172_spill] sm:$0xff]  ;;  %v6165_v63 = vld [vmem:[#allocation17_spill] sm:$0xff] }
 0x6a5   :  { %2297 = vmatpush1.bf16.msra.mxu0 %v6155_v31  ;;  %2338 = vmatpush1.bf16.msra.mxu1 %v6156_v17  ;;  %v6166_v31 = vld [vmem:[#allocation18_spill] sm:$0xff]  ;;  %v6231_v17 = vld [vmem:[#allocation93_spill] sm:$0xff] }
 0x6a6   :  { %2298 = vmatprep.subr.bf16.mxu0 %v6157_v4  ;;  %2339 = vmatprep.subr.bf16.mxu1 %v6158_v43  ;;  %v6167_v43 = vld [vmem:[#allocation19_spill] sm:$0xff]  ;;  %v6176_v4 = vld [vmem:[#allocation28_spill] sm:$0xff] }
 0x6a9   :  { %2299 = vmatpush1.bf16.msra.mxu0 %v6159_v32  ;;  %2340 = vmatpush1.bf16.msra.mxu1 %v6160_v44  ;;  %v6168_v32 = vld [vmem:[#allocation20_spill] sm:$0xff]  ;;  %v6169_v44 = vld [vmem:[#allocation21_spill] sm:$0xff] }
 0x6aa   :  { %2300 = vmatprep.subr.bf16.mxu0 %v6161_v26  ;;  %2341 = vmatprep.subr.bf16.mxu1 %v6162_v15  ;;  %v6170_v26 = vld [vmem:[#allocation22_spill] sm:$0xff]  ;;  %v6171_v15 = vld [vmem:[#allocation23_spill] sm:$0xff] }
 0x6ad   :  { %2301 = vmatpush1.bf16.msra.mxu0 %v6163_v55  ;;  %2342 = vmatpush1.bf16.msra.mxu1 %v6164_v42  ;;  %v6172_v55 = vld [vmem:[#allocation24_spill] sm:$0xff]  ;;  %v6173_v42 = vld [vmem:[#allocation25_spill] sm:$0xff] }
 0x6ae   :  { %2405 = vmatprep.subr.bf16.mxu0 %v6165_v63  ;;  %2446 = vmatprep.subr.bf16.mxu1 %v6166_v31  ;;  %v6174_v63 = vld [vmem:[#allocation26_spill] sm:$0xff]  ;;  %v6175_v31 = vld [vmem:[#allocation27_spill] sm:$0xff] }
 0x6b0   :  { %2303 = vmatmul.mubr.bf16.vlgmr.msra.gmra.mrb[36].mxu0 %v4867_v41  ;;  %2344 = vmatmul.mubr.bf16.vlgmr.msra.gmra.mrb[68].mxu1 %v4867_v41  ;;  %v6177_v41 = vld [vmem:[#allocation29_spill] sm:$0xff] }
 0x6b1   :  { %2406 = vmatpush1.bf16.msra.mxu0 %v6167_v43  ;;  %2447 = vmatpush1.bf16.msra.mxu1 %v6168_v32  ;;  %v6178_v43 = vld [vmem:[#allocation30_spill] sm:$0xff]  ;;  %v6179_v32 = vld [vmem:[#allocation31_spill] sm:$0xff] }
 0x6b2   :  { %2407 = vmatprep.subr.bf16.mxu0 %v6169_v44  ;;  %2448 = vmatprep.subr.bf16.mxu1 %v6170_v26  ;;  %v6180_v44 = vld [vmem:[#allocation32_spill] sm:$0xff]  ;;  %v6181_v26 = vld [vmem:[#allocation33_spill] sm:$0xff] }
 0x6b5   :  { %2408 = vmatpush1.bf16.msra.mxu0 %v6171_v15  ;;  %2449 = vmatpush1.bf16.msra.mxu1 %v6172_v55  ;;  %v6182_v15 = vld [vmem:[#allocation34_spill] sm:$0xff]  ;;  %v6183_v55 = vld [vmem:[#allocation35_spill] sm:$0xff] }
 0x6b6   :  { %2409 = vmatprep.subr.bf16.mxu0 %v6173_v42  ;;  %2450 = vmatprep.subr.bf16.mxu1 %v6174_v63  ;;  %v6184_v42 = vld [vmem:[#allocation36_spill] sm:$0xff]  ;;  %v6185_v63 = vld [vmem:[#allocation37_spill] sm:$0xff] }
 0x6b9   :  { %2410 = vmatpush1.bf16.msra.mxu0 %v6175_v31  ;;  %2451 = vmatpush1.bf16.msra.mxu1 %v6176_v4  ;;  %v6186_v31 = vld [vmem:[#allocation38_spill] sm:$0xff]  ;;  %v6187_v4 = vld [vmem:[#allocation39_spill] sm:$0xff] }
 0x6ba   :  { %2411 = vmatprep.subr.bf16.mxu0 %v6177_v41  ;;  %2452 = vmatprep.subr.bf16.mxu1 %v6178_v43  ;;  %v6188_v41 = vld [vmem:[#allocation40_spill] sm:$0xff]  ;;  %v6189_v43 = vld [vmem:[#allocation41_spill] sm:$0xff] }
 0x6bd   :  { %2412 = vmatpush1.bf16.msra.mxu0 %v6179_v32  ;;  %2453 = vmatpush1.bf16.msra.mxu1 %v6180_v44  ;;  %v6190_v32 = vld [vmem:[#allocation42_spill] sm:$0xff]  ;;  %v6191_v44 = vld [vmem:[#allocation43_spill] sm:$0xff] }
 0x6be   :  { %2413 = vmatprep.subr.bf16.mxu0 %v6181_v26  ;;  %2454 = vmatprep.subr.bf16.mxu1 %v6182_v15  ;;  %v6192_v26 = vld [vmem:[#allocation44_spill] sm:$0xff]  ;;  %v6193_v15 = vld [vmem:[#allocation45_spill] sm:$0xff] }
 0x6c1   :  { %2414 = vmatpush1.bf16.msra.mxu0 %v6183_v55  ;;  %2455 = vmatpush1.bf16.msra.mxu1 %v6184_v42  ;;  %v6194_v55 = vld [vmem:[#allocation46_spill] sm:$0xff]  ;;  %v6195_v42 = vld [vmem:[#allocation47_spill] sm:$0xff] }
 0x6c2   :  { %2415 = vmatprep.subr.bf16.mxu0 %v6185_v63  ;;  %2456 = vmatprep.subr.bf16.mxu1 %v6186_v31  ;;  %v6196_v63 = vld [vmem:[#allocation48_spill] sm:$0xff]  ;;  %v6197_v31 = vld [vmem:[#allocation49_spill] sm:$0xff] }
 0x6c5   :  { %2416 = vmatpush1.bf16.msra.mxu0 %v6187_v4  ;;  %2457 = vmatpush1.bf16.msra.mxu1 %v6188_v41  ;;  %v6198_v4 = vld [vmem:[#allocation50_spill] sm:$0xff]  ;;  %v6199_v41 = vld [vmem:[#allocation51_spill] sm:$0xff] }
 0x6c6   :  { %2417 = vmatprep.subr.bf16.mxu0 %v6189_v43  ;;  %2458 = vmatprep.subr.bf16.mxu1 %v6190_v32  ;;  %v6200_v43 = vld [vmem:[#allocation52_spill] sm:$0xff]  ;;  %v6201_v32 = vld [vmem:[#allocation53_spill] sm:$0xff] }
 0x6c9   :  { %2418 = vmatpush1.bf16.msra.mxu0 %v6191_v44  ;;  %2459 = vmatpush1.bf16.msra.mxu1 %v6192_v26  ;;  %v6202_v44 = vld [vmem:[#allocation54_spill] sm:$0xff]  ;;  %v6203_v26 = vld [vmem:[#allocation55_spill] sm:$0xff] }
 0x6ca   :  { %2419 = vmatprep.subr.bf16.mxu0 %v6193_v15  ;;  %2460 = vmatprep.subr.bf16.mxu1 %v6194_v55  ;;  %v6204_v15 = vld [vmem:[#allocation56_spill] sm:$0xff]  ;;  %v6205_v55 = vld [vmem:[#allocation57_spill] sm:$0xff] }
 0x6cd   :  { %2420 = vmatpush1.bf16.msra.mxu0 %v6195_v42  ;;  %2461 = vmatpush1.bf16.msra.mxu1 %v6196_v63  ;;  %v6206_v42 = vld [vmem:[#allocation58_spill] sm:$0xff]  ;;  %v6207_v63 = vld [vmem:[#allocation59_spill] sm:$0xff] }
 0x6ce   :  { %2421 = vmatprep.subr.bf16.mxu0 %v6197_v31  ;;  %2462 = vmatprep.subr.bf16.mxu1 %v6198_v4  ;;  %v6208_v31 = vld [vmem:[#allocation60_spill] sm:$0xff]  ;;  %v6209_v4 = vld [vmem:[#allocation61_spill] sm:$0xff] }
 0x6d1   :  { %2422 = vmatpush1.bf16.msra.mxu0 %v6199_v41  ;;  %2463 = vmatpush1.bf16.msra.mxu1 %v6200_v43  ;;  %v6210_v41 = vld [vmem:[#allocation62_spill] sm:$0xff]  ;;  %v6211_v43 = vld [vmem:[#allocation63_spill] sm:$0xff] }
 0x6d2   :  { %2423 = vmatprep.subr.bf16.mxu0 %v6201_v32  ;;  %2464 = vmatprep.subr.bf16.mxu1 %v6202_v44  ;;  %v6212_v32 = vld [vmem:[#allocation64_spill] sm:$0xff]  ;;  %v6213_v44 = vld [vmem:[#allocation65_spill] sm:$0xff] }
 0x6d5   :  { %2424 = vmatpush1.bf16.msra.mxu0 %v6203_v26  ;;  %2465 = vmatpush1.bf16.msra.mxu1 %v6204_v15  ;;  %v6214_v26 = vld [vmem:[#allocation66_spill] sm:$0xff]  ;;  %v6215_v15 = vld [vmem:[#allocation67_spill] sm:$0xff] }
 0x6d6   :  { %2425 = vmatprep.subr.bf16.mxu0 %v6205_v55  ;;  %2466 = vmatprep.subr.bf16.mxu1 %v6206_v42  ;;  %v6216_v55 = vld [vmem:[#allocation68_spill] sm:$0xff]  ;;  %v6217_v42 = vld [vmem:[#allocation69_spill] sm:$0xff] }
 0x6d9   :  { %2426 = vmatpush1.bf16.msra.mxu0 %v6207_v63  ;;  %2467 = vmatpush1.bf16.msra.mxu1 %v6208_v31  ;;  %v6218_v63 = vld [vmem:[#allocation70_spill] sm:$0xff]  ;;  %v6219_v31 = vld [vmem:[#allocation71_spill] sm:$0xff] }
 0x6da   :  { %2427 = vmatprep.subr.bf16.mxu0 %v6209_v4  ;;  %2468 = vmatprep.subr.bf16.mxu1 %v6210_v41  ;;  %v6220_v4 = vld [vmem:[#allocation72_spill] sm:$0xff]  ;;  %v6221_v41 = vld [vmem:[#allocation73_spill] sm:$0xff] }
 0x6dd   :  { %2428 = vmatpush1.bf16.msra.mxu0 %v6211_v43  ;;  %2469 = vmatpush1.bf16.msra.mxu1 %v6212_v32  ;;  %v6222_v43 = vld [vmem:[#allocation74_spill] sm:$0xff]  ;;  %v6223_v32 = vld [vmem:[#allocation75_spill] sm:$0xff] }
 0x6de   :  { %2429 = vmatprep.subr.bf16.mxu0 %v6213_v44  ;;  %2470 = vmatprep.subr.bf16.mxu1 %v6214_v26  ;;  %v6224_v44 = vld [vmem:[#allocation76_spill] sm:$0xff]  ;;  %v6225_v26 = vld [vmem:[#allocation77_spill] sm:$0xff] }
 0x6e1   :  { %2430 = vmatpush1.bf16.msra.mxu0 %v6215_v15  ;;  %2471 = vmatpush1.bf16.msra.mxu1 %v6216_v55  ;;  %v6226_v15 = vld [vmem:[#allocation78_spill] sm:$0xff]  ;;  %v6227_v55 = vld [vmem:[#allocation79_spill] sm:$0xff] }
 0x6e2   :  { %2431 = vmatprep.subr.bf16.mxu0 %v6217_v42  ;;  %2472 = vmatprep.subr.bf16.mxu1 %v6218_v63  ;;  %v6228_v42 = vld [vmem:[#allocation80_spill] sm:$0xff]  ;;  %v6229_v63 = vld [vmem:[#allocation81_spill] sm:$0xff] }
 0x6e5   :  { %2432 = vmatpush1.bf16.msra.mxu0 %v6219_v31  ;;  %2473 = vmatpush1.bf16.msra.mxu1 %v6220_v4  ;;  %v6230_v31 = vld [vmem:[#allocation82_spill] sm:$0xff] }
 0x6e6   :  { %2433 = vmatprep.subr.bf16.mxu0 %v6221_v41  ;;  %2474 = vmatprep.subr.bf16.mxu1 %v6222_v43 }
 0x6e9   :  { %2434 = vmatpush1.bf16.msra.mxu0 %v6223_v32  ;;  %2475 = vmatpush1.bf16.msra.mxu1 %v6224_v44 }
 0x6ea   :  { %2435 = vmatprep.subr.bf16.mxu0 %v6225_v26  ;;  %2476 = vmatprep.subr.bf16.mxu1 %v6226_v15 }
 0x6ed   :  { %2436 = vmatpush1.bf16.msra.mxu0 %v6227_v55  ;;  %2477 = vmatpush1.bf16.msra.mxu1 %v6228_v42 }
 0x6ee   :  { %2487 = vmatprep.subr.bf16.mxu0 %v6229_v63  ;;  %2528 = vmatprep.subr.bf16.mxu1 %v6230_v31 }
 0x743   :  { %v2222_v4 = vpop.f32.mrb[32].mxu0  ;;  %v2263_v41 = vpop.f32.mrb[64].mxu1 }
 0x744   :  { %v2381_v43 = vadd.f32 %v2222_v4, %v6231_v17  ;;  %v2383_v32 = vadd.f32 %v2263_v41, %v6232_v18  ;;  %v2224_v35 = vpop.f32.mrb[33].mxu0  ;;  %v2265_v44 = vpop.f32.mrb[65].mxu1 }
 0x745   :  { %v2382_v26 = vadd.f32 %v2224_v35, %v6233_v53  ;;  %v2384_v15 = vadd.f32 %v2265_v44, %v6234_v46  ;;  %v2226_v62 = vpop.f32.mrb[34].mxu0  ;;  %v2267_v55 = vpop.f32.mrb[66].mxu1 }
 0x746   :  { %v2385_v38 = vmul.f32 0.5, %v2381_v43  ;;  %v2227_v42 = vpop.f32.mrb[35].mxu0  ;;  %v2268_v9 = vpop.f32.mrb[67].mxu1 }
 0x747   :  { %v2389_v63 = vmul.f32 0.5, %v2382_v26 }
 0x748   :  { %3526 = vtanh.f32 %v2385_v38 }
 0x749   :  { %3528 = vtanh.f32 %v2389_v63 }
 0x74a   :  { %3530 = vtanh.f32 %v2383_v32 }
 0x752   :  { %v3527_v31 = vpop.eup %3526 }
 0x753   :  { %v3529_v1 = vpop.eup %3528  ;;  %v2387_v17 = vmul.f32 0.5, %v3527_v31 }
 0x754   :  { %v2391_v4 = vmul.f32 0.5, %v3529_v1  ;;  %v3531_v41 = vpop.eup %3530 }
 0x755   :  { %v2388_v18 = vadd.f32 0.5, %v2387_v17 }
 0x756   :  { %v2392_v47 = vadd.f32 0.5, %v2391_v4 }
 0x757   :  { %v2399_v48 = vmul.f32 %v3531_v41, %v2388_v18 }
 0x758   :  { %v2398_v53 = vmul.f32 %v2392_v47, %v4852_v29 }
 0x75a   :  { %v5006_v46 = vadd.f32 %v2399_v48, %v2398_v53  ;;  %v2394_v48 = vmul.f32 0.5, %v2384_v15 }
 0x783   :  { %v2304_v62 = vpop.f32.mrb[36].mxu0  ;;  %v2345_v35 = vpop.f32.mrb[68].mxu1 }
 0x784   :  { %v2352_v9 = vadd.f32 %v2304_v62, %v5944_v11  ;;  %v2306_v44 = vpop.f32.mrb[37].mxu0  ;;  %v2347_v38 = vpop.f32.mrb[69].mxu1  ;;  %v2354_v43 = vadd.f32 %v2345_v35, %v4388_v34 }
 0x785   :  { %v2353_v32 = vadd.f32 %v2306_v44, %v4383_v6  ;;  %v2308_v26 = vpop.f32.mrb[38].mxu0  ;;  %v2349_v55 = vpop.f32.mrb[70].mxu1  ;;  %v2355_v29 = vadd.f32 %v2347_v38, %v4394_v36 }
 0x786   :  { %v2356_v42 = vmul.f32 0.5, %v2352_v9  ;;  %v2309_v1 = vpop.f32.mrb[39].mxu0  ;;  %v2350_v63 = vpop.f32.mrb[71].mxu1 }
 0x787   :  { %v2360_v31 = vmul.f32 0.5, %v2353_v32  ;;  %v2365_v47 = vmul.f32 0.5, %v2355_v29 }
 0x788   :  { %3532 = vtanh.f32 %v2356_v42 }
 0x789   :  { %3534 = vtanh.f32 %v2360_v31 }
 0x78a   :  { %3536 = vtanh.f32 %v2354_v43 }
 0x78b   :  { %3538 = vtanh.f32 %v2394_v48 }
 0x78c   :  { %3540 = vtanh.f32 %v2365_v47  ;;  %v6236_v47 = vld [vmem:[#allocation147_spill] sm:$0xff] }
 0x78d   :  { %3542 = vtanh.f32 %v5006_v46 }
 0x792   :  { %v3533_v17 = vpop.eup %3532 }
 0x793   :  { %v3535_v4 = vpop.eup %3534  ;;  %v2358_v18 = vmul.f32 0.5, %v3533_v17  ;;  %v6237_v17 = vld [vmem:[#allocation148_spill] sm:$0xff] }
 0x794   :  { %v2362_v41 = vmul.f32 0.5, %v3535_v4  ;;  %v3537_v62 = vpop.eup %3536  ;;  %v6238_v4 = vld [vmem:[#allocation149_spill] sm:$0xff] }
 0x795   :  { %v2359_v53 = vadd.f32 0.5, %v2358_v18  ;;  %v3539_v15 = vpop.eup %3538  ;;  %v6239_v18 = vld [vmem:[#allocation150_spill] sm:$0xff] }
 0x796   :  { %v2363_v9 = vadd.f32 0.5, %v2362_v41  ;;  %v3541_v38 = vpop.eup %3540  ;;  %v2396_v26 = vmul.f32 0.5, %v3539_v15  ;;  %v6240_v41 = vld [vmem:[#allocation151_spill] sm:$0xff]  ;;  %v6246_v15 = vld [vmem:[#allocation157_spill] sm:$0xff] }
 0x797   :  { %v2370_v44 = vmul.f32 %v3537_v62, %v2359_v53  ;;  %v2367_v55 = vmul.f32 0.5, %v3541_v38  ;;  %v3543_v42 = vpop.eup %3542  ;;  %v6241_v53 = vld [vmem:[#allocation152_spill] sm:$0xff]  ;;  %v6242_v62 = vld [vmem:[#allocation153_spill] sm:$0xff]  ;;  %v6247_v38 = vld [vmem:[#allocation158_spill] sm:$0xff] }
 0x798   :  { %v2369_v32 = vmul.f32 %v2363_v9, %v4860_v45  ;;  %v2397_v1 = vadd.f32 0.5, %v2396_v26  ;;  %v6243_v9 = vld [vmem:[#allocation154_spill] sm:$0xff]  ;;  %v6248_v26 = vld [vmem:[#allocation159_spill] sm:$0xff] }
 0x799   :  { %v2368_v63 = vadd.f32 0.5, %v2367_v55  ;;  %v6249_v55 = vld [vmem:[#allocation160_spill] sm:$0xff] }
 0x79a   :  { %v5014_v35 = vadd.f32 %v2370_v44, %v2369_v32  ;;  %v2402_v43 = vmul.f32 %v3543_v42, %v2397_v1  ;;  %v6244_v44 = vld [vmem:[#allocation155_spill] sm:$0xff]  ;;  %v6245_v32 = vld [vmem:[#allocation156_spill] sm:$0xff]  ;;  %v6250_v42 = vld [vmem:[#allocation161_spill] sm:$0xff] }
 0x79b   :  { %v6251_v1 = vld [vmem:[#allocation162_spill] sm:$0xff] }
 0x79c   :  { %3544 = vtanh.f32 %v5014_v35  ;;  %v5021_v48 = vpack.c.bf16 %v2402_v43, %v2402_v43  ;;  %v6254_v43 = vld [vmem:[#allocation165_spill] sm:$0xff] }
 0x7a6   :  { %v3545_v31 = vpop.eup %3544 }
 0x7a7   :  { %v5017_v29 = vmul.f32 %v3545_v31, %v2368_v63  ;;  %v6252_v63 = vld [vmem:[#allocation163_spill] sm:$0xff]  ;;  %v6253_v31 = vld [vmem:[#allocation164_spill] sm:$0xff] }
 0x7a9   :  { %6235 = vst [vmem:[#allocation115_spill] sm:$0xff] %v5017_v29  ;;  %v2404_v45 = vpack.c.bf16 %v5017_v29, %v5017_v29  ;;  %v6256_v29 = vld [vmem:[#allocation167_spill] sm:$0xff] }
 0x7ab   :  { %2437 = vmatprep.mubr.bf16.mxu0 %v2404_v45  ;;  %2478 = vmatprep.mubr.bf16.mxu1 %v2404_v45 }
 0x7ac   :  { %2438 = vmatmul.mubr.bf16.vlgmr.msra.gmra.mrb[40].mxu0 %v5021_v48  ;;  %2479 = vmatmul.mubr.bf16.vlgmr.msra.gmra.mrb[72].mxu1 %v5021_v48 }
 0x7ad   :  { %2488 = vmatpush1.bf16.msra.mxu0 %v4027_v7  ;;  %2529 = vmatpush1.bf16.msra.mxu1 %v5853_v23 }
 0x7ae   :  { %2519 = vmatprep.mubr.bf16.mxu0 %v2404_v45  ;;  %2560 = vmatprep.mubr.bf16.mxu1 %v2404_v45  ;;  %v6255_v45 = vld [vmem:[#allocation166_spill] sm:$0xff] }
 0x7af   :  { %2489 = vmatprep.subr.bf16.mxu0 %v5854_v33  ;;  %2530 = vmatprep.subr.bf16.mxu1 %v5855_v54 }
 0x7b1   :  { %2490 = vmatpush1.bf16.msra.mxu0 %v5856_v14  ;;  %2531 = vmatpush1.bf16.msra.mxu1 %v5857_v39 }
 0x7b2   :  { %2491 = vmatprep.subr.bf16.mxu0 %v5858_v57  ;;  %2532 = vmatprep.subr.bf16.mxu1 %v5946_v19 }
 0x7b5   :  { %2492 = vmatpush1.bf16.msra.mxu0 %v5947_v8  ;;  %2533 = vmatpush1.bf16.msra.mxu1 %v5948_v20 }
 0x7b6   :  { %2493 = vmatprep.subr.bf16.mxu0 %v5949_v3  ;;  %2534 = vmatprep.subr.bf16.mxu1 %v5950_v0 }
 0x7b9   :  { %2494 = vmatpush1.bf16.msra.mxu0 %v5951_v59  ;;  %2535 = vmatpush1.bf16.msra.mxu1 %v5952_v12 }
 0x7ba   :  { %2495 = vmatprep.subr.bf16.mxu0 %v5953_v24  ;;  %2536 = vmatprep.subr.bf16.mxu1 %v5954_v16 }
 0x7bd   :  { %2496 = vmatpush1.bf16.msra.mxu0 %v6042_v2  ;;  %2537 = vmatpush1.bf16.msra.mxu1 %v6043_v22 }
 0x7be   :  { %2497 = vmatprep.subr.bf16.mxu0 %v6044_v37  ;;  %2538 = vmatprep.subr.bf16.mxu1 %v6045_v13 }
 0x7c1   :  { %2498 = vmatpush1.bf16.msra.mxu0 %v6046_v49  ;;  %2539 = vmatpush1.bf16.msra.mxu1 %v6047_v61 }
 0x7c2   :  { %2499 = vmatprep.subr.bf16.mxu0 %v6048_v21  ;;  %2540 = vmatprep.subr.bf16.mxu1 %v6049_v5 }
 0x7c5   :  { %2500 = vmatpush1.bf16.msra.mxu0 %v6050_v50  ;;  %2541 = vmatpush1.bf16.msra.mxu1 %v6051_v40 }
 0x7c6   :  { %2501 = vmatprep.subr.bf16.mxu0 %v5965_v56  ;;  %2542 = vmatprep.subr.bf16.mxu1 %v5966_v25 }
 0x7c9   :  { %2502 = vmatpush1.bf16.msra.mxu0 %v5967_v60  ;;  %2543 = vmatpush1.bf16.msra.mxu1 %v6052_v51 }
 0x7ca   :  { %2503 = vmatprep.subr.bf16.mxu0 %v6053_v30  ;;  %2544 = vmatprep.subr.bf16.mxu1 %v5970_v58 }
 0x7cd   :  { %2504 = vmatpush1.bf16.msra.mxu0 %v5971_v27  ;;  %2545 = vmatpush1.bf16.msra.mxu1 %v5972_v28 }
 0x7ce   :  { %2505 = vmatprep.subr.bf16.mxu0 %v5973_v10  ;;  %2546 = vmatprep.subr.bf16.mxu1 %v5974_v52 }
 0x7d1   :  { %2506 = vmatpush1.bf16.msra.mxu0 %v6236_v47  ;;  %2547 = vmatpush1.bf16.msra.mxu1 %v6237_v17 }
 0x7d2   :  { %2507 = vmatprep.subr.bf16.mxu0 %v6238_v4  ;;  %2548 = vmatprep.subr.bf16.mxu1 %v6239_v18 }
 0x7d5   :  { %2508 = vmatpush1.bf16.msra.mxu0 %v6240_v41  ;;  %2549 = vmatpush1.bf16.msra.mxu1 %v6241_v53 }
 0x7d6   :  { %2509 = vmatprep.subr.bf16.mxu0 %v6242_v62  ;;  %2550 = vmatprep.subr.bf16.mxu1 %v6243_v9  ;;  %v6330_v9 = vld [vmem:[#allocation96_spill] sm:$0xff]  ;;  %v6331_v62 = vld [vmem:[#allocation110_spill] sm:$0xff] }
 0x7d9   :  { %2510 = vmatpush1.bf16.msra.mxu0 %v6244_v44  ;;  %2551 = vmatpush1.bf16.msra.mxu1 %v6245_v32  ;;  %v6329_v32 = vld [vmem:[#allocation109_spill] sm:$0xff] }
 0x7da   :  { %2511 = vmatprep.subr.bf16.mxu0 %v6246_v15  ;;  %2552 = vmatprep.subr.bf16.mxu1 %v6247_v38  ;;  %v6257_v15 = vld [vmem:[#allocation168_spill] sm:$0xff]  ;;  %v6258_v38 = vld [vmem:[#allocation169_spill] sm:$0xff] }
 0x7dd   :  { %2512 = vmatpush1.bf16.msra.mxu0 %v6248_v26  ;;  %2553 = vmatpush1.bf16.msra.mxu1 %v6249_v55  ;;  %v6259_v26 = vld [vmem:[#allocation170_spill] sm:$0xff]  ;;  %v6260_v55 = vld [vmem:[#allocation171_spill] sm:$0xff] }
 0x7de   :  { %2513 = vmatprep.subr.bf16.mxu0 %v6250_v42  ;;  %2554 = vmatprep.subr.bf16.mxu1 %v6251_v1  ;;  %v6261_v42 = vld [vmem:[#allocation172_spill] sm:$0xff]  ;;  %v6262_v1 = vld [vmem:[#allocation17_spill] sm:$0xff] }
 0x7e1   :  { %2514 = vmatpush1.bf16.msra.mxu0 %v6252_v63  ;;  %2555 = vmatpush1.bf16.msra.mxu1 %v6253_v31  ;;  %v6263_v63 = vld [vmem:[#allocation18_spill] sm:$0xff]  ;;  %v6328_v31 = vld [vmem:[#allocation95_spill] sm:$0xff] }
 0x7e2   :  { %2515 = vmatprep.subr.bf16.mxu0 %v6254_v43  ;;  %2556 = vmatprep.subr.bf16.mxu1 %v6255_v45  ;;  %v6264_v45 = vld [vmem:[#allocation19_spill] sm:$0xff]  ;;  %v6273_v43 = vld [vmem:[#allocation28_spill] sm:$0xff] }
 0x7e5   :  { %2516 = vmatpush1.bf16.msra.mxu0 %v6256_v29  ;;  %2557 = vmatpush1.bf16.msra.mxu1 %v6257_v15  ;;  %v6265_v29 = vld [vmem:[#allocation20_spill] sm:$0xff]  ;;  %v6266_v15 = vld [vmem:[#allocation21_spill] sm:$0xff] }
 0x7e6   :  { %2517 = vmatprep.subr.bf16.mxu0 %v6258_v38  ;;  %2558 = vmatprep.subr.bf16.mxu1 %v6259_v26  ;;  %v6267_v38 = vld [vmem:[#allocation22_spill] sm:$0xff]  ;;  %v6268_v26 = vld [vmem:[#allocation23_spill] sm:$0xff] }
 0x7e9   :  { %2518 = vmatpush1.bf16.msra.mxu0 %v6260_v55  ;;  %2559 = vmatpush1.bf16.msra.mxu1 %v6261_v42  ;;  %v6269_v55 = vld [vmem:[#allocation24_spill] sm:$0xff]  ;;  %v6270_v42 = vld [vmem:[#allocation25_spill] sm:$0xff] }
 0x7ea   :  { %2622 = vmatprep.subr.bf16.mxu0 %v6262_v1  ;;  %2663 = vmatprep.subr.bf16.mxu1 %v6263_v63  ;;  %v6271_v1 = vld [vmem:[#allocation26_spill] sm:$0xff]  ;;  %v6272_v63 = vld [vmem:[#allocation27_spill] sm:$0xff] }
 0x7ec   :  { %2520 = vmatmul.mubr.bf16.vlgmr.msra.gmra.mrb[44].mxu0 %v5021_v48  ;;  %2561 = vmatmul.mubr.bf16.vlgmr.msra.gmra.mrb[76].mxu1 %v5021_v48  ;;  %v6274_v48 = vld [vmem:[#allocation29_spill] sm:$0xff] }
 0x7ed   :  { %2623 = vmatpush1.bf16.msra.mxu0 %v6264_v45  ;;  %2664 = vmatpush1.bf16.msra.mxu1 %v6265_v29  ;;  %v6275_v45 = vld [vmem:[#allocation30_spill] sm:$0xff]  ;;  %v6276_v29 = vld [vmem:[#allocation31_spill] sm:$0xff] }
 0x7ee   :  { %2624 = vmatprep.subr.bf16.mxu0 %v6266_v15  ;;  %2665 = vmatprep.subr.bf16.mxu1 %v6267_v38  ;;  %v6277_v15 = vld [vmem:[#allocation32_spill] sm:$0xff]  ;;  %v6278_v38 = vld [vmem:[#allocation33_spill] sm:$0xff] }
 0x7f1   :  { %2625 = vmatpush1.bf16.msra.mxu0 %v6268_v26  ;;  %2666 = vmatpush1.bf16.msra.mxu1 %v6269_v55  ;;  %v6279_v26 = vld [vmem:[#allocation34_spill] sm:$0xff]  ;;  %v6280_v55 = vld [vmem:[#allocation35_spill] sm:$0xff] }
 0x7f2   :  { %2626 = vmatprep.subr.bf16.mxu0 %v6270_v42  ;;  %2667 = vmatprep.subr.bf16.mxu1 %v6271_v1  ;;  %v6281_v42 = vld [vmem:[#allocation36_spill] sm:$0xff]  ;;  %v6282_v1 = vld [vmem:[#allocation37_spill] sm:$0xff] }
 0x7f5   :  { %2627 = vmatpush1.bf16.msra.mxu0 %v6272_v63  ;;  %2668 = vmatpush1.bf16.msra.mxu1 %v6273_v43  ;;  %v6283_v63 = vld [vmem:[#allocation38_spill] sm:$0xff]  ;;  %v6284_v43 = vld [vmem:[#allocation39_spill] sm:$0xff] }
 0x7f6   :  { %2628 = vmatprep.subr.bf16.mxu0 %v6274_v48  ;;  %2669 = vmatprep.subr.bf16.mxu1 %v6275_v45  ;;  %v6285_v48 = vld [vmem:[#allocation40_spill] sm:$0xff]  ;;  %v6286_v45 = vld [vmem:[#allocation41_spill] sm:$0xff] }
 0x7f9   :  { %2629 = vmatpush1.bf16.msra.mxu0 %v6276_v29  ;;  %2670 = vmatpush1.bf16.msra.mxu1 %v6277_v15  ;;  %v6287_v29 = vld [vmem:[#allocation42_spill] sm:$0xff]  ;;  %v6288_v15 = vld [vmem:[#allocation43_spill] sm:$0xff] }
 0x7fa   :  { %2630 = vmatprep.subr.bf16.mxu0 %v6278_v38  ;;  %2671 = vmatprep.subr.bf16.mxu1 %v6279_v26  ;;  %v6289_v38 = vld [vmem:[#allocation44_spill] sm:$0xff]  ;;  %v6290_v26 = vld [vmem:[#allocation45_spill] sm:$0xff] }
 0x7fd   :  { %2631 = vmatpush1.bf16.msra.mxu0 %v6280_v55  ;;  %2672 = vmatpush1.bf16.msra.mxu1 %v6281_v42  ;;  %v6291_v55 = vld [vmem:[#allocation46_spill] sm:$0xff]  ;;  %v6292_v42 = vld [vmem:[#allocation47_spill] sm:$0xff] }
 0x7fe   :  { %2632 = vmatprep.subr.bf16.mxu0 %v6282_v1  ;;  %2673 = vmatprep.subr.bf16.mxu1 %v6283_v63  ;;  %v6293_v1 = vld [vmem:[#allocation48_spill] sm:$0xff]  ;;  %v6294_v63 = vld [vmem:[#allocation49_spill] sm:$0xff] }
 0x801   :  { %2633 = vmatpush1.bf16.msra.mxu0 %v6284_v43  ;;  %2674 = vmatpush1.bf16.msra.mxu1 %v6285_v48  ;;  %v6295_v43 = vld [vmem:[#allocation50_spill] sm:$0xff]  ;;  %v6296_v48 = vld [vmem:[#allocation51_spill] sm:$0xff] }
 0x802   :  { %2634 = vmatprep.subr.bf16.mxu0 %v6286_v45  ;;  %2675 = vmatprep.subr.bf16.mxu1 %v6287_v29  ;;  %v6297_v45 = vld [vmem:[#allocation52_spill] sm:$0xff]  ;;  %v6298_v29 = vld [vmem:[#allocation53_spill] sm:$0xff] }
 0x805   :  { %2635 = vmatpush1.bf16.msra.mxu0 %v6288_v15  ;;  %2676 = vmatpush1.bf16.msra.mxu1 %v6289_v38  ;;  %v6299_v15 = vld [vmem:[#allocation54_spill] sm:$0xff]  ;;  %v6300_v38 = vld [vmem:[#allocation55_spill] sm:$0xff] }
 0x806   :  { %2636 = vmatprep.subr.bf16.mxu0 %v6290_v26  ;;  %2677 = vmatprep.subr.bf16.mxu1 %v6291_v55  ;;  %v6301_v26 = vld [vmem:[#allocation56_spill] sm:$0xff]  ;;  %v6302_v55 = vld [vmem:[#allocation57_spill] sm:$0xff] }
 0x809   :  { %2637 = vmatpush1.bf16.msra.mxu0 %v6292_v42  ;;  %2678 = vmatpush1.bf16.msra.mxu1 %v6293_v1  ;;  %v6303_v42 = vld [vmem:[#allocation58_spill] sm:$0xff]  ;;  %v6304_v1 = vld [vmem:[#allocation59_spill] sm:$0xff] }
 0x80a   :  { %2638 = vmatprep.subr.bf16.mxu0 %v6294_v63  ;;  %2679 = vmatprep.subr.bf16.mxu1 %v6295_v43  ;;  %v6305_v63 = vld [vmem:[#allocation60_spill] sm:$0xff]  ;;  %v6306_v43 = vld [vmem:[#allocation61_spill] sm:$0xff] }
 0x80d   :  { %2639 = vmatpush1.bf16.msra.mxu0 %v6296_v48  ;;  %2680 = vmatpush1.bf16.msra.mxu1 %v6297_v45  ;;  %v6307_v48 = vld [vmem:[#allocation62_spill] sm:$0xff]  ;;  %v6308_v45 = vld [vmem:[#allocation63_spill] sm:$0xff] }
 0x80e   :  { %2640 = vmatprep.subr.bf16.mxu0 %v6298_v29  ;;  %2681 = vmatprep.subr.bf16.mxu1 %v6299_v15  ;;  %v6309_v29 = vld [vmem:[#allocation64_spill] sm:$0xff]  ;;  %v6310_v15 = vld [vmem:[#allocation65_spill] sm:$0xff] }
 0x811   :  { %2641 = vmatpush1.bf16.msra.mxu0 %v6300_v38  ;;  %2682 = vmatpush1.bf16.msra.mxu1 %v6301_v26  ;;  %v6311_v38 = vld [vmem:[#allocation66_spill] sm:$0xff]  ;;  %v6312_v26 = vld [vmem:[#allocation67_spill] sm:$0xff] }
 0x812   :  { %2642 = vmatprep.subr.bf16.mxu0 %v6302_v55  ;;  %2683 = vmatprep.subr.bf16.mxu1 %v6303_v42  ;;  %v6313_v55 = vld [vmem:[#allocation68_spill] sm:$0xff]  ;;  %v6314_v42 = vld [vmem:[#allocation69_spill] sm:$0xff] }
 0x815   :  { %2643 = vmatpush1.bf16.msra.mxu0 %v6304_v1  ;;  %2684 = vmatpush1.bf16.msra.mxu1 %v6305_v63  ;;  %v6315_v1 = vld [vmem:[#allocation70_spill] sm:$0xff]  ;;  %v6316_v63 = vld [vmem:[#allocation71_spill] sm:$0xff] }
 0x816   :  { %2644 = vmatprep.subr.bf16.mxu0 %v6306_v43  ;;  %2685 = vmatprep.subr.bf16.mxu1 %v6307_v48  ;;  %v6317_v43 = vld [vmem:[#allocation72_spill] sm:$0xff]  ;;  %v6318_v48 = vld [vmem:[#allocation73_spill] sm:$0xff] }
 0x819   :  { %2645 = vmatpush1.bf16.msra.mxu0 %v6308_v45  ;;  %2686 = vmatpush1.bf16.msra.mxu1 %v6309_v29  ;;  %v6319_v45 = vld [vmem:[#allocation74_spill] sm:$0xff]  ;;  %v6320_v29 = vld [vmem:[#allocation75_spill] sm:$0xff] }
 0x81a   :  { %2646 = vmatprep.subr.bf16.mxu0 %v6310_v15  ;;  %2687 = vmatprep.subr.bf16.mxu1 %v6311_v38  ;;  %v6321_v15 = vld [vmem:[#allocation76_spill] sm:$0xff]  ;;  %v6322_v38 = vld [vmem:[#allocation77_spill] sm:$0xff] }
 0x81d   :  { %2647 = vmatpush1.bf16.msra.mxu0 %v6312_v26  ;;  %2688 = vmatpush1.bf16.msra.mxu1 %v6313_v55  ;;  %v6323_v26 = vld [vmem:[#allocation78_spill] sm:$0xff]  ;;  %v6324_v55 = vld [vmem:[#allocation79_spill] sm:$0xff] }
 0x81e   :  { %2648 = vmatprep.subr.bf16.mxu0 %v6314_v42  ;;  %2689 = vmatprep.subr.bf16.mxu1 %v6315_v1  ;;  %v6325_v42 = vld [vmem:[#allocation80_spill] sm:$0xff]  ;;  %v6326_v1 = vld [vmem:[#allocation81_spill] sm:$0xff] }
 0x821   :  { %2649 = vmatpush1.bf16.msra.mxu0 %v6316_v63  ;;  %2690 = vmatpush1.bf16.msra.mxu1 %v6317_v43  ;;  %v6327_v63 = vld [vmem:[#allocation82_spill] sm:$0xff] }
 0x822   :  { %2650 = vmatprep.subr.bf16.mxu0 %v6318_v48  ;;  %2691 = vmatprep.subr.bf16.mxu1 %v6319_v45 }
 0x825   :  { %2651 = vmatpush1.bf16.msra.mxu0 %v6320_v29  ;;  %2692 = vmatpush1.bf16.msra.mxu1 %v6321_v15 }
 0x826   :  { %2652 = vmatprep.subr.bf16.mxu0 %v6322_v38  ;;  %2693 = vmatprep.subr.bf16.mxu1 %v6323_v26 }
 0x829   :  { %2653 = vmatpush1.bf16.msra.mxu0 %v6324_v55  ;;  %2694 = vmatpush1.bf16.msra.mxu1 %v6325_v42 }
 0x82a   :  { %2704 = vmatprep.subr.bf16.mxu0 %v6326_v1  ;;  %2745 = vmatprep.subr.bf16.mxu1 %v6327_v63 }
 0x87f   :  { %v2439_v43 = vpop.f32.mrb[40].mxu0  ;;  %v2480_v48 = vpop.f32.mrb[72].mxu1 }
 0x880   :  { %v2598_v45 = vadd.f32 %v2439_v43, %v6328_v31  ;;  %v2600_v29 = vadd.f32 %v2480_v48, %v6329_v32  ;;  %v2441_v44 = vpop.f32.mrb[41].mxu0  ;;  %v2482_v15 = vpop.f32.mrb[73].mxu1 }
 0x881   :  { %v2599_v38 = vadd.f32 %v2441_v44, %v6330_v9  ;;  %v2601_v26 = vadd.f32 %v2482_v15, %v6331_v62  ;;  %v2443_v53 = vpop.f32.mrb[42].mxu0  ;;  %v2484_v55 = vpop.f32.mrb[74].mxu1 }
 0x882   :  { %v2602_v41 = vmul.f32 0.5, %v2598_v45  ;;  %v2444_v42 = vpop.f32.mrb[43].mxu0  ;;  %v2485_v18 = vpop.f32.mrb[75].mxu1 }
 0x883   :  { %v2606_v1 = vmul.f32 0.5, %v2599_v38 }
 0x884   :  { %3546 = vtanh.f32 %v2602_v41 }
 0x885   :  { %3548 = vtanh.f32 %v2606_v1 }
 0x886   :  { %3550 = vtanh.f32 %v2600_v29 }
 0x88e   :  { %v3547_v63 = vpop.eup %3546 }
 0x88f   :  { %v3549_v4 = vpop.eup %3548  ;;  %v2604_v31 = vmul.f32 0.5, %v3547_v63 }
 0x890   :  { %v2608_v43 = vmul.f32 0.5, %v3549_v4  ;;  %v3551_v48 = vpop.eup %3550 }
 0x891   :  { %v2605_v32 = vadd.f32 0.5, %v2604_v31 }
 0x892   :  { %v2609_v17 = vadd.f32 0.5, %v2608_v43 }
 0x893   :  { %v2616_v47 = vmul.f32 %v3551_v48, %v2605_v32 }
 0x894   :  { %v2615_v9 = vmul.f32 %v2609_v17, %v5006_v46 }
 0x896   :  { %v5160_v62 = vadd.f32 %v2616_v47, %v2615_v9  ;;  %v2611_v47 = vmul.f32 0.5, %v2601_v26 }
 0x898   :  { %6332 = vst [vmem:[#allocation116_spill] sm:$0xff] %v5160_v62 }
 0x8bf   :  { %v2521_v53 = vpop.f32.mrb[44].mxu0  ;;  %v2562_v44 = vpop.f32.mrb[76].mxu1 }
 0x8c0   :  { %v2569_v18 = vadd.f32 %v2521_v53, %v5944_v11  ;;  %v2523_v45 = vpop.f32.mrb[45].mxu0  ;;  %v2564_v41 = vpop.f32.mrb[77].mxu1  ;;  %v2571_v42 = vadd.f32 %v2562_v44, %v4388_v34  ;;  %v6358_v34 = vld [vmem:[#allocation170_spill] sm:$0xff]  ;;  %v6360_v11 = vld [vmem:[#allocation172_spill] sm:$0xff] }
 0x8c1   :  { %v2570_v1 = vadd.f32 %v2523_v45, %v4383_v6  ;;  %v2525_v29 = vpop.f32.mrb[46].mxu0  ;;  %v2566_v15 = vpop.f32.mrb[78].mxu1  ;;  %v2572_v46 = vadd.f32 %v2564_v41, %v4394_v36  ;;  %v6357_v36 = vld [vmem:[#allocation169_spill] sm:$0xff]  ;;  %v6359_v6 = vld [vmem:[#allocation171_spill] sm:$0xff] }
 0x8c2   :  { %v2573_v63 = vmul.f32 0.5, %v2569_v18  ;;  %v2526_v4 = vpop.f32.mrb[47].mxu0  ;;  %v2567_v38 = vpop.f32.mrb[79].mxu1 }
 0x8c3   :  { %v2577_v55 = vmul.f32 0.5, %v2570_v1  ;;  %v2582_v17 = vmul.f32 0.5, %v2572_v46 }
 0x8c4   :  { %3552 = vtanh.f32 %v2573_v63 }
 0x8c5   :  { %3554 = vtanh.f32 %v2577_v55 }
 0x8c6   :  { %3556 = vtanh.f32 %v2571_v42 }
 0x8c7   :  { %3558 = vtanh.f32 %v2611_v47 }
 0x8c8   :  { %3560 = vtanh.f32 %v2582_v17  ;;  %v6335_v17 = vld [vmem:[#allocation147_spill] sm:$0xff] }
 0x8c9   :  { %3562 = vtanh.f32 %v5160_v62  ;;  %v6361_v62 = vld [vmem:[#allocation81_spill] sm:$0xff] }
 0x8ce   :  { %v3553_v31 = vpop.eup %3552 }
 0x8cf   :  { %v3555_v43 = vpop.eup %3554  ;;  %v2575_v32 = vmul.f32 0.5, %v3553_v31  ;;  %v6336_v31 = vld [vmem:[#allocation148_spill] sm:$0xff] }
 0x8d0   :  { %v2579_v48 = vmul.f32 0.5, %v3555_v43  ;;  %v3557_v53 = vpop.eup %3556  ;;  %v6337_v43 = vld [vmem:[#allocation149_spill] sm:$0xff] }
 0x8d1   :  { %v2576_v9 = vadd.f32 0.5, %v2575_v32  ;;  %v3559_v26 = vpop.eup %3558  ;;  %v6338_v32 = vld [vmem:[#allocation150_spill] sm:$0xff] }
 0x8d2   :  { %v2580_v18 = vadd.f32 0.5, %v2579_v48  ;;  %v3561_v41 = vpop.eup %3560  ;;  %v2613_v29 = vmul.f32 0.5, %v3559_v26  ;;  %v6339_v48 = vld [vmem:[#allocation151_spill] sm:$0xff]  ;;  %v6345_v26 = vld [vmem:[#allocation157_spill] sm:$0xff] }
 0x8d3   :  { %v2587_v45 = vmul.f32 %v3557_v53, %v2576_v9  ;;  %v2584_v15 = vmul.f32 0.5, %v3561_v41  ;;  %v3563_v63 = vpop.eup %3562  ;;  %v6340_v9 = vld [vmem:[#allocation152_spill] sm:$0xff]  ;;  %v6341_v53 = vld [vmem:[#allocation153_spill] sm:$0xff]  ;;  %v6346_v41 = vld [vmem:[#allocation158_spill] sm:$0xff] }
 0x8d4   :  { %v2586_v1 = vmul.f32 %v2580_v18, %v5014_v35  ;;  %v2614_v4 = vadd.f32 0.5, %v2613_v29  ;;  %v6342_v18 = vld [vmem:[#allocation154_spill] sm:$0xff]  ;;  %v6347_v29 = vld [vmem:[#allocation159_spill] sm:$0xff] }
 0x8d5   :  { %v2585_v38 = vadd.f32 0.5, %v2584_v15  ;;  %v6348_v15 = vld [vmem:[#allocation160_spill] sm:$0xff] }
 0x8d6   :  { %v5168_v44 = vadd.f32 %v2587_v45, %v2586_v1  ;;  %v2619_v42 = vmul.f32 %v3563_v63, %v2614_v4  ;;  %v6343_v45 = vld [vmem:[#allocation155_spill] sm:$0xff]  ;;  %v6344_v1 = vld [vmem:[#allocation156_spill] sm:$0xff]  ;;  %v6349_v63 = vld [vmem:[#allocation161_spill] sm:$0xff] }
 0x8d7   :  { %v6350_v4 = vld [vmem:[#allocation162_spill] sm:$0xff] }
 0x8d8   :  { %6333 = vst [vmem:[#allocation117_spill] sm:$0xff] %v5168_v44  ;;  %3564 = vtanh.f32 %v5168_v44  ;;  %v5175_v47 = vpack.c.bf16 %v2619_v42, %v2619_v42  ;;  %v6353_v42 = vld [vmem:[#allocation165_spill] sm:$0xff]  ;;  %v6356_v44 = vld [vmem:[#allocation168_spill] sm:$0xff] }
 0x8e2   :  { %v3565_v55 = vpop.eup %3564 }
 0x8e3   :  { %v5171_v46 = vmul.f32 %v3565_v55, %v2585_v38  ;;  %v6351_v38 = vld [vmem:[#allocation163_spill] sm:$0xff]  ;;  %v6352_v55 = vld [vmem:[#allocation164_spill] sm:$0xff] }
 0x8e5   :  { %6334 = vst [vmem:[#allocation87_spill] sm:$0xff] %v5171_v46  ;;  %v2621_v35 = vpack.c.bf16 %v5171_v46, %v5171_v46  ;;  %v6355_v46 = vld [vmem:[#allocation167_spill] sm:$0xff] }
 0x8e7   :  { %2654 = vmatprep.mubr.bf16.mxu0 %v2621_v35  ;;  %2695 = vmatprep.mubr.bf16.mxu1 %v2621_v35 }
 0x8e8   :  { %2655 = vmatmul.mubr.bf16.vlgmr.msra.gmra.mrb[48].mxu0 %v5175_v47  ;;  %2696 = vmatmul.mubr.bf16.vlgmr.msra.gmra.mrb[80].mxu1 %v5175_v47 }
 0x8e9   :  { %2705 = vmatpush1.bf16.msra.mxu0 %v4027_v7  ;;  %2746 = vmatpush1.bf16.msra.mxu1 %v5853_v23 }
 0x8ea   :  { %2736 = vmatprep.mubr.bf16.mxu0 %v2621_v35  ;;  %2777 = vmatprep.mubr.bf16.mxu1 %v2621_v35  ;;  %v6354_v35 = vld [vmem:[#allocation166_spill] sm:$0xff] }
 0x8eb   :  { %2706 = vmatprep.subr.bf16.mxu0 %v5854_v33  ;;  %2747 = vmatprep.subr.bf16.mxu1 %v5855_v54 }
 0x8ed   :  { %2707 = vmatpush1.bf16.msra.mxu0 %v5856_v14  ;;  %2748 = vmatpush1.bf16.msra.mxu1 %v5857_v39 }
 0x8ee   :  { %2708 = vmatprep.subr.bf16.mxu0 %v5858_v57  ;;  %2749 = vmatprep.subr.bf16.mxu1 %v5946_v19 }
 0x8f1   :  { %2709 = vmatpush1.bf16.msra.mxu0 %v5947_v8  ;;  %2750 = vmatpush1.bf16.msra.mxu1 %v5948_v20 }
 0x8f2   :  { %2710 = vmatprep.subr.bf16.mxu0 %v5949_v3  ;;  %2751 = vmatprep.subr.bf16.mxu1 %v5950_v0 }
 0x8f5   :  { %2711 = vmatpush1.bf16.msra.mxu0 %v5951_v59  ;;  %2752 = vmatpush1.bf16.msra.mxu1 %v5952_v12 }
 0x8f6   :  { %2712 = vmatprep.subr.bf16.mxu0 %v5953_v24  ;;  %2753 = vmatprep.subr.bf16.mxu1 %v5954_v16 }
 0x8f9   :  { %2713 = vmatpush1.bf16.msra.mxu0 %v6042_v2  ;;  %2754 = vmatpush1.bf16.msra.mxu1 %v6043_v22 }
 0x8fa   :  { %2714 = vmatprep.subr.bf16.mxu0 %v6044_v37  ;;  %2755 = vmatprep.subr.bf16.mxu1 %v6045_v13 }
 0x8fd   :  { %2715 = vmatpush1.bf16.msra.mxu0 %v6046_v49  ;;  %2756 = vmatpush1.bf16.msra.mxu1 %v6047_v61 }
 0x8fe   :  { %2716 = vmatprep.subr.bf16.mxu0 %v6048_v21  ;;  %2757 = vmatprep.subr.bf16.mxu1 %v6049_v5 }
 0x901   :  { %2717 = vmatpush1.bf16.msra.mxu0 %v6050_v50  ;;  %2758 = vmatpush1.bf16.msra.mxu1 %v6051_v40 }
 0x902   :  { %2718 = vmatprep.subr.bf16.mxu0 %v5965_v56  ;;  %2759 = vmatprep.subr.bf16.mxu1 %v5966_v25 }
 0x905   :  { %2719 = vmatpush1.bf16.msra.mxu0 %v5967_v60  ;;  %2760 = vmatpush1.bf16.msra.mxu1 %v6052_v51 }
 0x906   :  { %2720 = vmatprep.subr.bf16.mxu0 %v6053_v30  ;;  %2761 = vmatprep.subr.bf16.mxu1 %v5970_v58 }
 0x909   :  { %2721 = vmatpush1.bf16.msra.mxu0 %v5971_v27  ;;  %2762 = vmatpush1.bf16.msra.mxu1 %v5972_v28 }
 0x90a   :  { %2722 = vmatprep.subr.bf16.mxu0 %v5973_v10  ;;  %2763 = vmatprep.subr.bf16.mxu1 %v5974_v52 }
 0x90d   :  { %2723 = vmatpush1.bf16.msra.mxu0 %v6335_v17  ;;  %2764 = vmatpush1.bf16.msra.mxu1 %v6336_v31 }
 0x90e   :  { %2724 = vmatprep.subr.bf16.mxu0 %v6337_v43  ;;  %2765 = vmatprep.subr.bf16.mxu1 %v6338_v32 }
 0x911   :  { %2725 = vmatpush1.bf16.msra.mxu0 %v6339_v48  ;;  %2766 = vmatpush1.bf16.msra.mxu1 %v6340_v9 }
 0x912   :  { %2726 = vmatprep.subr.bf16.mxu0 %v6341_v53  ;;  %2767 = vmatprep.subr.bf16.mxu1 %v6342_v18 }
 0x915   :  { %2727 = vmatpush1.bf16.msra.mxu0 %v6343_v45  ;;  %2768 = vmatpush1.bf16.msra.mxu1 %v6344_v1 }
 0x916   :  { %2728 = vmatprep.subr.bf16.mxu0 %v6345_v26  ;;  %2769 = vmatprep.subr.bf16.mxu1 %v6346_v41 }
 0x919   :  { %2729 = vmatpush1.bf16.msra.mxu0 %v6347_v29  ;;  %2770 = vmatpush1.bf16.msra.mxu1 %v6348_v15 }
 0x91a   :  { %2730 = vmatprep.subr.bf16.mxu0 %v6349_v63  ;;  %2771 = vmatprep.subr.bf16.mxu1 %v6350_v4 }
 0x91d   :  { %2731 = vmatpush1.bf16.msra.mxu0 %v6351_v38  ;;  %2772 = vmatpush1.bf16.msra.mxu1 %v6352_v55  ;;  %v6362_v38 = vld [vmem:[#allocation82_spill] sm:$0xff] }
 0x91e   :  { %2732 = vmatprep.subr.bf16.mxu0 %v6353_v42  ;;  %2773 = vmatprep.subr.bf16.mxu1 %v6354_v35 }
 0x921   :  { %2733 = vmatpush1.bf16.msra.mxu0 %v6355_v46  ;;  %2774 = vmatpush1.bf16.msra.mxu1 %v6356_v44 }
 0x922   :  { %2734 = vmatprep.subr.bf16.mxu0 %v6357_v36  ;;  %2775 = vmatprep.subr.bf16.mxu1 %v6358_v34 }
 0x925   :  { %2735 = vmatpush1.bf16.msra.mxu0 %v6359_v6  ;;  %2776 = vmatpush1.bf16.msra.mxu1 %v6360_v11 }
 0x926   :  { %2839 = vmatprep.subr.bf16.mxu0 %v6361_v62  ;;  %2880 = vmatprep.subr.bf16.mxu1 %v6362_v38 }
 0x928   :  { %2737 = vmatmul.mubr.bf16.vlgmr.msra.gmra.mrb[52].mxu0 %v5175_v47  ;;  %2778 = vmatmul.mubr.bf16.vlgmr.msra.gmra.mrb[84].mxu1 %v5175_v47  ;;  %v6370_v47 = vld [vmem:[#allocation86_spill] sm:$0xff] }
 0x929   :  { %2840 = vmatpush1.bf16.msra.mxu0 %v4027_v7  ;;  %2881 = vmatpush1.bf16.msra.mxu1 %v5853_v23  ;;  %v6363_v7 = vld [vmem:[#allocation163_spill] sm:$0xff]  ;;  %v5307_v23 = vld [vmem:[#allocation10] sm:$0xff]  }
 0x92a   :  { %2841 = vmatprep.subr.bf16.mxu0 %v5854_v33  ;;  %2882 = vmatprep.subr.bf16.mxu1 %v5855_v54 }
 0x92d   :  { %2842 = vmatpush1.bf16.msra.mxu0 %v5856_v14  ;;  %2883 = vmatpush1.bf16.msra.mxu1 %v5857_v39  ;;  %v6364_v14 = vld [vmem:[#allocation97_spill] sm:$0xff] }
 0x92e   :  { %2843 = vmatprep.subr.bf16.mxu0 %v5858_v57  ;;  %2884 = vmatprep.subr.bf16.mxu1 %v5946_v19  ;;  %v6365_v57 = vld [vmem:[#allocation111_spill] sm:$0xff] }
 0x931   :  { %2844 = vmatpush1.bf16.msra.mxu0 %v5947_v8  ;;  %2885 = vmatpush1.bf16.msra.mxu1 %v5948_v20  ;;  %v6366_v20 = vld [vmem:[#allocation98_spill] sm:$0xff] }
 0x932   :  { %2845 = vmatprep.subr.bf16.mxu0 %v5949_v3  ;;  %2886 = vmatprep.subr.bf16.mxu1 %v5950_v0  ;;  %v6367_v3 = vld [vmem:[#allocation112_spill] sm:$0xff] }
 0x935   :  { %2846 = vmatpush1.bf16.msra.mxu0 %v5951_v59  ;;  %2887 = vmatpush1.bf16.msra.mxu1 %v5952_v12 }
 0x936   :  { %2847 = vmatprep.subr.bf16.mxu0 %v5953_v24  ;;  %2888 = vmatprep.subr.bf16.mxu1 %v5954_v16 }
 0x939   :  { %2848 = vmatpush1.bf16.msra.mxu0 %v6042_v2  ;;  %2889 = vmatpush1.bf16.msra.mxu1 %v6043_v22  ;;  %v6368_v22 = vld [vmem:[#allocation116_spill] sm:$0xff] }
 0x93a   :  { %2849 = vmatprep.subr.bf16.mxu0 %v6044_v37  ;;  %2890 = vmatprep.subr.bf16.mxu1 %v6045_v13 }
 0x93d   :  { %2850 = vmatpush1.bf16.msra.mxu0 %v6046_v49  ;;  %2891 = vmatpush1.bf16.msra.mxu1 %v6047_v61 }
 0x93e   :  { %2851 = vmatprep.subr.bf16.mxu0 %v6048_v21  ;;  %2892 = vmatprep.subr.bf16.mxu1 %v6049_v5 }
 0x941   :  { %2852 = vmatpush1.bf16.msra.mxu0 %v6050_v50  ;;  %2893 = vmatpush1.bf16.msra.mxu1 %v6051_v40 }
 0x942   :  { %2853 = vmatprep.subr.bf16.mxu0 %v5965_v56  ;;  %2894 = vmatprep.subr.bf16.mxu1 %v5966_v25 }
 0x945   :  { %2854 = vmatpush1.bf16.msra.mxu0 %v5967_v60  ;;  %2895 = vmatpush1.bf16.msra.mxu1 %v6052_v51 }
 0x946   :  { %2855 = vmatprep.subr.bf16.mxu0 %v6053_v30  ;;  %2896 = vmatprep.subr.bf16.mxu1 %v5970_v58  ;;  %v6369_v30 = vld [vmem:[#allocation85_spill] sm:$0xff] }
 0x949   :  { %2856 = vmatpush1.bf16.msra.mxu0 %v5971_v27  ;;  %2897 = vmatpush1.bf16.msra.mxu1 %v5972_v28 }
 0x94a   :  { %2857 = vmatprep.subr.bf16.mxu0 %v5973_v10  ;;  %2898 = vmatprep.subr.bf16.mxu1 %v5974_v52 }
 0x94d   :  { %2858 = vmatpush1.bf16.msra.mxu0 %v6335_v17  ;;  %2899 = vmatpush1.bf16.msra.mxu1 %v6336_v31 }
 0x94e   :  { %2859 = vmatprep.subr.bf16.mxu0 %v6337_v43  ;;  %2900 = vmatprep.subr.bf16.mxu1 %v6338_v32 }
 0x951   :  { %2860 = vmatpush1.bf16.msra.mxu0 %v6339_v48  ;;  %2901 = vmatpush1.bf16.msra.mxu1 %v6340_v9 }
 0x952   :  { %2861 = vmatprep.subr.bf16.mxu0 %v6341_v53  ;;  %2902 = vmatprep.subr.bf16.mxu1 %v6342_v18  ;;  %v6371_v18 = vld [vmem:[#allocation99_spill] sm:$0xff] }
 0x955   :  { %2862 = vmatpush1.bf16.msra.mxu0 %v6343_v45  ;;  %2903 = vmatpush1.bf16.msra.mxu1 %v6344_v1  ;;  %v6372_v1 = vld [vmem:[#allocation104_spill] sm:$0xff] }
 0x956   :  { %2863 = vmatprep.subr.bf16.mxu0 %v6345_v26  ;;  %2904 = vmatprep.subr.bf16.mxu1 %v6346_v41 }
 0x959   :  { %2864 = vmatpush1.bf16.msra.mxu0 %v6347_v29  ;;  %2905 = vmatpush1.bf16.msra.mxu1 %v6348_v15 }
 0x95a   :  { %2865 = vmatprep.subr.bf16.mxu0 %v6349_v63  ;;  %2906 = vmatprep.subr.bf16.mxu1 %v6350_v4 }
 0x95d   :  { %2866 = vmatpush1.bf16.msra.mxu0 %v6363_v7  ;;  %2907 = vmatpush1.bf16.msra.mxu1 %v6352_v55  ;;  %v6373_v7 = vld [vmem:[#allocation117_spill] sm:$0xff] }
 0x95e   :  { %2867 = vmatprep.subr.bf16.mxu0 %v6353_v42  ;;  %2908 = vmatprep.subr.bf16.mxu1 %v6354_v35 }
 0x961   :  { %2868 = vmatpush1.bf16.msra.mxu0 %v6355_v46  ;;  %2909 = vmatpush1.bf16.msra.mxu1 %v6356_v44 }
 0x962   :  { %2869 = vmatprep.subr.bf16.mxu0 %v6357_v36  ;;  %2910 = vmatprep.subr.bf16.mxu1 %v6358_v34 }
 0x965   :  { %2870 = vmatpush1.bf16.msra.mxu0 %v6359_v6  ;;  %2911 = vmatpush1.bf16.msra.mxu1 %v6360_v11 }
 0x966   :  { %3337 = vmatprep.subr.bf16.mxu0 %v5307_v23 }
 0x9bb   :  { %v2656_v33 = vpop.f32.mrb[48].mxu0  ;;  %v2697_v54 = vpop.f32.mrb[80].mxu1 }
 0x9bc   :  { %v2815_v39 = vadd.f32 %v2656_v33, %v6364_v14  ;;  %v2817_v56 = vadd.f32 %v2697_v54, %v6365_v57  ;;  %v2658_v19 = vpop.f32.mrb[49].mxu0  ;;  %v2699_v8 = vpop.f32.mrb[81].mxu1 }
 0x9bd   :  { %v2816_v36 = vadd.f32 %v2658_v19, %v6366_v20  ;;  %v2818_v34 = vadd.f32 %v2699_v8, %v6367_v3  ;;  %v2660_v0 = vpop.f32.mrb[50].mxu0  ;;  %v2701_v6 = vpop.f32.mrb[82].mxu1  ;;  %v6374_v3 = vld [vmem:[#allocation84_spill] sm:$0xff] }
 0x9be   :  { %v2819_v59 = vmul.f32 0.5, %v2815_v39  ;;  %v2661_v11 = vpop.f32.mrb[51].mxu0  ;;  %v2702_v12 = vpop.f32.mrb[83].mxu1  ;;  %v3430_v6 = vld [vmem:[#allocation10 + $0x10] sm:$0xff]  }
 0x9bf   :  { %v2823_v24 = vmul.f32 0.5, %v2816_v36  ;;  %v2828_v16 = vmul.f32 0.5, %v2818_v34  ;;  %v3429_v36 = vld [vmem:[#allocation10 + $0x8] sm:$0xff]   ;;  %v6375_v34 = vld [vmem:[#allocation83_spill] sm:$0xff]  ;;  %v3432_v11 = vld [vmem:[#allocation10 + $0x20] sm:$0xff]  }
 0x9c0   :  { %3566 = vtanh.f32 %v2819_v59  ;;  %v3321_v0 = vpack.c.bf16 %v6375_v34, %v6374_v3  ;;  %v3431_v59 = vld [vmem:[#allocation10 + $0x18] sm:$0xff]   ;;  %v3433_v12 = vld [vmem:[#allocation10 + $0x28] sm:$0xff]  }
 0x9c1   :  { %3568 = vtanh.f32 %v2823_v24  ;;  %v3434_v24 = vld [vmem:[#allocation10 + $0x30] sm:$0xff]  }
 0x9c2   :  { %3570 = vtanh.f32 %v2817_v56 }
 0x9c3   :  { %3572 = vtanh.f32 %v2828_v16  ;;  %v3435_v16 = vld [vmem:[#allocation10 + $0x38] sm:$0xff]  }
 0x9ca   :  { %v3567_v25 = vpop.eup %3566 }
 0x9cb   :  { %v3569_v60 = vpop.eup %3568  ;;  %v2821_v58 = vmul.f32 0.5, %v3567_v25  ;;  %v6377_v25 = vld [vmem:[#allocation114_spill] sm:$0xff] }
 0x9cc   :  { %v2825_v27 = vmul.f32 0.5, %v3569_v60  ;;  %v3571_v10 = vpop.eup %3570 }
 0x9cd   :  { %v2822_v28 = vadd.f32 0.5, %v2821_v58  ;;  %v3573_v49 = vpop.eup %3572  ;;  %v6378_v58 = vld [vmem:[#allocation115_spill] sm:$0xff] }
 0x9ce   :  { %v2826_v52 = vadd.f32 0.5, %v2825_v27  ;;  %v2830_v61 = vmul.f32 0.5, %v3573_v49  ;;  %v6379_v27 = vld [vmem:[#allocation87_spill] sm:$0xff] }
 0x9cf   :  { %v2833_v2 = vmul.f32 %v3571_v10, %v2822_v28  ;;  %v3323_v28 = vpack.c.bf16 %v6379_v27, %v6378_v58 }
 0x9d0   :  { %v2832_v37 = vmul.f32 %v2826_v52, %v6368_v22  ;;  %v2831_v21 = vadd.f32 0.5, %v2830_v61 }
 0x9d2   :  { %v2834_v13 = vadd.f32 %v2833_v2, %v2832_v37 }
 0x9d4   :  { %3574 = vtanh.f32 %v2834_v13 }
 0x9de   :  { %v3575_v5 = vpop.eup %3574 }
 0x9df   :  { %v2836_v50 = vmul.f32 %v3575_v5, %v2831_v21 }
 0x9e1   :  { %v2837_v20 = vpack.c.bf16 %v2836_v50, %v2836_v50 }
 0x9fb   :  { %v2738_v40 = vpop.f32.mrb[52].mxu0  ;;  %v2779_v51 = vpop.f32.mrb[84].mxu1 }
 0x9fc   :  { %v2786_v62 = vadd.f32 %v2738_v40, %v6369_v30  ;;  %v2740_v44 = vpop.f32.mrb[53].mxu0  ;;  %v2781_v46 = vpop.f32.mrb[85].mxu1  ;;  %v2788_v45 = vadd.f32 %v2779_v51, %v6371_v18 }
 0x9fd   :  { %v2787_v17 = vadd.f32 %v2740_v44, %v6370_v47  ;;  %v2742_v31 = vpop.f32.mrb[54].mxu0  ;;  %v2783_v43 = vpop.f32.mrb[86].mxu1  ;;  %v2789_v26 = vadd.f32 %v2781_v46, %v6372_v1 }
 0x9fe   :  { %v2790_v32 = vmul.f32 0.5, %v2786_v62  ;;  %v2743_v48 = vpop.f32.mrb[55].mxu0  ;;  %v2784_v9 = vpop.f32.mrb[87].mxu1 }
 0x9ff   :  { %v2794_v53 = vmul.f32 0.5, %v2787_v17  ;;  %v2799_v41 = vmul.f32 0.5, %v2789_v26 }
 0xa00   :  { %3576 = vtanh.f32 %v2790_v32 }
 0xa01   :  { %3578 = vtanh.f32 %v2794_v53 }
 0xa02   :  { %3580 = vtanh.f32 %v2788_v45 }
 0xa03   :  { %3582 = vtanh.f32 %v2799_v41 }
 0xa0a   :  { %v3577_v29 = vpop.eup %3576 }
 0xa0b   :  { %v3579_v15 = vpop.eup %3578  ;;  %v2792_v63 = vmul.f32 0.5, %v3577_v29 }
 0xa0c   :  { %v2796_v4 = vmul.f32 0.5, %v3579_v15  ;;  %v3581_v55 = vpop.eup %3580 }
 0xa0d   :  { %v2793_v38 = vadd.f32 0.5, %v2792_v63  ;;  %v3583_v14 = vpop.eup %3582 }
 0xa0e   :  { %v2797_v42 = vadd.f32 0.5, %v2796_v4  ;;  %v2801_v39 = vmul.f32 0.5, %v3583_v14 }
 0xa0f   :  { %v2804_v35 = vmul.f32 %v3581_v55, %v2793_v38 }
 0xa10   :  { %v2803_v33 = vmul.f32 %v2797_v42, %v6373_v7  ;;  %v2802_v57 = vadd.f32 0.5, %v2801_v39 }
 0xa12   :  { %v5320_v54 = vadd.f32 %v2804_v35, %v2803_v33 }
 0xa14   :  { %3584 = vtanh.f32 %v5320_v54 }
 0xa1e   :  { %v3585_v56 = vpop.eup %3584 }
 0xa1f   :  { %v5323_v19 = vmul.f32 %v3585_v56, %v2802_v57 }
 0xa21   :  { %v2838_v8 = vpack.c.bf16 %v5323_v19, %v5323_v19 }
 0xa23   :  { %2871 = vmatprep.mubr.bf16.mxu0 %v2838_v8  ;;  %2912 = vmatprep.mubr.bf16.mxu1 %v2838_v8 }
 0xa24   :  { %2872 = vmatmul.mubr.bf16.vlgmr.msra.gmra.mrb[56].mxu0 %v2837_v20  ;;  %2913 = vmatmul.mubr.bf16.vlgmr.msra.gmra.mrb[88].mxu1 %v2837_v20 }
 0xa25   :  { %3338 = vmatpush3.bf16.msra.mxu0 %v5307_v23  ;;  %3353 = vmatprep.mubr.bf16.mxu0 %v3321_v0  ;;  %v6376_v23 = vld [vmem:[#allocation113_spill] sm:$0xff] }
 0xa26   :  { %3339 = vmatprep.subr.bf16.mxu0 %v3429_v36  ;;  %v3322_v60 = vpack.c.bf16 %v6377_v25, %v6376_v23 }
 0xa29   :  { %3340 = vmatpush3.bf16.msra.mxu0 %v3429_v36 }
 0xa2a   :  { %3341 = vmatprep.subr.bf16.mxu0 %v3430_v6 }
 0xa2d   :  { %3342 = vmatpush3.bf16.msra.mxu0 %v3430_v6 }
 0xa2e   :  { %3343 = vmatprep.subr.bf16.mxu0 %v3431_v59 }
 0xa31   :  { %3344 = vmatpush3.bf16.msra.mxu0 %v3431_v59 }
 0xa32   :  { %3345 = vmatprep.subr.bf16.mxu0 %v3432_v11 }
 0xa35   :  { %3346 = vmatpush3.bf16.msra.mxu0 %v3432_v11 }
 0xa36   :  { %3347 = vmatprep.subr.bf16.mxu0 %v3433_v12 }
 0xa39   :  { %3348 = vmatpush3.bf16.msra.mxu0 %v3433_v12 }
 0xa3a   :  { %3349 = vmatprep.subr.bf16.mxu0 %v3434_v24 }
 0xa3d   :  { %3350 = vmatpush3.bf16.msra.mxu0 %v3434_v24 }
 0xa3e   :  { %3351 = vmatprep.subr.bf16.mxu0 %v3435_v16 }
 0xa41   :  { %3352 = vmatpush3.bf16.msra.mxu0 %v3435_v16 }
 0xa44   :  { %3354 = vmatmul.mubr.bf16.vlgmr.msra.gmra.mrb[60].mxu0 %v3322_v60 }
 0xa45   :  { %3357 = vmatprep.mubr.bf16.mxu0 %v3323_v28 }
 0xaf7   :  { %v2873_v10 = vpop.f32.mrb[56].mxu0  ;;  %v2914_v52 = vpop.f32.mrb[88].mxu1 }
 0xaf8   :  { %v2874_v2 = vadd.f32 %v2873_v10, %v6369_v30  ;;  %v2875_v22 = vpop.f32.mrb[57].mxu0  ;;  %v2916_v37 = vpop.f32.mrb[89].mxu1  ;;  %v2915_v51 = vadd.f32 %v2914_v52, %v6371_v18 }
 0xaf9   :  { %v2876_v13 = vadd.f32 %v2875_v22, %v6370_v47  ;;  %v2877_v49 = vpop.f32.mrb[58].mxu0  ;;  %v2918_v61 = vpop.f32.mrb[90].mxu1  ;;  %v2917_v62 = vadd.f32 %v2916_v37, %v6372_v1  ;;  %v3308_v1 = vld [vmem:[%s5361_s6] ss:$0 sm:$0xff]  ;;  %s3726_s6 = smov [#allocation12]  }
 0xafa   :  { %v2921_v21 = vmul.f32 0.5, %v2874_v2  ;;  %v2878_v5 = vpop.f32.mrb[59].mxu0  ;;  %v2919_v50 = vpop.f32.mrb[91].mxu1  ;;  %s3130_s8 = sshll.u32 %s3726_s6, 4  ;;  %s3131_s8 = int_to_ptr.vmem [resolvable:$true] %s3130_s8 }
 0xafb   :  { %v2925_v40 = vmul.f32 0.5, %v2876_v13  ;;  %v2930_v44 = vmul.f32 0.5, %v2917_v62  ;;  %s3684_s9 = scalar_lea.vmem %s3131_s8, 1024  ;;  %p3689_p5 = scmp.lt.s32.totalorder %s3131_s8, %s3131_s8 }
 0xafc   :  { %3586 = vtanh.f32 %v2921_v21  ;;  %p3685_p4 = scmp.ne.s32.totalorder %s3131_s8, %s3684_s9  ;;  %p3690_p6 = scmp.lt.s32.totalorder %s3684_s9, %s3684_s9 }
 0xafd   :  { %3588 = vtanh.f32 %v2925_v40 }
 0xafe   :  { %3590 = vtanh.f32 %v2915_v51  ;;  %p3691_p7 = por %p3690_p6, %p3689_p5 }
 0xaff   :  { %3592 = vtanh.f32 %v2930_v44 }
 0xb00   :  { %p3692_p8 = pnand %p3691_p7, %p3685_p4 }
 0xb06   :  { %v3587_v46 = vpop.eup %3586 }
 0xb07   :  { %v3589_v30 = vpop.eup %3588  ;;  %v2923_v17 = vmul.f32 0.5, %v3587_v46 }
 0xb08   :  { %v2927_v31 = vmul.f32 0.5, %v3589_v30  ;;  %v3591_v43 = vpop.eup %3590 }
 0xb09   :  { %v2924_v47 = vadd.f32 0.5, %v2923_v17  ;;  %v3593_v45 = vpop.eup %3592 }
 0xb0a   :  { %v2928_v32 = vadd.f32 0.5, %v2927_v31  ;;  %v2932_v18 = vmul.f32 0.5, %v3593_v45 }
 0xb0b   :  { %v2935_v48 = vmul.f32 %v3591_v43, %v2924_v47 }
 0xb0c   :  { %v2934_v9 = vmul.f32 %v2928_v32, %v5320_v54  ;;  %v2933_v15 = vadd.f32 0.5, %v2932_v18 }
 0xb0e   :  { %v2936_v53 = vadd.f32 %v2935_v48, %v2934_v9 }
 0xb10   :  { %3594 = vtanh.f32 %v2936_v53 }
 0xb17   :  { %v3355_v26 = vpop.f32.mrb[60].mxu0 }
 0xb18   :  { %v3095_v41 = vadd.f32 %v3355_v26, %v3308_v1  ;;  %v3086_v29 = vpop.f32.mrb[61].mxu0 }
 0xb19   :  { %v3087_v63 = vadd.f32 %v3308_v1, %v3086_v29  ;;  %v3356_v4 = vpop.f32.mrb[62].mxu0 }
 0xb1a   :  { %v3595_v38 = vpop.eup %3594  ;;  %3119 = vst [vmem:[#allocation12 + $0x10] sm:$0xff] %v3095_v41  ;;  %v3098_v55 = vadd.f32 %v3356_v4, %v3308_v1  ;;  %v3089_v42 = vpop.f32.mrb[63].mxu0 }
 0xb1b   :  { %3117 = vst [vmem:[#allocation12] sm:$0xff] %v3087_v63  ;;  %v3090_v35 = vadd.f32 %v3308_v1, %v3089_v42  ;;  %v2938_v7 = vmul.f32 %v3595_v38, %v2933_v15 }
 0xb1c   :  { %3120 = vst [vmem:[#allocation12 + $0x18] sm:$0xff] %v3098_v55 }
 0xb1d   :  { %3118 = vst [vmem:[#allocation12 + $0x8] sm:$0xff] %v3090_v35  ;;  %v3324_v33 = vpack.c.bf16 %v2938_v7, %v5323_v19 }
 0xb1f   :  { %3358 = vmatmul.mubr.bf16.gmra.mrb[64].mxu0 %v3324_v33 }
 0xbf2   :  { %v3359_v54 = vpop.f32.mrb[64].mxu0 }
 0xbf3   :  { %v3111_v14 = vadd.f32 %v3359_v54, %v3308_v1  ;;  %v3102_v39 = vpop.f32.mrb[65].mxu0 }
 0xbf4   :  { %v3103_v57 = vadd.f32 %v3308_v1, %v3102_v39  ;;  %v3360_v56 = vpop.f32.mrb[66].mxu0 }
 0xbf5   :  { %3123 = vst [vmem:[#allocation12 + $0x30] sm:$0xff] %v3111_v14  ;;  %v3114_v8 = vadd.f32 %v3360_v56, %v3308_v1  ;;  %v3105_v20 = vpop.f32.mrb[67].mxu0 }
 0xbf6   :  { %3121 = vst [vmem:[#allocation12 + $0x20] sm:$0xff] %v3103_v57  ;;  %v3106_v36 = vadd.f32 %v3308_v1, %v3105_v20 }
 0xbf7   :  { %3124 = vst [vmem:[#allocation12 + $0x38] sm:$0xff] %v3114_v8 }
 0xbf8   :  { %3122 = vst [vmem:[#allocation12 + $0x28] sm:$0xff] %v3106_v36 }
 0xbf9   :  { %3695 = shalt.err (!%p3692_p8)
}
 0xbfa   :  { %s3696_s12 = scalar_lea.hbm %s5362_s7, 1024 }
 0xbfb   :  { %p3697_p9 = scmp.ne.s32.totalorder %s5362_s7, %s3696_s12  ;;  %p3700_p10 = scmp.lt.u32.totalorder %s3696_s12, %s5362_s7 }
 0xbfd   :  { %p3702_p11 = pnand %p3700_p10, %p3697_p9 }
 0xbff   :  { %3705 = shalt.err (!%p3702_p11)
}
 0xc00   :  { %s3727_s16 = smov 128   ;;  %s3728_s17 = smov 8  }
 0xc01   :  { %3136 = dma.vmem_to_hbm [thread:$0]  %s3131_s8, 1024, %s5362_s7, [#allocation6], %s3727_s16, %s3727_s16, %s3728_s17  }
 0xc02   :  { %3712 = dma.done.wait [#allocation6], 1024  }
 0xc03   :  { %3713 = vsyncadd [#allocation6], 4294966272 }
 0xc04   :  { %3140 = vsyncpa [#allocation5], 1 }
 0xc05   :  { %3141 = vsyncpa [#allocation8], 1 }
 0xc06   :  { %3142 = vsyncpa [#allocation11], 1 }
 0xc07   :  { %3143 = vsyncpa [#allocation6], 1 }

</bundles_post_ra>
